<compile_context>
chip_gen: v7x
topology: tpu7x:2x2x1
jax: 0.10.0
libtpu: 0.0.40
codegen_flags: <defaults>
</compile_context>

<pallas_src>
import functools
import math

import numpy as np
import jax
import jax.numpy as jnp
from jax.experimental import pallas as pl
from jax.experimental.pallas import tpu as pltpu


_SQRT_HALF = 0.7071067811865476
_LN_EPS = 1e-5
_NEG_INF = -1e30


# ----------------------------------------------------------------------------
# In-kernel math helpers (all pure 2-D / elementwise ops)
# ----------------------------------------------------------------------------
def _erf_approx(x):
    # Abramowitz & Stegun 7.1.26 (|error| <= 1.5e-7): float32-accurate erf.
    p = 0.3275911
    a1, a2, a3, a4, a5 = 0.254829592, -0.284496736, 1.421413741, -1.453152027, 1.061405429
    ax = jnp.abs(x)
    t = 1.0 / (1.0 + p * ax)
    poly = t * (a1 + t * (a2 + t * (a3 + t * (a4 + t * a5))))
    y = 1.0 - poly * jnp.exp(-ax * ax)
    return jnp.where(x >= 0.0, y, -y)


def _gelu(x):
    # exact (erf-based) GELU, matching torch.nn.GELU() default.
    return 0.5 * x * (1.0 + _erf_approx(x * _SQRT_HALF))


def _layernorm(z, g, b):
    mu = jnp.mean(z, axis=-1, keepdims=True)
    zc = z - mu
    var = jnp.mean(zc * zc, axis=-1, keepdims=True)
    return zc * jax.lax.rsqrt(var + _LN_EPS) * g + b


def _mha(q_in, kv_in, wts, bs, head_mask, bias, n_heads):
    """Multi-head attention with sublane-stacked heads.

    q_in: (Rq, D), kv_in: (Rk, D).  wts/bs: [q, k, v, o] projection params.
    head_mask: (H*Rq, D) 0/1 f32 mask -- row block h keeps only head-h lanes.
    bias: (H*Rq, Rk) additive block-diagonal mask (0 in-group, -1e30 otherwise),
      identical for every head block (host-built, grid-invariant input).

    All heads share ONE score matmul, ONE softmax chain and ONE PV matmul:
      S[h*Rq+q, j]  = <Q[q, lanes of head h], K[j, lanes of head h]>
      PV[h*Rq+q, :] = P_h[q, :] @ V
      concat(heads)[q, h*dh:(h+1)*dh] = sum over sublane blocks of PV*head_mask.
    """
    rq, d_model = q_in.shape
    dh = d_model // n_heads
    scale = 1.0 / math.sqrt(dh)

    # TODO(synk): for d_model >= 128, pack Wq/Wk/Wv into one (D, 3D) matmul and
    # use bf16 matmul operands; at D=32 the separate f32 dots are cheaper.
    q = jnp.dot(q_in, wts[0], preferred_element_type=jnp.float32) + bs[0]
    k = jnp.dot(kv_in, wts[1], preferred_element_type=jnp.float32) + bs[1]
    v = jnp.dot(kv_in, wts[2], preferred_element_type=jnp.float32) + bs[2]

    # stack heads along sublanes: row block h holds Q with only head-h lanes.
    q_stk = jnp.concatenate([q] * n_heads, axis=0) * head_mask          # (H*Rq, D)
    s = jax.lax.dot_general(q_stk, k, (((1,), (1,)), ((), ())),
                            preferred_element_type=jnp.float32) * scale + bias
    s = s - jnp.max(s, axis=-1, keepdims=True)
    e = jnp.exp(s)
    p = e * pl.reciprocal(jnp.sum(e, axis=-1, keepdims=True), approx=True)

    # one PV matmul for all heads; lane-mask then fold the H sublane blocks to
    # reproduce concat(head outputs) without any per-head matmul/concat.
    pv = jnp.dot(p, v, preferred_element_type=jnp.float32) * head_mask  # (H*Rq, D)
    o_cat = pv[0:rq]
    for h in range(1, n_heads):
        o_cat = o_cat + pv[h * rq:(h + 1) * rq]

    # single dense out-projection of the concatenated heads.
    return jnp.dot(o_cat, wts[3], preferred_element_type=jnp.float32) + bs[3]


def _mlp(x, w1, b1, w2, b2):
    h = _gelu(jnp.dot(x, w1, preferred_element_type=jnp.float32) + b1)
    return jnp.dot(h, w2, preferred_element_type=jnp.float32) + b2


# ----------------------------------------------------------------------------
# The fused DecoderLayer kernel (one grid step == one batch element)
# ----------------------------------------------------------------------------
def _decoder_layer_kernel(
        x_ref, cross_ref, router_ref,
        hmask_rows_ref, hmask_router_ref,
        bias_time_ref, bias_send_ref, bias_recv_ref, bias_cross_ref,
        attn_w_ref, attn_b_ref, ln_g_ref, ln_b_ref,
        mlp_w1_ref, mlp_b1_ref, mlp_w2_ref, mlp_b2_ref,
        dmlp_w1_ref, dmlp_b1_ref, dmlp_w2_ref, dmlp_b2_ref,
        pred_w_ref, pred_b_ref,
        out_ref,
        *, n_heads):
    x = x_ref[0]                      # (ts_d*out_seg, D), rows ordered (t, s)
    cross = cross_ref[0]              # (ts_d*in_seg,  D), rows ordered (t, e)
    router = router_ref[...]          # (out_seg*factor, D), rows ordered (s, f)
    hm_rows = hmask_rows_ref[...]     # (H*rows,   D) 0/1 head-lane mask
    hm_router = hmask_router_ref[...]  # (H*r_rows, D) 0/1 head-lane mask
    d_model = x.shape[1]

    def attn_params(idx):
        w = [attn_w_ref[4 * idx + j] for j in range(4)]   # q, k, v, o weights
        b = [attn_b_ref[4 * idx + j] for j in range(4)]   # q, k, v, o biases
        return w, b

    def add_ln(idx, a, bval):
        return _layernorm(a + bval, ln_g_ref[idx], ln_b_ref[idx])

    # ------------- TwoStageAttention: cross-time stage -----------------------
    w, b = attn_params(0)
    time_enc = _mha(x, x, w, b, hm_rows, bias_time_ref[...], n_heads)
    dim_in = add_ln(0, x, time_enc)                                   # norm1
    dim_in = add_ln(1, dim_in, _mlp(dim_in, mlp_w1_ref[0], mlp_b1_ref[0],
                                    mlp_w2_ref[0], mlp_b2_ref[0]))    # norm2

    # ------------- TwoStageAttention: cross-dimension (router) stage ---------
    w, b = attn_params(1)
    dim_buffer = _mha(router, dim_in, w, b, hm_router, bias_send_ref[...], n_heads)

    w, b = attn_params(2)
    dim_receive = _mha(dim_in, dim_buffer, w, b, hm_rows, bias_recv_ref[...], n_heads)
    dim_enc = add_ln(2, dim_in, dim_receive)                          # norm3
    dim_enc = add_ln(3, dim_enc, _mlp(dim_enc, mlp_w1_ref[1], mlp_b1_ref[1],
                                      mlp_w2_ref[1], mlp_b2_ref[1]))  # norm4

    # ------------- cross attention + decoder head ----------------------------
    w, b = attn_params(3)
    tmp = _mha(dim_enc, cross, w, b, hm_rows, bias_cross_ref[...], n_heads)
    y = add_ln(4, dim_enc, tmp)                                       # norm1
    dec = add_ln(5, y, _mlp(y, dmlp_w1_ref[...], dmlp_b1_ref[...],
                            dmlp_w2_ref[...], dmlp_b2_ref[...]))      # norm2

    pred = (jnp.dot(dec, pred_w_ref[...],
                    preferred_element_type=jnp.float32) + pred_b_ref[...])
    # lane-dense single store: [dec | pred] -> one writeback, split in wrapper.
    out_ref[0] = jnp.concatenate([dec, pred], axis=-1)


# ----------------------------------------------------------------------------
# Host-side constant builders (grid-invariant masks / additive biases)
# ----------------------------------------------------------------------------
def _head_mask(rq, d_model, n_heads):
    """(H*rq, D) 0/1 mask: row block h keeps only the lanes of head h."""
    dh = d_model // n_heads
    h_row = np.repeat(np.arange(n_heads), rq)
    h_lane = np.arange(d_model) // dh
    return (h_row[:, None] == h_lane[None, :]).astype(np.float32)


def _stacked_bias(q_grp, k_grp, n_heads):
    """(H*Rq, Rk) additive mask: 0 where query/key share a logical sequence,
    -1e30 elsewhere, tiled over the H sublane-stacked head blocks."""
    m = q_grp[:, None] == k_grp[None, :]
    bias = np.where(m, 0.0, _NEG_INF).astype(np.float32)
    return np.tile(bias, (n_heads, 1))


# ----------------------------------------------------------------------------
# pallas_call wrapper
# ----------------------------------------------------------------------------
def _full_spec(arr):
    nd = arr.ndim
    return pl.BlockSpec(tuple(arr.shape), lambda i, _nd=nd: (0,) * _nd)


def decoder_layer_forward(x, cross, params, n_heads):
    b, ts_d, out_seg, d_model = x.shape
    in_seg = cross.shape[2]
    tsa = params['self_attention']
    factor = tsa['router'].shape[1]
    seg_len = params['linear_pred']['w'].shape[1]
    rows = ts_d * out_seg
    c_rows = ts_d * in_seg
    r_rows = out_seg * factor

    # Flatten to lane-dense 2-D-per-batch layouts (free reshapes in XLA).
    x2 = x.reshape(b, rows, d_model)
    cross2 = cross.reshape(b, c_rows, d_model)
    router2 = tsa['router'].reshape(r_rows, d_model)

    # Grid-invariant head-lane masks and block-diagonal attention biases,
    # built once on the host (they only depend on static shapes).
    hmask_rows = jnp.asarray(_head_mask(rows, d_model, n_heads))
    hmask_router = jnp.asarray(_head_mask(r_rows, d_model, n_heads))
    grp_t = np.arange(rows) // out_seg       # time index of a (t, s) row
    grp_s = np.arange(rows) % out_seg        # segment index of a (t, s) row
    grp_r = np.arange(r_rows) // factor      # segment index of a router (s, f) row
    grp_c = np.arange(c_rows) // in_seg      # time index of a cross (t, e) row
    bias_time = jnp.asarray(_stacked_bias(grp_t, grp_t, n_heads))
    bias_send = jnp.asarray(_stacked_bias(grp_r, grp_s, n_heads))
    bias_recv = jnp.asarray(_stacked_bias(grp_s, grp_r, n_heads))
    bias_cross = jnp.asarray(_stacked_bias(grp_t, grp_c, n_heads))

    # Pack weights so the kernel takes a small number of resident VMEM blocks.
    attn_layers = [tsa['time_attention'], tsa['dim_sender'], tsa['dim_receiver'],
                   params['cross_attention']]
    attn_w = jnp.stack([a[nm]['w'] for a in attn_layers for nm in ('q', 'k', 'v', 'o')])
    attn_b = jnp.stack([a[nm]['b'] for a in attn_layers for nm in ('q', 'k', 'v', 'o')])
    ln_list = [tsa['norm1'], tsa['norm2'], tsa['norm3'], tsa['norm4'],
               params['norm1'], params['norm2']]
    ln_g = jnp.stack([l['g'] for l in ln_list])
    ln_b = jnp.stack([l['b'] for l in ln_list])
    mlp_w1 = jnp.stack([tsa['mlp1']['fc1']['w'], tsa['mlp2']['fc1']['w']])
    mlp_b1 = jnp.stack([tsa['mlp1']['fc1']['b'], tsa['mlp2']['fc1']['b']])
    mlp_w2 = jnp.stack([tsa['mlp1']['fc2']['w'], tsa['mlp2']['fc2']['w']])
    mlp_b2 = jnp.stack([tsa['mlp1']['fc2']['b'], tsa['mlp2']['fc2']['b']])
    dmlp = params['mlp1']
    pred_p = params['linear_pred']

    operands = (x2, cross2, router2,
                hmask_rows, hmask_router,
                bias_time, bias_send, bias_recv, bias_cross,
                attn_w, attn_b, ln_g, ln_b,
                mlp_w1, mlp_b1, mlp_w2, mlp_b2,
                dmlp['fc1']['w'], dmlp['fc1']['b'],
                dmlp['fc2']['w'], dmlp['fc2']['b'],
                pred_p['w'], pred_p['b'])

    # Weights/masks use constant index_maps (grid-invariant, no re-fetch across
    # steps).  TODO(synk): for production d_model on v7x, mark these with
    # pipeline_mode=pl.Buffered(1) to avoid double-buffering under 64 MiB VMEM.
    in_specs = [pl.BlockSpec((1, rows, d_model), lambda i: (i, 0, 0)),
                pl.BlockSpec((1, c_rows, d_model), lambda i: (i, 0, 0))]
    in_specs += [_full_spec(a) for a in operands[2:]]

    kernel = functools.partial(_decoder_layer_kernel, n_heads=n_heads)

    out = pl.pallas_call(
        kernel,
        out_shape=jax.ShapeDtypeStruct((b, rows, d_model + seg_len), jnp.float32),
        grid=(b,),
        in_specs=in_specs,
        out_specs=pl.BlockSpec((1, rows, d_model + seg_len), lambda i: (i, 0, 0)),
        compiler_params=pltpu.CompilerParams(
            dimension_semantics=("parallel",),
            vmem_limit_bytes=32 * 1024 * 1024),
    )(*operands)

    dec_output = out[..., :d_model].reshape(b, ts_d, out_seg, d_model)
    layer_predict = out[..., d_model:]        # (b, ts_d*out_seg, seg_len)
    return dec_output, layer_predict


# ----------------------------------------------------------------------------
# Deterministic parameter construction (synthetic weights, no checkpoints)
# ----------------------------------------------------------------------------
def make_linear(key, d_in, d_out, scale=0.05):
    kw, kb = jax.random.split(key)
    return {'w': jax.random.normal(kw, (d_in, d_out), jnp.float32) * scale,
            'b': jax.random.normal(kb, (1, d_out), jnp.float32) * scale}


def make_attn(key, d_model):
    kq, kk, kv, ko = jax.random.split(key, 4)
    return {'q': make_linear(kq, d_model, d_model),
            'k': make_linear(kk, d_model, d_model),
            'v': make_linear(kv, d_model, d_model),
            'o': make_linear(ko, d_model, d_model)}


def make_ln(d_model):
    return {'g': jnp.ones((1, d_model), jnp.float32),
            'b': jnp.zeros((1, d_model), jnp.float32)}


def make_mlp(key, d_in, d_hidden):
    k1, k2 = jax.random.split(key)
    return {'fc1': make_linear(k1, d_in, d_hidden),
            'fc2': make_linear(k2, d_hidden, d_in)}


def make_params(key, *, seg_len, d_model, n_heads, d_ff, out_seg_num, factor):
    ks = jax.random.split(key, 10)
    tsa = {
        'time_attention': make_attn(ks[0], d_model),
        'dim_sender': make_attn(ks[1], d_model),
        'dim_receiver': make_attn(ks[2], d_model),
        'router': jax.random.normal(ks[3], (out_seg_num, factor, d_model), jnp.float32),
        'norm1': make_ln(d_model), 'norm2': make_ln(d_model),
        'norm3': make_ln(d_model), 'norm4': make_ln(d_model),
        'mlp1': make_mlp(ks[4], d_model, d_ff),
        'mlp2': make_mlp(ks[5], d_model, d_ff),
    }
    return {
        'self_attention': tsa,
        'cross_attention': make_attn(ks[6], d_model),
        'norm1': make_ln(d_model), 'norm2': make_ln(d_model),
        'mlp1': make_mlp(ks[7], d_model, d_model),   # Linear(d,d) GELU Linear(d,d)
        'linear_pred': make_linear(ks[8], d_model, seg_len),
    }


# ----------------------------------------------------------------------------
# Pure-JAX reference (for correctness check of the Pallas kernel)
# ----------------------------------------------------------------------------
def _ref_linear(x, lin):
    return jnp.einsum('...d,de->...e', x, lin['w'], precision='highest') + lin['b'][0]


def _ref_ln(z, ln):
    mu = jnp.mean(z, -1, keepdims=True)
    var = jnp.mean((z - mu) ** 2, -1, keepdims=True)
    return (z - mu) / jnp.sqrt(var + _LN_EPS) * ln['g'][0] + ln['b'][0]


def _ref_gelu(x):
    return 0.5 * x * (1.0 + jax.scipy.special.erf(x * _SQRT_HALF))


def _ref_mlp(x, mlp):
    return _ref_linear(_ref_gelu(_ref_linear(x, mlp['fc1'])), mlp['fc2'])


def _ref_mha(q_in, kv_in, p, n_heads):
    B, Lq, D = q_in.shape
    Lk = kv_in.shape[1]
    dh = D // n_heads
    q = _ref_linear(q_in, p['q']).reshape(B, Lq, n_heads, dh)
    k = _ref_linear(kv_in, p['k']).reshape(B, Lk, n_heads, dh)
    v = _ref_linear(kv_in, p['v']).reshape(B, Lk, n_heads, dh)
    s = jnp.einsum('blhe,bshe->bhls', q, k, precision='highest') / math.sqrt(dh)
    a = jax.nn.softmax(s, axis=-1)
    o = jnp.einsum('bhls,bshd->blhd', a, v, precision='highest').reshape(B, Lq, D)
    return _ref_linear(o, p['o'])


def ref_two_stage_attention(x, p, n_heads):
    b, ts_d, seg_num, D = x.shape
    time_in = x.reshape(b * ts_d, seg_num, D)
    time_enc = _ref_mha(time_in, time_in, p['time_attention'], n_heads)
    dim_in = _ref_ln(time_in + time_enc, p['norm1'])
    dim_in = _ref_ln(dim_in + _ref_mlp(dim_in, p['mlp1']), p['norm2'])
    dim_send = dim_in.reshape(b, ts_d, seg_num, D).transpose(0, 2, 1, 3).reshape(
        b * seg_num, ts_d, D)
    batch_router = jnp.tile(p['router'], (b, 1, 1))
    dim_buffer = _ref_mha(batch_router, dim_send, p['dim_sender'], n_heads)
    dim_receive = _ref_mha(dim_send, dim_buffer, p['dim_receiver'], n_heads)
    dim_enc = _ref_ln(dim_send + dim_receive, p['norm3'])
    dim_enc = _ref_ln(dim_enc + _ref_mlp(dim_enc, p['mlp2']), p['norm4'])
    return dim_enc.reshape(b, seg_num, ts_d, D).transpose(0, 2, 1, 3)


def ref_decoder_forward(x, cross, params, n_heads):
    b, ts_d, out_seg, D = x.shape
    x = ref_two_stage_attention(x, params['self_attention'], n_heads)
    x2 = x.reshape(b * ts_d, out_seg, D)
    cross2 = cross.reshape(b * ts_d, cross.shape[2], D)
    tmp = _ref_mha(x2, cross2, params['cross_attention'], n_heads)
    x2 = _ref_ln(x2 + tmp, params['norm1'])
    dec = _ref_ln(x2 + _ref_mlp(x2, params['mlp1']), params['norm2'])
    dec_output = dec.reshape(b, ts_d, out_seg, D)
    layer_predict = _ref_linear(dec_output, params['linear_pred'])
    return dec_output, layer_predict.reshape(b, ts_d * out_seg, -1)


# ----------------------------------------------------------------------------
if __name__ == "__main__":
    B, TS_D, OUT_SEG, IN_SEG = 2, 3, 4, 6
    D_MODEL, N_HEADS, D_FF = 32, 4, 64
    SEG_LEN, FACTOR = 12, 2

    key = jax.random.PRNGKey(0)
    kx, kc, kp = jax.random.split(key, 3)
    x = jax.random.normal(kx, (B, TS_D, OUT_SEG, D_MODEL), jnp.float32)
    cross = jax.random.normal(kc, (B, TS_D, IN_SEG, D_MODEL), jnp.float32)
    params = make_params(kp, seg_len=SEG_LEN, d_model=D_MODEL, n_heads=N_HEADS,
                         d_ff=D_FF, out_seg_num=OUT_SEG, factor=FACTOR)

    fwd = jax.jit(functools.partial(decoder_layer_forward, n_heads=N_HEADS))
    dec_out, layer_pred = fwd(x, cross, params)
    jax.block_until_ready((dec_out, layer_pred))

    # Shape checks (match the PyTorch module's outputs).
    assert dec_out.shape == (B, TS_D, OUT_SEG, D_MODEL)
    assert layer_pred.shape == (B, TS_D * OUT_SEG, SEG_LEN)

    # Numerical check against a pure-JAX reference (approx-reciprocal softmax
    # and the erf polynomial add a few 1e-4 of absolute error at most).
    ref_dec, ref_pred = ref_decoder_forward(x, cross, params, N_HEADS)
    err_dec = float(jnp.max(jnp.abs(dec_out - ref_dec)))
    err_pred = float(jnp.max(jnp.abs(layer_pred - ref_pred)))
    finite = bool(jnp.all(jnp.isfinite(dec_out)) & jnp.all(jnp.isfinite(layer_pred)))

    if finite and err_dec < 1e-2 and err_pred < 1e-2:
        print("KERNEL_OK")
    else:
        print(f"MISMATCH dec_err={err_dec} pred_err={err_pred} finite={finite}")
</pallas_src>

<mosaic_0001>
module attributes {stable_mosaic.version = 11 : i64} {
  func.func @_decoder_layer_kernel(%arg0: i32, %arg1: memref<1x12x32xf32, #tpu.memory_space<vmem>>, %arg2: memref<1x18x32xf32, #tpu.memory_space<vmem>>, %arg3: memref<8x32xf32, #tpu.memory_space<vmem>>, %arg4: memref<48x32xf32, #tpu.memory_space<vmem>>, %arg5: memref<32x32xf32, #tpu.memory_space<vmem>>, %arg6: memref<48x12xf32, #tpu.memory_space<vmem>>, %arg7: memref<32x12xf32, #tpu.memory_space<vmem>>, %arg8: memref<48x8xf32, #tpu.memory_space<vmem>>, %arg9: memref<48x18xf32, #tpu.memory_space<vmem>>, %arg10: memref<16x32x32xf32, #tpu.memory_space<vmem>>, %arg11: memref<16x1x32xf32, #tpu.memory_space<vmem>>, %arg12: memref<6x1x32xf32, #tpu.memory_space<vmem>>, %arg13: memref<6x1x32xf32, #tpu.memory_space<vmem>>, %arg14: memref<2x32x64xf32, #tpu.memory_space<vmem>>, %arg15: memref<2x1x64xf32, #tpu.memory_space<vmem>>, %arg16: memref<2x64x32xf32, #tpu.memory_space<vmem>>, %arg17: memref<2x1x32xf32, #tpu.memory_space<vmem>>, %arg18: memref<32x32xf32, #tpu.memory_space<vmem>>, %arg19: memref<1x32xf32, #tpu.memory_space<vmem>>, %arg20: memref<32x32xf32, #tpu.memory_space<vmem>>, %arg21: memref<1x32xf32, #tpu.memory_space<vmem>>, %arg22: memref<32x12xf32, #tpu.memory_space<vmem>>, %arg23: memref<1x12xf32, #tpu.memory_space<vmem>>, %arg24: memref<1x12x44xf32, #tpu.memory_space<vmem>>) attributes {dimension_semantics = [#tpu.dimension_semantics<parallel>], iteration_bounds = array<i64: 2>, scalar_prefetch = 0 : i64, scratch_operands = 0 : i64, tpu.core_type = #tpu.core_type<tc>, window_params = [{transform_indices = @transform_0, window_bounds = array<i64: 1, 12, 32>}, {transform_indices = @transform_1, window_bounds = array<i64: 1, 18, 32>}, {pipeline_mode = #tpu.pipeline_mode<synchronous>, transform_indices = @transform_2, window_bounds = array<i64: 8, 32>}, {pipeline_mode = #tpu.pipeline_mode<synchronous>, transform_indices = @transform_3, window_bounds = array<i64: 48, 32>}, {pipeline_mode = #tpu.pipeline_mode<synchronous>, transform_indices = @transform_4, window_bounds = array<i64: 32, 32>}, {pipeline_mode = #tpu.pipeline_mode<synchronous>, transform_indices = @transform_5, window_bounds = array<i64: 48, 12>}, {pipeline_mode = #tpu.pipeline_mode<synchronous>, transform_indices = @transform_6, window_bounds = array<i64: 32, 12>}, {pipeline_mode = #tpu.pipeline_mode<synchronous>, transform_indices = @transform_7, window_bounds = array<i64: 48, 8>}, {pipeline_mode = #tpu.pipeline_mode<synchronous>, transform_indices = @transform_8, window_bounds = array<i64: 48, 18>}, {pipeline_mode = #tpu.pipeline_mode<synchronous>, transform_indices = @transform_9, window_bounds = array<i64: 16, 32, 32>}, {pipeline_mode = #tpu.pipeline_mode<synchronous>, transform_indices = @transform_10, window_bounds = array<i64: 16, 1, 32>}, {pipeline_mode = #tpu.pipeline_mode<synchronous>, transform_indices = @transform_11, window_bounds = array<i64: 6, 1, 32>}, {pipeline_mode = #tpu.pipeline_mode<synchronous>, transform_indices = @transform_12, window_bounds = array<i64: 6, 1, 32>}, {pipeline_mode = #tpu.pipeline_mode<synchronous>, transform_indices = @transform_13, window_bounds = array<i64: 2, 32, 64>}, {pipeline_mode = #tpu.pipeline_mode<synchronous>, transform_indices = @transform_14, window_bounds = array<i64: 2, 1, 64>}, {pipeline_mode = #tpu.pipeline_mode<synchronous>, transform_indices = @transform_15, window_bounds = array<i64: 2, 64, 32>}, {pipeline_mode = #tpu.pipeline_mode<synchronous>, transform_indices = @transform_16, window_bounds = array<i64: 2, 1, 32>}, {pipeline_mode = #tpu.pipeline_mode<synchronous>, transform_indices = @transform_17, window_bounds = array<i64: 32, 32>}, {pipeline_mode = #tpu.pipeline_mode<synchronous>, transform_indices = @transform_18, window_bounds = array<i64: 1, 32>}, {pipeline_mode = #tpu.pipeline_mode<synchronous>, transform_indices = @transform_19, window_bounds = array<i64: 32, 32>}, {pipeline_mode = #tpu.pipeline_mode<synchronous>, transform_indices = @transform_20, window_bounds = array<i64: 1, 32>}, {pipeline_mode = #tpu.pipeline_mode<synchronous>, transform_indices = @transform_21, window_bounds = array<i64: 32, 12>}, {pipeline_mode = #tpu.pipeline_mode<synchronous>, transform_indices = @transform_22, window_bounds = array<i64: 1, 12>}, {transform_indices = @transform_23, window_bounds = array<i64: 1, 12, 44>}]} {
    %c0 = arith.constant 0 : index
    %c0_0 = arith.constant 0 : index
    %c0_1 = arith.constant 0 : index
    %0 = vector.load %arg1[%c0, %c0_0, %c0_1] : memref<1x12x32xf32, #tpu.memory_space<vmem>>, vector<1x12x32xf32>
    %1 = vector.shape_cast %0 : vector<1x12x32xf32> to vector<12x32xf32>
    %c0_2 = arith.constant 0 : index
    %c0_3 = arith.constant 0 : index
    %c0_4 = arith.constant 0 : index
    %2 = vector.load %arg2[%c0_2, %c0_3, %c0_4] : memref<1x18x32xf32, #tpu.memory_space<vmem>>, vector<1x18x32xf32>
    %3 = vector.shape_cast %2 : vector<1x18x32xf32> to vector<18x32xf32>
    %c0_5 = arith.constant 0 : index
    %c0_6 = arith.constant 0 : index
    %4 = vector.load %arg3[%c0_5, %c0_6] : memref<8x32xf32, #tpu.memory_space<vmem>>, vector<8x32xf32>
    %c0_7 = arith.constant 0 : index
    %c0_8 = arith.constant 0 : index
    %5 = vector.load %arg4[%c0_7, %c0_8] : memref<48x32xf32, #tpu.memory_space<vmem>>, vector<48x32xf32>
    %c0_9 = arith.constant 0 : index
    %c0_10 = arith.constant 0 : index
    %6 = vector.load %arg5[%c0_9, %c0_10] : memref<32x32xf32, #tpu.memory_space<vmem>>, vector<32x32xf32>
    %c0_11 = arith.constant 0 : index
    %c0_12 = arith.constant 0 : index
    %c0_13 = arith.constant 0 : index
    %7 = vector.load %arg10[%c0_11, %c0_12, %c0_13] : memref<16x32x32xf32, #tpu.memory_space<vmem>>, vector<1x32x32xf32>
    %8 = vector.shape_cast %7 : vector<1x32x32xf32> to vector<32x32xf32>
    %c1 = arith.constant 1 : index
    %c0_14 = arith.constant 0 : index
    %c0_15 = arith.constant 0 : index
    %9 = vector.load %arg10[%c1, %c0_14, %c0_15] : memref<16x32x32xf32, #tpu.memory_space<vmem>>, vector<1x32x32xf32>
    %10 = vector.shape_cast %9 : vector<1x32x32xf32> to vector<32x32xf32>
    %c2 = arith.constant 2 : index
    %c0_16 = arith.constant 0 : index
    %c0_17 = arith.constant 0 : index
    %11 = vector.load %arg10[%c2, %c0_16, %c0_17] : memref<16x32x32xf32, #tpu.memory_space<vmem>>, vector<1x32x32xf32>
    %12 = vector.shape_cast %11 : vector<1x32x32xf32> to vector<32x32xf32>
    %c3 = arith.constant 3 : index
    %c0_18 = arith.constant 0 : index
    %c0_19 = arith.constant 0 : index
    %13 = vector.load %arg10[%c3, %c0_18, %c0_19] : memref<16x32x32xf32, #tpu.memory_space<vmem>>, vector<1x32x32xf32>
    %14 = vector.shape_cast %13 : vector<1x32x32xf32> to vector<32x32xf32>
    %c0_20 = arith.constant 0 : index
    %c0_21 = arith.constant 0 : index
    %c0_22 = arith.constant 0 : index
    %15 = vector.load %arg11[%c0_20, %c0_21, %c0_22] : memref<16x1x32xf32, #tpu.memory_space<vmem>>, vector<1x1x32xf32>
    %16 = vector.shape_cast %15 : vector<1x1x32xf32> to vector<1x32xf32>
    %c1_23 = arith.constant 1 : index
    %c0_24 = arith.constant 0 : index
    %c0_25 = arith.constant 0 : index
    %17 = vector.load %arg11[%c1_23, %c0_24, %c0_25] : memref<16x1x32xf32, #tpu.memory_space<vmem>>, vector<1x1x32xf32>
    %18 = vector.shape_cast %17 : vector<1x1x32xf32> to vector<1x32xf32>
    %c2_26 = arith.constant 2 : index
    %c0_27 = arith.constant 0 : index
    %c0_28 = arith.constant 0 : index
    %19 = vector.load %arg11[%c2_26, %c0_27, %c0_28] : memref<16x1x32xf32, #tpu.memory_space<vmem>>, vector<1x1x32xf32>
    %20 = vector.shape_cast %19 : vector<1x1x32xf32> to vector<1x32xf32>
    %c3_29 = arith.constant 3 : index
    %c0_30 = arith.constant 0 : index
    %c0_31 = arith.constant 0 : index
    %21 = vector.load %arg11[%c3_29, %c0_30, %c0_31] : memref<16x1x32xf32, #tpu.memory_space<vmem>>, vector<1x1x32xf32>
    %22 = vector.shape_cast %21 : vector<1x1x32xf32> to vector<1x32xf32>
    %c0_32 = arith.constant 0 : index
    %c0_33 = arith.constant 0 : index
    %23 = vector.load %arg6[%c0_32, %c0_33] : memref<48x12xf32, #tpu.memory_space<vmem>>, vector<48x12xf32>
    %cst = arith.constant dense<0.000000e+00> : vector<12x32xf32>
    %24 = tpu.matmul %1, %8, %cst {dimension_numbers = #tpu.dot_dimension_numbers<[1], [0], [0], [1], [0, 0, 1, 1], [], []>} : vector<12x32xf32>, vector<32x32xf32>, vector<12x32xf32> -> vector<12x32xf32>
    %25 = vector.broadcast %16 : vector<1x32xf32> to vector<12x32xf32>
    %26 = arith.addf %24, %25 : vector<12x32xf32>
    %cst_34 = arith.constant dense<0.000000e+00> : vector<12x32xf32>
    %27 = tpu.matmul %1, %10, %cst_34 {dimension_numbers = #tpu.dot_dimension_numbers<[1], [0], [0], [1], [0, 0, 1, 1], [], []>} : vector<12x32xf32>, vector<32x32xf32>, vector<12x32xf32> -> vector<12x32xf32>
    %28 = vector.broadcast %18 : vector<1x32xf32> to vector<12x32xf32>
    %29 = arith.addf %27, %28 : vector<12x32xf32>
    %cst_35 = arith.constant dense<0.000000e+00> : vector<12x32xf32>
    %30 = tpu.matmul %1, %12, %cst_35 {dimension_numbers = #tpu.dot_dimension_numbers<[1], [0], [0], [1], [0, 0, 1, 1], [], []>} : vector<12x32xf32>, vector<32x32xf32>, vector<12x32xf32> -> vector<12x32xf32>
    %31 = vector.broadcast %20 : vector<1x32xf32> to vector<12x32xf32>
    %32 = arith.addf %30, %31 : vector<12x32xf32>
    %33 = tpu.concatenate %26, %26, %26, %26 in 0 : vector<12x32xf32>, vector<12x32xf32>, vector<12x32xf32>, vector<12x32xf32> -> vector<48x32xf32>
    %34 = arith.mulf %33, %5 : vector<48x32xf32>
    %cst_36 = arith.constant dense<0.000000e+00> : vector<48x12xf32>
    %35 = tpu.matmul %34, %29, %cst_36 {dimension_numbers = #tpu.dot_dimension_numbers<[1], [1], [0], [0], [0, 0, 1, 0], [], []>} : vector<48x32xf32>, vector<12x32xf32>, vector<48x12xf32> -> vector<48x12xf32>
    %cst_37 = arith.constant 0.353553385 : f32
    %36 = vector.broadcast %cst_37 : f32 to vector<48x12xf32>
    %37 = arith.mulf %35, %36 : vector<48x12xf32>
    %38 = arith.addf %37, %23 : vector<48x12xf32>
    %cst_38 = arith.constant dense<0xFF800000> : vector<48xf32>
    %39 = vector.multi_reduction <maximumf>, %38, %cst_38 [1] : vector<48x12xf32> to vector<48xf32>
    %40 = vector.shape_cast %39 : vector<48xf32> to vector<48x1xf32>
    %41 = vector.broadcast %40 : vector<48x1xf32> to vector<48x12xf32>
    %42 = arith.subf %38, %41 : vector<48x12xf32>
    %43 = math.exp %42 : vector<48x12xf32>
    %cst_39 = arith.constant dense<0.000000e+00> : vector<48xf32>
    %44 = vector.multi_reduction <add>, %43, %cst_39 [1] : vector<48x12xf32> to vector<48xf32>
    %45 = vector.shape_cast %44 : vector<48xf32> to vector<48x1xf32>
    %46 = tpu.reciprocal %45 {approx = true} : vector<48x1xf32> -> vector<48x1xf32>
    %47 = vector.broadcast %46 : vector<48x1xf32> to vector<48x12xf32>
    %48 = arith.mulf %43, %47 : vector<48x12xf32>
    %cst_40 = arith.constant dense<0.000000e+00> : vector<48x32xf32>
    %49 = tpu.matmul %48, %32, %cst_40 {dimension_numbers = #tpu.dot_dimension_numbers<[1], [0], [0], [1], [0, 0, 1, 1], [], []>} : vector<48x12xf32>, vector<12x32xf32>, vector<48x32xf32> -> vector<48x32xf32>
    %50 = arith.mulf %49, %5 : vector<48x32xf32>
    %51 = vector.extract_strided_slice %50 {offsets = [0, 0], sizes = [12, 32], strides = [1, 1]} : vector<48x32xf32> to vector<12x32xf32>
    %52 = vector.extract_strided_slice %50 {offsets = [12, 0], sizes = [12, 32], strides = [1, 1]} : vector<48x32xf32> to vector<12x32xf32>
    %53 = arith.addf %51, %52 : vector<12x32xf32>
    %54 = vector.extract_strided_slice %50 {offsets = [24, 0], sizes = [12, 32], strides = [1, 1]} : vector<48x32xf32> to vector<12x32xf32>
    %55 = arith.addf %53, %54 : vector<12x32xf32>
    %56 = vector.extract_strided_slice %50 {offsets = [36, 0], sizes = [12, 32], strides = [1, 1]} : vector<48x32xf32> to vector<12x32xf32>
    %57 = arith.addf %55, %56 : vector<12x32xf32>
    %cst_41 = arith.constant dense<0.000000e+00> : vector<12x32xf32>
    %58 = tpu.matmul %57, %14, %cst_41 {dimension_numbers = #tpu.dot_dimension_numbers<[1], [0], [0], [1], [0, 0, 1, 1], [], []>} : vector<12x32xf32>, vector<32x32xf32>, vector<12x32xf32> -> vector<12x32xf32>
    %59 = vector.broadcast %22 : vector<1x32xf32> to vector<12x32xf32>
    %60 = arith.addf %58, %59 : vector<12x32xf32>
    %61 = arith.addf %1, %60 : vector<12x32xf32>
    %c0_42 = arith.constant 0 : index
    %c0_43 = arith.constant 0 : index
    %c0_44 = arith.constant 0 : index
    %62 = vector.load %arg12[%c0_42, %c0_43, %c0_44] : memref<6x1x32xf32, #tpu.memory_space<vmem>>, vector<1x1x32xf32>
    %63 = vector.shape_cast %62 : vector<1x1x32xf32> to vector<1x32xf32>
    %c0_45 = arith.constant 0 : index
    %c0_46 = arith.constant 0 : index
    %c0_47 = arith.constant 0 : index
    %64 = vector.load %arg13[%c0_45, %c0_46, %c0_47] : memref<6x1x32xf32, #tpu.memory_space<vmem>>, vector<1x1x32xf32>
    %65 = vector.shape_cast %64 : vector<1x1x32xf32> to vector<1x32xf32>
    %cst_48 = arith.constant dense<0.000000e+00> : vector<12xf32>
    %66 = vector.multi_reduction <add>, %61, %cst_48 [1] : vector<12x32xf32> to vector<12xf32>
    %67 = vector.shape_cast %66 : vector<12xf32> to vector<12x1xf32>
    %cst_49 = arith.constant 3.200000e+01 : f32
    %68 = vector.broadcast %cst_49 : f32 to vector<12x1xf32>
    %69 = arith.divf %67, %68 : vector<12x1xf32>
    %70 = vector.broadcast %69 : vector<12x1xf32> to vector<12x32xf32>
    %71 = arith.subf %61, %70 : vector<12x32xf32>
    %72 = arith.mulf %71, %71 : vector<12x32xf32>
    %cst_50 = arith.constant dense<0.000000e+00> : vector<12xf32>
    %73 = vector.multi_reduction <add>, %72, %cst_50 [1] : vector<12x32xf32> to vector<12xf32>
    %74 = vector.shape_cast %73 : vector<12xf32> to vector<12x1xf32>
    %cst_51 = arith.constant 3.200000e+01 : f32
    %75 = vector.broadcast %cst_51 : f32 to vector<12x1xf32>
    %76 = arith.divf %74, %75 : vector<12x1xf32>
    %cst_52 = arith.constant 9.99999974E-6 : f32
    %77 = vector.broadcast %cst_52 : f32 to vector<12x1xf32>
    %78 = arith.addf %76, %77 : vector<12x1xf32>
    %79 = math.rsqrt %78 : vector<12x1xf32>
    %80 = vector.broadcast %79 : vector<12x1xf32> to vector<12x32xf32>
    %81 = arith.mulf %71, %80 : vector<12x32xf32>
    %82 = vector.broadcast %63 : vector<1x32xf32> to vector<12x32xf32>
    %83 = arith.mulf %81, %82 : vector<12x32xf32>
    %84 = vector.broadcast %65 : vector<1x32xf32> to vector<12x32xf32>
    %85 = arith.addf %83, %84 : vector<12x32xf32>
    %c0_53 = arith.constant 0 : index
    %c0_54 = arith.constant 0 : index
    %c0_55 = arith.constant 0 : index
    %86 = vector.load %arg14[%c0_53, %c0_54, %c0_55] : memref<2x32x64xf32, #tpu.memory_space<vmem>>, vector<1x32x64xf32>
    %87 = vector.shape_cast %86 : vector<1x32x64xf32> to vector<32x64xf32>
    %c0_56 = arith.constant 0 : index
    %c0_57 = arith.constant 0 : index
    %c0_58 = arith.constant 0 : index
    %88 = vector.load %arg15[%c0_56, %c0_57, %c0_58] : memref<2x1x64xf32, #tpu.memory_space<vmem>>, vector<1x1x64xf32>
    %89 = vector.shape_cast %88 : vector<1x1x64xf32> to vector<1x64xf32>
    %c0_59 = arith.constant 0 : index
    %c0_60 = arith.constant 0 : index
    %c0_61 = arith.constant 0 : index
    %90 = vector.load %arg16[%c0_59, %c0_60, %c0_61] : memref<2x64x32xf32, #tpu.memory_space<vmem>>, vector<1x64x32xf32>
    %91 = vector.shape_cast %90 : vector<1x64x32xf32> to vector<64x32xf32>
    %c0_62 = arith.constant 0 : index
    %c0_63 = arith.constant 0 : index
    %c0_64 = arith.constant 0 : index
    %92 = vector.load %arg17[%c0_62, %c0_63, %c0_64] : memref<2x1x32xf32, #tpu.memory_space<vmem>>, vector<1x1x32xf32>
    %93 = vector.shape_cast %92 : vector<1x1x32xf32> to vector<1x32xf32>
    %cst_65 = arith.constant dense<0.000000e+00> : vector<12x64xf32>
    %94 = tpu.matmul %85, %87, %cst_65 {dimension_numbers = #tpu.dot_dimension_numbers<[1], [0], [0], [1], [0, 0, 1, 1], [], []>} : vector<12x32xf32>, vector<32x64xf32>, vector<12x64xf32> -> vector<12x64xf32>
    %95 = vector.broadcast %89 : vector<1x64xf32> to vector<12x64xf32>
    %96 = arith.addf %94, %95 : vector<12x64xf32>
    %cst_66 = arith.constant 5.000000e-01 : f32
    %97 = vector.broadcast %cst_66 : f32 to vector<12x64xf32>
    %98 = arith.mulf %97, %96 : vector<12x64xf32>
    %cst_67 = arith.constant 0.707106769 : f32
    %99 = vector.broadcast %cst_67 : f32 to vector<12x64xf32>
    %100 = arith.mulf %96, %99 : vector<12x64xf32>
    %101 = math.absf %100 : vector<12x64xf32>
    %cst_68 = arith.constant 0.327591091 : f32
    %102 = vector.broadcast %cst_68 : f32 to vector<12x64xf32>
    %103 = arith.mulf %102, %101 : vector<12x64xf32>
    %cst_69 = arith.constant 1.000000e+00 : f32
    %104 = vector.broadcast %cst_69 : f32 to vector<12x64xf32>
    %105 = arith.addf %104, %103 : vector<12x64xf32>
    %cst_70 = arith.constant 1.000000e+00 : f32
    %106 = vector.broadcast %cst_70 : f32 to vector<12x64xf32>
    %107 = arith.divf %106, %105 : vector<12x64xf32>
    %cst_71 = arith.constant 1.06140542 : f32
    %108 = vector.broadcast %cst_71 : f32 to vector<12x64xf32>
    %109 = arith.mulf %107, %108 : vector<12x64xf32>
    %cst_72 = arith.constant -1.45315206 : f32
    %110 = vector.broadcast %cst_72 : f32 to vector<12x64xf32>
    %111 = arith.addf %110, %109 : vector<12x64xf32>
    %112 = arith.mulf %107, %111 : vector<12x64xf32>
    %cst_73 = arith.constant 1.42141378 : f32
    %113 = vector.broadcast %cst_73 : f32 to vector<12x64xf32>
    %114 = arith.addf %113, %112 : vector<12x64xf32>
    %115 = arith.mulf %107, %114 : vector<12x64xf32>
    %cst_74 = arith.constant -0.284496725 : f32
    %116 = vector.broadcast %cst_74 : f32 to vector<12x64xf32>
    %117 = arith.addf %116, %115 : vector<12x64xf32>
    %118 = arith.mulf %107, %117 : vector<12x64xf32>
    %cst_75 = arith.constant 0.254829586 : f32
    %119 = vector.broadcast %cst_75 : f32 to vector<12x64xf32>
    %120 = arith.addf %119, %118 : vector<12x64xf32>
    %121 = arith.mulf %107, %120 : vector<12x64xf32>
    %cst_76 = arith.constant 0.000000e+00 : f32
    %122 = vector.broadcast %cst_76 : f32 to vector<12x64xf32>
    %123 = arith.subf %122, %101 : vector<12x64xf32>
    %124 = arith.mulf %123, %101 : vector<12x64xf32>
    %125 = math.exp %124 : vector<12x64xf32>
    %126 = arith.mulf %121, %125 : vector<12x64xf32>
    %cst_77 = arith.constant 1.000000e+00 : f32
    %127 = vector.broadcast %cst_77 : f32 to vector<12x64xf32>
    %128 = arith.subf %127, %126 : vector<12x64xf32>
    %cst_78 = arith.constant 0.000000e+00 : f32
    %129 = vector.broadcast %cst_78 : f32 to vector<12x64xf32>
    %130 = arith.cmpf oge, %100, %129 : vector<12x64xf32>
    %cst_79 = arith.constant 0.000000e+00 : f32
    %131 = vector.broadcast %cst_79 : f32 to vector<12x64xf32>
    %132 = arith.subf %131, %128 : vector<12x64xf32>
    %133 = arith.select %130, %128, %132 : vector<12x64xi1>, vector<12x64xf32>
    %cst_80 = arith.constant 1.000000e+00 : f32
    %134 = vector.broadcast %cst_80 : f32 to vector<12x64xf32>
    %135 = arith.addf %134, %133 : vector<12x64xf32>
    %136 = arith.mulf %98, %135 : vector<12x64xf32>
    %cst_81 = arith.constant dense<0.000000e+00> : vector<12x32xf32>
    %137 = tpu.matmul %136, %91, %cst_81 {dimension_numbers = #tpu.dot_dimension_numbers<[1], [0], [0], [1], [0, 0, 1, 1], [], []>} : vector<12x64xf32>, vector<64x32xf32>, vector<12x32xf32> -> vector<12x32xf32>
    %138 = vector.broadcast %93 : vector<1x32xf32> to vector<12x32xf32>
    %139 = arith.addf %137, %138 : vector<12x32xf32>
    %140 = arith.addf %85, %139 : vector<12x32xf32>
    %c1_82 = arith.constant 1 : index
    %c0_83 = arith.constant 0 : index
    %c0_84 = arith.constant 0 : index
    %141 = vector.load %arg12[%c1_82, %c0_83, %c0_84] : memref<6x1x32xf32, #tpu.memory_space<vmem>>, vector<1x1x32xf32>
    %142 = vector.shape_cast %141 : vector<1x1x32xf32> to vector<1x32xf32>
    %c1_85 = arith.constant 1 : index
    %c0_86 = arith.constant 0 : index
    %c0_87 = arith.constant 0 : index
    %143 = vector.load %arg13[%c1_85, %c0_86, %c0_87] : memref<6x1x32xf32, #tpu.memory_space<vmem>>, vector<1x1x32xf32>
    %144 = vector.shape_cast %143 : vector<1x1x32xf32> to vector<1x32xf32>
    %cst_88 = arith.constant dense<0.000000e+00> : vector<12xf32>
    %145 = vector.multi_reduction <add>, %140, %cst_88 [1] : vector<12x32xf32> to vector<12xf32>
    %146 = vector.shape_cast %145 : vector<12xf32> to vector<12x1xf32>
    %cst_89 = arith.constant 3.200000e+01 : f32
    %147 = vector.broadcast %cst_89 : f32 to vector<12x1xf32>
    %148 = arith.divf %146, %147 : vector<12x1xf32>
    %149 = vector.broadcast %148 : vector<12x1xf32> to vector<12x32xf32>
    %150 = arith.subf %140, %149 : vector<12x32xf32>
    %151 = arith.mulf %150, %150 : vector<12x32xf32>
    %cst_90 = arith.constant dense<0.000000e+00> : vector<12xf32>
    %152 = vector.multi_reduction <add>, %151, %cst_90 [1] : vector<12x32xf32> to vector<12xf32>
    %153 = vector.shape_cast %152 : vector<12xf32> to vector<12x1xf32>
    %cst_91 = arith.constant 3.200000e+01 : f32
    %154 = vector.broadcast %cst_91 : f32 to vector<12x1xf32>
    %155 = arith.divf %153, %154 : vector<12x1xf32>
    %cst_92 = arith.constant 9.99999974E-6 : f32
    %156 = vector.broadcast %cst_92 : f32 to vector<12x1xf32>
    %157 = arith.addf %155, %156 : vector<12x1xf32>
    %158 = math.rsqrt %157 : vector<12x1xf32>
    %159 = vector.broadcast %158 : vector<12x1xf32> to vector<12x32xf32>
    %160 = arith.mulf %150, %159 : vector<12x32xf32>
    %161 = vector.broadcast %142 : vector<1x32xf32> to vector<12x32xf32>
    %162 = arith.mulf %160, %161 : vector<12x32xf32>
    %163 = vector.broadcast %144 : vector<1x32xf32> to vector<12x32xf32>
    %164 = arith.addf %162, %163 : vector<12x32xf32>
    %c4 = arith.constant 4 : index
    %c0_93 = arith.constant 0 : index
    %c0_94 = arith.constant 0 : index
    %165 = vector.load %arg10[%c4, %c0_93, %c0_94] : memref<16x32x32xf32, #tpu.memory_space<vmem>>, vector<1x32x32xf32>
    %166 = vector.shape_cast %165 : vector<1x32x32xf32> to vector<32x32xf32>
    %c5 = arith.constant 5 : index
    %c0_95 = arith.constant 0 : index
    %c0_96 = arith.constant 0 : index
    %167 = vector.load %arg10[%c5, %c0_95, %c0_96] : memref<16x32x32xf32, #tpu.memory_space<vmem>>, vector<1x32x32xf32>
    %168 = vector.shape_cast %167 : vector<1x32x32xf32> to vector<32x32xf32>
    %c6 = arith.constant 6 : index
    %c0_97 = arith.constant 0 : index
    %c0_98 = arith.constant 0 : index
    %169 = vector.load %arg10[%c6, %c0_97, %c0_98] : memref<16x32x32xf32, #tpu.memory_space<vmem>>, vector<1x32x32xf32>
    %170 = vector.shape_cast %169 : vector<1x32x32xf32> to vector<32x32xf32>
    %c7 = arith.constant 7 : index
    %c0_99 = arith.constant 0 : index
    %c0_100 = arith.constant 0 : index
    %171 = vector.load %arg10[%c7, %c0_99, %c0_100] : memref<16x32x32xf32, #tpu.memory_space<vmem>>, vector<1x32x32xf32>
    %172 = vector.shape_cast %171 : vector<1x32x32xf32> to vector<32x32xf32>
    %c4_101 = arith.constant 4 : index
    %c0_102 = arith.constant 0 : index
    %c0_103 = arith.constant 0 : index
    %173 = vector.load %arg11[%c4_101, %c0_102, %c0_103] : memref<16x1x32xf32, #tpu.memory_space<vmem>>, vector<1x1x32xf32>
    %174 = vector.shape_cast %173 : vector<1x1x32xf32> to vector<1x32xf32>
    %c5_104 = arith.constant 5 : index
    %c0_105 = arith.constant 0 : index
    %c0_106 = arith.constant 0 : index
    %175 = vector.load %arg11[%c5_104, %c0_105, %c0_106] : memref<16x1x32xf32, #tpu.memory_space<vmem>>, vector<1x1x32xf32>
    %176 = vector.shape_cast %175 : vector<1x1x32xf32> to vector<1x32xf32>
    %c6_107 = arith.constant 6 : index
    %c0_108 = arith.constant 0 : index
    %c0_109 = arith.constant 0 : index
    %177 = vector.load %arg11[%c6_107, %c0_108, %c0_109] : memref<16x1x32xf32, #tpu.memory_space<vmem>>, vector<1x1x32xf32>
    %178 = vector.shape_cast %177 : vector<1x1x32xf32> to vector<1x32xf32>
    %c7_110 = arith.constant 7 : index
    %c0_111 = arith.constant 0 : index
    %c0_112 = arith.constant 0 : index
    %179 = vector.load %arg11[%c7_110, %c0_111, %c0_112] : memref<16x1x32xf32, #tpu.memory_space<vmem>>, vector<1x1x32xf32>
    %180 = vector.shape_cast %179 : vector<1x1x32xf32> to vector<1x32xf32>
    %c0_113 = arith.constant 0 : index
    %c0_114 = arith.constant 0 : index
    %181 = vector.load %arg7[%c0_113, %c0_114] : memref<32x12xf32, #tpu.memory_space<vmem>>, vector<32x12xf32>
    %cst_115 = arith.constant dense<0.000000e+00> : vector<8x32xf32>
    %182 = tpu.matmul %4, %166, %cst_115 {dimension_numbers = #tpu.dot_dimension_numbers<[1], [0], [0], [1], [0, 0, 1, 1], [], []>} : vector<8x32xf32>, vector<32x32xf32>, vector<8x32xf32> -> vector<8x32xf32>
    %183 = vector.broadcast %174 : vector<1x32xf32> to vector<8x32xf32>
    %184 = arith.addf %182, %183 : vector<8x32xf32>
    %cst_116 = arith.constant dense<0.000000e+00> : vector<12x32xf32>
    %185 = tpu.matmul %164, %168, %cst_116 {dimension_numbers = #tpu.dot_dimension_numbers<[1], [0], [0], [1], [0, 0, 1, 1], [], []>} : vector<12x32xf32>, vector<32x32xf32>, vector<12x32xf32> -> vector<12x32xf32>
    %186 = vector.broadcast %176 : vector<1x32xf32> to vector<12x32xf32>
    %187 = arith.addf %185, %186 : vector<12x32xf32>
    %cst_117 = arith.constant dense<0.000000e+00> : vector<12x32xf32>
    %188 = tpu.matmul %164, %170, %cst_117 {dimension_numbers = #tpu.dot_dimension_numbers<[1], [0], [0], [1], [0, 0, 1, 1], [], []>} : vector<12x32xf32>, vector<32x32xf32>, vector<12x32xf32> -> vector<12x32xf32>
    %189 = vector.broadcast %178 : vector<1x32xf32> to vector<12x32xf32>
    %190 = arith.addf %188, %189 : vector<12x32xf32>
    %191 = tpu.concatenate %184, %184, %184, %184 in 0 : vector<8x32xf32>, vector<8x32xf32>, vector<8x32xf32>, vector<8x32xf32> -> vector<32x32xf32>
    %192 = arith.mulf %191, %6 : vector<32x32xf32>
    %cst_118 = arith.constant dense<0.000000e+00> : vector<32x12xf32>
    %193 = tpu.matmul %192, %187, %cst_118 {dimension_numbers = #tpu.dot_dimension_numbers<[1], [1], [0], [0], [0, 0, 1, 0], [], []>} : vector<32x32xf32>, vector<12x32xf32>, vector<32x12xf32> -> vector<32x12xf32>
    %cst_119 = arith.constant 0.353553385 : f32
    %194 = vector.broadcast %cst_119 : f32 to vector<32x12xf32>
    %195 = arith.mulf %193, %194 : vector<32x12xf32>
    %196 = arith.addf %195, %181 : vector<32x12xf32>
    %cst_120 = arith.constant dense<0xFF800000> : vector<32xf32>
    %197 = vector.multi_reduction <maximumf>, %196, %cst_120 [1] : vector<32x12xf32> to vector<32xf32>
    %198 = vector.shape_cast %197 : vector<32xf32> to vector<32x1xf32>
    %199 = vector.broadcast %198 : vector<32x1xf32> to vector<32x12xf32>
    %200 = arith.subf %196, %199 : vector<32x12xf32>
    %201 = math.exp %200 : vector<32x12xf32>
    %cst_121 = arith.constant dense<0.000000e+00> : vector<32xf32>
    %202 = vector.multi_reduction <add>, %201, %cst_121 [1] : vector<32x12xf32> to vector<32xf32>
    %203 = vector.shape_cast %202 : vector<32xf32> to vector<32x1xf32>
    %204 = tpu.reciprocal %203 {approx = true} : vector<32x1xf32> -> vector<32x1xf32>
    %205 = vector.broadcast %204 : vector<32x1xf32> to vector<32x12xf32>
    %206 = arith.mulf %201, %205 : vector<32x12xf32>
    %cst_122 = arith.constant dense<0.000000e+00> : vector<32x32xf32>
    %207 = tpu.matmul %206, %190, %cst_122 {dimension_numbers = #tpu.dot_dimension_numbers<[1], [0], [0], [1], [0, 0, 1, 1], [], []>} : vector<32x12xf32>, vector<12x32xf32>, vector<32x32xf32> -> vector<32x32xf32>
    %208 = arith.mulf %207, %6 : vector<32x32xf32>
    %209 = vector.extract_strided_slice %208 {offsets = [0, 0], sizes = [8, 32], strides = [1, 1]} : vector<32x32xf32> to vector<8x32xf32>
    %210 = vector.extract_strided_slice %208 {offsets = [8, 0], sizes = [8, 32], strides = [1, 1]} : vector<32x32xf32> to vector<8x32xf32>
    %211 = arith.addf %209, %210 : vector<8x32xf32>
    %212 = vector.extract_strided_slice %208 {offsets = [16, 0], sizes = [8, 32], strides = [1, 1]} : vector<32x32xf32> to vector<8x32xf32>
    %213 = arith.addf %211, %212 : vector<8x32xf32>
    %214 = vector.extract_strided_slice %208 {offsets = [24, 0], sizes = [8, 32], strides = [1, 1]} : vector<32x32xf32> to vector<8x32xf32>
    %215 = arith.addf %213, %214 : vector<8x32xf32>
    %cst_123 = arith.constant dense<0.000000e+00> : vector<8x32xf32>
    %216 = tpu.matmul %215, %172, %cst_123 {dimension_numbers = #tpu.dot_dimension_numbers<[1], [0], [0], [1], [0, 0, 1, 1], [], []>} : vector<8x32xf32>, vector<32x32xf32>, vector<8x32xf32> -> vector<8x32xf32>
    %217 = vector.broadcast %180 : vector<1x32xf32> to vector<8x32xf32>
    %218 = arith.addf %216, %217 : vector<8x32xf32>
    %c8 = arith.constant 8 : index
    %c0_124 = arith.constant 0 : index
    %c0_125 = arith.constant 0 : index
    %219 = vector.load %arg10[%c8, %c0_124, %c0_125] : memref<16x32x32xf32, #tpu.memory_space<vmem>>, vector<1x32x32xf32>
    %220 = vector.shape_cast %219 : vector<1x32x32xf32> to vector<32x32xf32>
    %c9 = arith.constant 9 : index
    %c0_126 = arith.constant 0 : index
    %c0_127 = arith.constant 0 : index
    %221 = vector.load %arg10[%c9, %c0_126, %c0_127] : memref<16x32x32xf32, #tpu.memory_space<vmem>>, vector<1x32x32xf32>
    %222 = vector.shape_cast %221 : vector<1x32x32xf32> to vector<32x32xf32>
    %c10 = arith.constant 10 : index
    %c0_128 = arith.constant 0 : index
    %c0_129 = arith.constant 0 : index
    %223 = vector.load %arg10[%c10, %c0_128, %c0_129] : memref<16x32x32xf32, #tpu.memory_space<vmem>>, vector<1x32x32xf32>
    %224 = vector.shape_cast %223 : vector<1x32x32xf32> to vector<32x32xf32>
    %c11 = arith.constant 11 : index
    %c0_130 = arith.constant 0 : index
    %c0_131 = arith.constant 0 : index
    %225 = vector.load %arg10[%c11, %c0_130, %c0_131] : memref<16x32x32xf32, #tpu.memory_space<vmem>>, vector<1x32x32xf32>
    %226 = vector.shape_cast %225 : vector<1x32x32xf32> to vector<32x32xf32>
    %c8_132 = arith.constant 8 : index
    %c0_133 = arith.constant 0 : index
    %c0_134 = arith.constant 0 : index
    %227 = vector.load %arg11[%c8_132, %c0_133, %c0_134] : memref<16x1x32xf32, #tpu.memory_space<vmem>>, vector<1x1x32xf32>
    %228 = vector.shape_cast %227 : vector<1x1x32xf32> to vector<1x32xf32>
    %c9_135 = arith.constant 9 : index
    %c0_136 = arith.constant 0 : index
    %c0_137 = arith.constant 0 : index
    %229 = vector.load %arg11[%c9_135, %c0_136, %c0_137] : memref<16x1x32xf32, #tpu.memory_space<vmem>>, vector<1x1x32xf32>
    %230 = vector.shape_cast %229 : vector<1x1x32xf32> to vector<1x32xf32>
    %c10_138 = arith.constant 10 : index
    %c0_139 = arith.constant 0 : index
    %c0_140 = arith.constant 0 : index
    %231 = vector.load %arg11[%c10_138, %c0_139, %c0_140] : memref<16x1x32xf32, #tpu.memory_space<vmem>>, vector<1x1x32xf32>
    %232 = vector.shape_cast %231 : vector<1x1x32xf32> to vector<1x32xf32>
    %c11_141 = arith.constant 11 : index
    %c0_142 = arith.constant 0 : index
    %c0_143 = arith.constant 0 : index
    %233 = vector.load %arg11[%c11_141, %c0_142, %c0_143] : memref<16x1x32xf32, #tpu.memory_space<vmem>>, vector<1x1x32xf32>
    %234 = vector.shape_cast %233 : vector<1x1x32xf32> to vector<1x32xf32>
    %c0_144 = arith.constant 0 : index
    %c0_145 = arith.constant 0 : index
    %235 = vector.load %arg8[%c0_144, %c0_145] : memref<48x8xf32, #tpu.memory_space<vmem>>, vector<48x8xf32>
    %cst_146 = arith.constant dense<0.000000e+00> : vector<12x32xf32>
    %236 = tpu.matmul %164, %220, %cst_146 {dimension_numbers = #tpu.dot_dimension_numbers<[1], [0], [0], [1], [0, 0, 1, 1], [], []>} : vector<12x32xf32>, vector<32x32xf32>, vector<12x32xf32> -> vector<12x32xf32>
    %237 = vector.broadcast %228 : vector<1x32xf32> to vector<12x32xf32>
    %238 = arith.addf %236, %237 : vector<12x32xf32>
    %cst_147 = arith.constant dense<0.000000e+00> : vector<8x32xf32>
    %239 = tpu.matmul %218, %222, %cst_147 {dimension_numbers = #tpu.dot_dimension_numbers<[1], [0], [0], [1], [0, 0, 1, 1], [], []>} : vector<8x32xf32>, vector<32x32xf32>, vector<8x32xf32> -> vector<8x32xf32>
    %240 = vector.broadcast %230 : vector<1x32xf32> to vector<8x32xf32>
    %241 = arith.addf %239, %240 : vector<8x32xf32>
    %cst_148 = arith.constant dense<0.000000e+00> : vector<8x32xf32>
    %242 = tpu.matmul %218, %224, %cst_148 {dimension_numbers = #tpu.dot_dimension_numbers<[1], [0], [0], [1], [0, 0, 1, 1], [], []>} : vector<8x32xf32>, vector<32x32xf32>, vector<8x32xf32> -> vector<8x32xf32>
    %243 = vector.broadcast %232 : vector<1x32xf32> to vector<8x32xf32>
    %244 = arith.addf %242, %243 : vector<8x32xf32>
    %245 = tpu.concatenate %238, %238, %238, %238 in 0 : vector<12x32xf32>, vector<12x32xf32>, vector<12x32xf32>, vector<12x32xf32> -> vector<48x32xf32>
    %246 = arith.mulf %245, %5 : vector<48x32xf32>
    %cst_149 = arith.constant dense<0.000000e+00> : vector<48x8xf32>
    %247 = tpu.matmul %246, %241, %cst_149 {dimension_numbers = #tpu.dot_dimension_numbers<[1], [1], [0], [0], [0, 0, 1, 0], [], []>} : vector<48x32xf32>, vector<8x32xf32>, vector<48x8xf32> -> vector<48x8xf32>
    %cst_150 = arith.constant 0.353553385 : f32
    %248 = vector.broadcast %cst_150 : f32 to vector<48x8xf32>
    %249 = arith.mulf %247, %248 : vector<48x8xf32>
    %250 = arith.addf %249, %235 : vector<48x8xf32>
    %cst_151 = arith.constant dense<0xFF800000> : vector<48xf32>
    %251 = vector.multi_reduction <maximumf>, %250, %cst_151 [1] : vector<48x8xf32> to vector<48xf32>
    %252 = vector.shape_cast %251 : vector<48xf32> to vector<48x1xf32>
    %253 = vector.broadcast %252 : vector<48x1xf32> to vector<48x8xf32>
    %254 = arith.subf %250, %253 : vector<48x8xf32>
    %255 = math.exp %254 : vector<48x8xf32>
    %cst_152 = arith.constant dense<0.000000e+00> : vector<48xf32>
    %256 = vector.multi_reduction <add>, %255, %cst_152 [1] : vector<48x8xf32> to vector<48xf32>
    %257 = vector.shape_cast %256 : vector<48xf32> to vector<48x1xf32>
    %258 = tpu.reciprocal %257 {approx = true} : vector<48x1xf32> -> vector<48x1xf32>
    %259 = vector.broadcast %258 : vector<48x1xf32> to vector<48x8xf32>
    %260 = arith.mulf %255, %259 : vector<48x8xf32>
    %cst_153 = arith.constant dense<0.000000e+00> : vector<48x32xf32>
    %261 = tpu.matmul %260, %244, %cst_153 {dimension_numbers = #tpu.dot_dimension_numbers<[1], [0], [0], [1], [0, 0, 1, 1], [], []>} : vector<48x8xf32>, vector<8x32xf32>, vector<48x32xf32> -> vector<48x32xf32>
    %262 = arith.mulf %261, %5 : vector<48x32xf32>
    %263 = vector.extract_strided_slice %262 {offsets = [0, 0], sizes = [12, 32], strides = [1, 1]} : vector<48x32xf32> to vector<12x32xf32>
    %264 = vector.extract_strided_slice %262 {offsets = [12, 0], sizes = [12, 32], strides = [1, 1]} : vector<48x32xf32> to vector<12x32xf32>
    %265 = arith.addf %263, %264 : vector<12x32xf32>
    %266 = vector.extract_strided_slice %262 {offsets = [24, 0], sizes = [12, 32], strides = [1, 1]} : vector<48x32xf32> to vector<12x32xf32>
    %267 = arith.addf %265, %266 : vector<12x32xf32>
    %268 = vector.extract_strided_slice %262 {offsets = [36, 0], sizes = [12, 32], strides = [1, 1]} : vector<48x32xf32> to vector<12x32xf32>
    %269 = arith.addf %267, %268 : vector<12x32xf32>
    %cst_154 = arith.constant dense<0.000000e+00> : vector<12x32xf32>
    %270 = tpu.matmul %269, %226, %cst_154 {dimension_numbers = #tpu.dot_dimension_numbers<[1], [0], [0], [1], [0, 0, 1, 1], [], []>} : vector<12x32xf32>, vector<32x32xf32>, vector<12x32xf32> -> vector<12x32xf32>
    %271 = vector.broadcast %234 : vector<1x32xf32> to vector<12x32xf32>
    %272 = arith.addf %270, %271 : vector<12x32xf32>
    %273 = arith.addf %164, %272 : vector<12x32xf32>
    %c2_155 = arith.constant 2 : index
    %c0_156 = arith.constant 0 : index
    %c0_157 = arith.constant 0 : index
    %274 = vector.load %arg12[%c2_155, %c0_156, %c0_157] : memref<6x1x32xf32, #tpu.memory_space<vmem>>, vector<1x1x32xf32>
    %275 = vector.shape_cast %274 : vector<1x1x32xf32> to vector<1x32xf32>
    %c2_158 = arith.constant 2 : index
    %c0_159 = arith.constant 0 : index
    %c0_160 = arith.constant 0 : index
    %276 = vector.load %arg13[%c2_158, %c0_159, %c0_160] : memref<6x1x32xf32, #tpu.memory_space<vmem>>, vector<1x1x32xf32>
    %277 = vector.shape_cast %276 : vector<1x1x32xf32> to vector<1x32xf32>
    %cst_161 = arith.constant dense<0.000000e+00> : vector<12xf32>
    %278 = vector.multi_reduction <add>, %273, %cst_161 [1] : vector<12x32xf32> to vector<12xf32>
    %279 = vector.shape_cast %278 : vector<12xf32> to vector<12x1xf32>
    %cst_162 = arith.constant 3.200000e+01 : f32
    %280 = vector.broadcast %cst_162 : f32 to vector<12x1xf32>
    %281 = arith.divf %279, %280 : vector<12x1xf32>
    %282 = vector.broadcast %281 : vector<12x1xf32> to vector<12x32xf32>
    %283 = arith.subf %273, %282 : vector<12x32xf32>
    %284 = arith.mulf %283, %283 : vector<12x32xf32>
    %cst_163 = arith.constant dense<0.000000e+00> : vector<12xf32>
    %285 = vector.multi_reduction <add>, %284, %cst_163 [1] : vector<12x32xf32> to vector<12xf32>
    %286 = vector.shape_cast %285 : vector<12xf32> to vector<12x1xf32>
    %cst_164 = arith.constant 3.200000e+01 : f32
    %287 = vector.broadcast %cst_164 : f32 to vector<12x1xf32>
    %288 = arith.divf %286, %287 : vector<12x1xf32>
    %cst_165 = arith.constant 9.99999974E-6 : f32
    %289 = vector.broadcast %cst_165 : f32 to vector<12x1xf32>
    %290 = arith.addf %288, %289 : vector<12x1xf32>
    %291 = math.rsqrt %290 : vector<12x1xf32>
    %292 = vector.broadcast %291 : vector<12x1xf32> to vector<12x32xf32>
    %293 = arith.mulf %283, %292 : vector<12x32xf32>
    %294 = vector.broadcast %275 : vector<1x32xf32> to vector<12x32xf32>
    %295 = arith.mulf %293, %294 : vector<12x32xf32>
    %296 = vector.broadcast %277 : vector<1x32xf32> to vector<12x32xf32>
    %297 = arith.addf %295, %296 : vector<12x32xf32>
    %c1_166 = arith.constant 1 : index
    %c0_167 = arith.constant 0 : index
    %c0_168 = arith.constant 0 : index
    %298 = vector.load %arg14[%c1_166, %c0_167, %c0_168] : memref<2x32x64xf32, #tpu.memory_space<vmem>>, vector<1x32x64xf32>
    %299 = vector.shape_cast %298 : vector<1x32x64xf32> to vector<32x64xf32>
    %c1_169 = arith.constant 1 : index
    %c0_170 = arith.constant 0 : index
    %c0_171 = arith.constant 0 : index
    %300 = vector.load %arg15[%c1_169, %c0_170, %c0_171] : memref<2x1x64xf32, #tpu.memory_space<vmem>>, vector<1x1x64xf32>
    %301 = vector.shape_cast %300 : vector<1x1x64xf32> to vector<1x64xf32>
    %c1_172 = arith.constant 1 : index
    %c0_173 = arith.constant 0 : index
    %c0_174 = arith.constant 0 : index
    %302 = vector.load %arg16[%c1_172, %c0_173, %c0_174] : memref<2x64x32xf32, #tpu.memory_space<vmem>>, vector<1x64x32xf32>
    %303 = vector.shape_cast %302 : vector<1x64x32xf32> to vector<64x32xf32>
    %c1_175 = arith.constant 1 : index
    %c0_176 = arith.constant 0 : index
    %c0_177 = arith.constant 0 : index
    %304 = vector.load %arg17[%c1_175, %c0_176, %c0_177] : memref<2x1x32xf32, #tpu.memory_space<vmem>>, vector<1x1x32xf32>
    %305 = vector.shape_cast %304 : vector<1x1x32xf32> to vector<1x32xf32>
    %cst_178 = arith.constant dense<0.000000e+00> : vector<12x64xf32>
    %306 = tpu.matmul %297, %299, %cst_178 {dimension_numbers = #tpu.dot_dimension_numbers<[1], [0], [0], [1], [0, 0, 1, 1], [], []>} : vector<12x32xf32>, vector<32x64xf32>, vector<12x64xf32> -> vector<12x64xf32>
    %307 = vector.broadcast %301 : vector<1x64xf32> to vector<12x64xf32>
    %308 = arith.addf %306, %307 : vector<12x64xf32>
    %cst_179 = arith.constant 5.000000e-01 : f32
    %309 = vector.broadcast %cst_179 : f32 to vector<12x64xf32>
    %310 = arith.mulf %309, %308 : vector<12x64xf32>
    %cst_180 = arith.constant 0.707106769 : f32
    %311 = vector.broadcast %cst_180 : f32 to vector<12x64xf32>
    %312 = arith.mulf %308, %311 : vector<12x64xf32>
    %313 = math.absf %312 : vector<12x64xf32>
    %cst_181 = arith.constant 0.327591091 : f32
    %314 = vector.broadcast %cst_181 : f32 to vector<12x64xf32>
    %315 = arith.mulf %314, %313 : vector<12x64xf32>
    %cst_182 = arith.constant 1.000000e+00 : f32
    %316 = vector.broadcast %cst_182 : f32 to vector<12x64xf32>
    %317 = arith.addf %316, %315 : vector<12x64xf32>
    %cst_183 = arith.constant 1.000000e+00 : f32
    %318 = vector.broadcast %cst_183 : f32 to vector<12x64xf32>
    %319 = arith.divf %318, %317 : vector<12x64xf32>
    %cst_184 = arith.constant 1.06140542 : f32
    %320 = vector.broadcast %cst_184 : f32 to vector<12x64xf32>
    %321 = arith.mulf %319, %320 : vector<12x64xf32>
    %cst_185 = arith.constant -1.45315206 : f32
    %322 = vector.broadcast %cst_185 : f32 to vector<12x64xf32>
    %323 = arith.addf %322, %321 : vector<12x64xf32>
    %324 = arith.mulf %319, %323 : vector<12x64xf32>
    %cst_186 = arith.constant 1.42141378 : f32
    %325 = vector.broadcast %cst_186 : f32 to vector<12x64xf32>
    %326 = arith.addf %325, %324 : vector<12x64xf32>
    %327 = arith.mulf %319, %326 : vector<12x64xf32>
    %cst_187 = arith.constant -0.284496725 : f32
    %328 = vector.broadcast %cst_187 : f32 to vector<12x64xf32>
    %329 = arith.addf %328, %327 : vector<12x64xf32>
    %330 = arith.mulf %319, %329 : vector<12x64xf32>
    %cst_188 = arith.constant 0.254829586 : f32
    %331 = vector.broadcast %cst_188 : f32 to vector<12x64xf32>
    %332 = arith.addf %331, %330 : vector<12x64xf32>
    %333 = arith.mulf %319, %332 : vector<12x64xf32>
    %cst_189 = arith.constant 0.000000e+00 : f32
    %334 = vector.broadcast %cst_189 : f32 to vector<12x64xf32>
    %335 = arith.subf %334, %313 : vector<12x64xf32>
    %336 = arith.mulf %335, %313 : vector<12x64xf32>
    %337 = math.exp %336 : vector<12x64xf32>
    %338 = arith.mulf %333, %337 : vector<12x64xf32>
    %cst_190 = arith.constant 1.000000e+00 : f32
    %339 = vector.broadcast %cst_190 : f32 to vector<12x64xf32>
    %340 = arith.subf %339, %338 : vector<12x64xf32>
    %cst_191 = arith.constant 0.000000e+00 : f32
    %341 = vector.broadcast %cst_191 : f32 to vector<12x64xf32>
    %342 = arith.cmpf oge, %312, %341 : vector<12x64xf32>
    %cst_192 = arith.constant 0.000000e+00 : f32
    %343 = vector.broadcast %cst_192 : f32 to vector<12x64xf32>
    %344 = arith.subf %343, %340 : vector<12x64xf32>
    %345 = arith.select %342, %340, %344 : vector<12x64xi1>, vector<12x64xf32>
    %cst_193 = arith.constant 1.000000e+00 : f32
    %346 = vector.broadcast %cst_193 : f32 to vector<12x64xf32>
    %347 = arith.addf %346, %345 : vector<12x64xf32>
    %348 = arith.mulf %310, %347 : vector<12x64xf32>
    %cst_194 = arith.constant dense<0.000000e+00> : vector<12x32xf32>
    %349 = tpu.matmul %348, %303, %cst_194 {dimension_numbers = #tpu.dot_dimension_numbers<[1], [0], [0], [1], [0, 0, 1, 1], [], []>} : vector<12x64xf32>, vector<64x32xf32>, vector<12x32xf32> -> vector<12x32xf32>
    %350 = vector.broadcast %305 : vector<1x32xf32> to vector<12x32xf32>
    %351 = arith.addf %349, %350 : vector<12x32xf32>
    %352 = arith.addf %297, %351 : vector<12x32xf32>
    %c3_195 = arith.constant 3 : index
    %c0_196 = arith.constant 0 : index
    %c0_197 = arith.constant 0 : index
    %353 = vector.load %arg12[%c3_195, %c0_196, %c0_197] : memref<6x1x32xf32, #tpu.memory_space<vmem>>, vector<1x1x32xf32>
    %354 = vector.shape_cast %353 : vector<1x1x32xf32> to vector<1x32xf32>
    %c3_198 = arith.constant 3 : index
    %c0_199 = arith.constant 0 : index
    %c0_200 = arith.constant 0 : index
    %355 = vector.load %arg13[%c3_198, %c0_199, %c0_200] : memref<6x1x32xf32, #tpu.memory_space<vmem>>, vector<1x1x32xf32>
    %356 = vector.shape_cast %355 : vector<1x1x32xf32> to vector<1x32xf32>
    %cst_201 = arith.constant dense<0.000000e+00> : vector<12xf32>
    %357 = vector.multi_reduction <add>, %352, %cst_201 [1] : vector<12x32xf32> to vector<12xf32>
    %358 = vector.shape_cast %357 : vector<12xf32> to vector<12x1xf32>
    %cst_202 = arith.constant 3.200000e+01 : f32
    %359 = vector.broadcast %cst_202 : f32 to vector<12x1xf32>
    %360 = arith.divf %358, %359 : vector<12x1xf32>
    %361 = vector.broadcast %360 : vector<12x1xf32> to vector<12x32xf32>
    %362 = arith.subf %352, %361 : vector<12x32xf32>
    %363 = arith.mulf %362, %362 : vector<12x32xf32>
    %cst_203 = arith.constant dense<0.000000e+00> : vector<12xf32>
    %364 = vector.multi_reduction <add>, %363, %cst_203 [1] : vector<12x32xf32> to vector<12xf32>
    %365 = vector.shape_cast %364 : vector<12xf32> to vector<12x1xf32>
    %cst_204 = arith.constant 3.200000e+01 : f32
    %366 = vector.broadcast %cst_204 : f32 to vector<12x1xf32>
    %367 = arith.divf %365, %366 : vector<12x1xf32>
    %cst_205 = arith.constant 9.99999974E-6 : f32
    %368 = vector.broadcast %cst_205 : f32 to vector<12x1xf32>
    %369 = arith.addf %367, %368 : vector<12x1xf32>
    %370 = math.rsqrt %369 : vector<12x1xf32>
    %371 = vector.broadcast %370 : vector<12x1xf32> to vector<12x32xf32>
    %372 = arith.mulf %362, %371 : vector<12x32xf32>
    %373 = vector.broadcast %354 : vector<1x32xf32> to vector<12x32xf32>
    %374 = arith.mulf %372, %373 : vector<12x32xf32>
    %375 = vector.broadcast %356 : vector<1x32xf32> to vector<12x32xf32>
    %376 = arith.addf %374, %375 : vector<12x32xf32>
    %c12 = arith.constant 12 : index
    %c0_206 = arith.constant 0 : index
    %c0_207 = arith.constant 0 : index
    %377 = vector.load %arg10[%c12, %c0_206, %c0_207] : memref<16x32x32xf32, #tpu.memory_space<vmem>>, vector<1x32x32xf32>
    %378 = vector.shape_cast %377 : vector<1x32x32xf32> to vector<32x32xf32>
    %c13 = arith.constant 13 : index
    %c0_208 = arith.constant 0 : index
    %c0_209 = arith.constant 0 : index
    %379 = vector.load %arg10[%c13, %c0_208, %c0_209] : memref<16x32x32xf32, #tpu.memory_space<vmem>>, vector<1x32x32xf32>
    %380 = vector.shape_cast %379 : vector<1x32x32xf32> to vector<32x32xf32>
    %c14 = arith.constant 14 : index
    %c0_210 = arith.constant 0 : index
    %c0_211 = arith.constant 0 : index
    %381 = vector.load %arg10[%c14, %c0_210, %c0_211] : memref<16x32x32xf32, #tpu.memory_space<vmem>>, vector<1x32x32xf32>
    %382 = vector.shape_cast %381 : vector<1x32x32xf32> to vector<32x32xf32>
    %c15 = arith.constant 15 : index
    %c0_212 = arith.constant 0 : index
    %c0_213 = arith.constant 0 : index
    %383 = vector.load %arg10[%c15, %c0_212, %c0_213] : memref<16x32x32xf32, #tpu.memory_space<vmem>>, vector<1x32x32xf32>
    %384 = vector.shape_cast %383 : vector<1x32x32xf32> to vector<32x32xf32>
    %c12_214 = arith.constant 12 : index
    %c0_215 = arith.constant 0 : index
    %c0_216 = arith.constant 0 : index
    %385 = vector.load %arg11[%c12_214, %c0_215, %c0_216] : memref<16x1x32xf32, #tpu.memory_space<vmem>>, vector<1x1x32xf32>
    %386 = vector.shape_cast %385 : vector<1x1x32xf32> to vector<1x32xf32>
    %c13_217 = arith.constant 13 : index
    %c0_218 = arith.constant 0 : index
    %c0_219 = arith.constant 0 : index
    %387 = vector.load %arg11[%c13_217, %c0_218, %c0_219] : memref<16x1x32xf32, #tpu.memory_space<vmem>>, vector<1x1x32xf32>
    %388 = vector.shape_cast %387 : vector<1x1x32xf32> to vector<1x32xf32>
    %c14_220 = arith.constant 14 : index
    %c0_221 = arith.constant 0 : index
    %c0_222 = arith.constant 0 : index
    %389 = vector.load %arg11[%c14_220, %c0_221, %c0_222] : memref<16x1x32xf32, #tpu.memory_space<vmem>>, vector<1x1x32xf32>
    %390 = vector.shape_cast %389 : vector<1x1x32xf32> to vector<1x32xf32>
    %c15_223 = arith.constant 15 : index
    %c0_224 = arith.constant 0 : index
    %c0_225 = arith.constant 0 : index
    %391 = vector.load %arg11[%c15_223, %c0_224, %c0_225] : memref<16x1x32xf32, #tpu.memory_space<vmem>>, vector<1x1x32xf32>
    %392 = vector.shape_cast %391 : vector<1x1x32xf32> to vector<1x32xf32>
    %c0_226 = arith.constant 0 : index
    %c0_227 = arith.constant 0 : index
    %393 = vector.load %arg9[%c0_226, %c0_227] : memref<48x18xf32, #tpu.memory_space<vmem>>, vector<48x18xf32>
    %cst_228 = arith.constant dense<0.000000e+00> : vector<12x32xf32>
    %394 = tpu.matmul %376, %378, %cst_228 {dimension_numbers = #tpu.dot_dimension_numbers<[1], [0], [0], [1], [0, 0, 1, 1], [], []>} : vector<12x32xf32>, vector<32x32xf32>, vector<12x32xf32> -> vector<12x32xf32>
    %395 = vector.broadcast %386 : vector<1x32xf32> to vector<12x32xf32>
    %396 = arith.addf %394, %395 : vector<12x32xf32>
    %cst_229 = arith.constant dense<0.000000e+00> : vector<18x32xf32>
    %397 = tpu.matmul %3, %380, %cst_229 {dimension_numbers = #tpu.dot_dimension_numbers<[1], [0], [0], [1], [0, 0, 1, 1], [], []>} : vector<18x32xf32>, vector<32x32xf32>, vector<18x32xf32> -> vector<18x32xf32>
    %398 = vector.broadcast %388 : vector<1x32xf32> to vector<18x32xf32>
    %399 = arith.addf %397, %398 : vector<18x32xf32>
    %cst_230 = arith.constant dense<0.000000e+00> : vector<18x32xf32>
    %400 = tpu.matmul %3, %382, %cst_230 {dimension_numbers = #tpu.dot_dimension_numbers<[1], [0], [0], [1], [0, 0, 1, 1], [], []>} : vector<18x32xf32>, vector<32x32xf32>, vector<18x32xf32> -> vector<18x32xf32>
    %401 = vector.broadcast %390 : vector<1x32xf32> to vector<18x32xf32>
    %402 = arith.addf %400, %401 : vector<18x32xf32>
    %403 = tpu.concatenate %396, %396, %396, %396 in 0 : vector<12x32xf32>, vector<12x32xf32>, vector<12x32xf32>, vector<12x32xf32> -> vector<48x32xf32>
    %404 = arith.mulf %403, %5 : vector<48x32xf32>
    %cst_231 = arith.constant dense<0.000000e+00> : vector<48x18xf32>
    %405 = tpu.matmul %404, %399, %cst_231 {dimension_numbers = #tpu.dot_dimension_numbers<[1], [1], [0], [0], [0, 0, 1, 0], [], []>} : vector<48x32xf32>, vector<18x32xf32>, vector<48x18xf32> -> vector<48x18xf32>
    %cst_232 = arith.constant 0.353553385 : f32
    %406 = vector.broadcast %cst_232 : f32 to vector<48x18xf32>
    %407 = arith.mulf %405, %406 : vector<48x18xf32>
    %408 = arith.addf %407, %393 : vector<48x18xf32>
    %cst_233 = arith.constant dense<0xFF800000> : vector<48xf32>
    %409 = vector.multi_reduction <maximumf>, %408, %cst_233 [1] : vector<48x18xf32> to vector<48xf32>
    %410 = vector.shape_cast %409 : vector<48xf32> to vector<48x1xf32>
    %411 = vector.broadcast %410 : vector<48x1xf32> to vector<48x18xf32>
    %412 = arith.subf %408, %411 : vector<48x18xf32>
    %413 = math.exp %412 : vector<48x18xf32>
    %cst_234 = arith.constant dense<0.000000e+00> : vector<48xf32>
    %414 = vector.multi_reduction <add>, %413, %cst_234 [1] : vector<48x18xf32> to vector<48xf32>
    %415 = vector.shape_cast %414 : vector<48xf32> to vector<48x1xf32>
    %416 = tpu.reciprocal %415 {approx = true} : vector<48x1xf32> -> vector<48x1xf32>
    %417 = vector.broadcast %416 : vector<48x1xf32> to vector<48x18xf32>
    %418 = arith.mulf %413, %417 : vector<48x18xf32>
    %cst_235 = arith.constant dense<0.000000e+00> : vector<48x32xf32>
    %419 = tpu.matmul %418, %402, %cst_235 {dimension_numbers = #tpu.dot_dimension_numbers<[1], [0], [0], [1], [0, 0, 1, 1], [], []>} : vector<48x18xf32>, vector<18x32xf32>, vector<48x32xf32> -> vector<48x32xf32>
    %420 = arith.mulf %419, %5 : vector<48x32xf32>
    %421 = vector.extract_strided_slice %420 {offsets = [0, 0], sizes = [12, 32], strides = [1, 1]} : vector<48x32xf32> to vector<12x32xf32>
    %422 = vector.extract_strided_slice %420 {offsets = [12, 0], sizes = [12, 32], strides = [1, 1]} : vector<48x32xf32> to vector<12x32xf32>
    %423 = arith.addf %421, %422 : vector<12x32xf32>
    %424 = vector.extract_strided_slice %420 {offsets = [24, 0], sizes = [12, 32], strides = [1, 1]} : vector<48x32xf32> to vector<12x32xf32>
    %425 = arith.addf %423, %424 : vector<12x32xf32>
    %426 = vector.extract_strided_slice %420 {offsets = [36, 0], sizes = [12, 32], strides = [1, 1]} : vector<48x32xf32> to vector<12x32xf32>
    %427 = arith.addf %425, %426 : vector<12x32xf32>
    %cst_236 = arith.constant dense<0.000000e+00> : vector<12x32xf32>
    %428 = tpu.matmul %427, %384, %cst_236 {dimension_numbers = #tpu.dot_dimension_numbers<[1], [0], [0], [1], [0, 0, 1, 1], [], []>} : vector<12x32xf32>, vector<32x32xf32>, vector<12x32xf32> -> vector<12x32xf32>
    %429 = vector.broadcast %392 : vector<1x32xf32> to vector<12x32xf32>
    %430 = arith.addf %428, %429 : vector<12x32xf32>
    %431 = arith.addf %376, %430 : vector<12x32xf32>
    %c4_237 = arith.constant 4 : index
    %c0_238 = arith.constant 0 : index
    %c0_239 = arith.constant 0 : index
    %432 = vector.load %arg12[%c4_237, %c0_238, %c0_239] : memref<6x1x32xf32, #tpu.memory_space<vmem>>, vector<1x1x32xf32>
    %433 = vector.shape_cast %432 : vector<1x1x32xf32> to vector<1x32xf32>
    %c4_240 = arith.constant 4 : index
    %c0_241 = arith.constant 0 : index
    %c0_242 = arith.constant 0 : index
    %434 = vector.load %arg13[%c4_240, %c0_241, %c0_242] : memref<6x1x32xf32, #tpu.memory_space<vmem>>, vector<1x1x32xf32>
    %435 = vector.shape_cast %434 : vector<1x1x32xf32> to vector<1x32xf32>
    %cst_243 = arith.constant dense<0.000000e+00> : vector<12xf32>
    %436 = vector.multi_reduction <add>, %431, %cst_243 [1] : vector<12x32xf32> to vector<12xf32>
    %437 = vector.shape_cast %436 : vector<12xf32> to vector<12x1xf32>
    %cst_244 = arith.constant 3.200000e+01 : f32
    %438 = vector.broadcast %cst_244 : f32 to vector<12x1xf32>
    %439 = arith.divf %437, %438 : vector<12x1xf32>
    %440 = vector.broadcast %439 : vector<12x1xf32> to vector<12x32xf32>
    %441 = arith.subf %431, %440 : vector<12x32xf32>
    %442 = arith.mulf %441, %441 : vector<12x32xf32>
    %cst_245 = arith.constant dense<0.000000e+00> : vector<12xf32>
    %443 = vector.multi_reduction <add>, %442, %cst_245 [1] : vector<12x32xf32> to vector<12xf32>
    %444 = vector.shape_cast %443 : vector<12xf32> to vector<12x1xf32>
    %cst_246 = arith.constant 3.200000e+01 : f32
    %445 = vector.broadcast %cst_246 : f32 to vector<12x1xf32>
    %446 = arith.divf %444, %445 : vector<12x1xf32>
    %cst_247 = arith.constant 9.99999974E-6 : f32
    %447 = vector.broadcast %cst_247 : f32 to vector<12x1xf32>
    %448 = arith.addf %446, %447 : vector<12x1xf32>
    %449 = math.rsqrt %448 : vector<12x1xf32>
    %450 = vector.broadcast %449 : vector<12x1xf32> to vector<12x32xf32>
    %451 = arith.mulf %441, %450 : vector<12x32xf32>
    %452 = vector.broadcast %433 : vector<1x32xf32> to vector<12x32xf32>
    %453 = arith.mulf %451, %452 : vector<12x32xf32>
    %454 = vector.broadcast %435 : vector<1x32xf32> to vector<12x32xf32>
    %455 = arith.addf %453, %454 : vector<12x32xf32>
    %c0_248 = arith.constant 0 : index
    %c0_249 = arith.constant 0 : index
    %456 = vector.load %arg18[%c0_248, %c0_249] : memref<32x32xf32, #tpu.memory_space<vmem>>, vector<32x32xf32>
    %c0_250 = arith.constant 0 : index
    %c0_251 = arith.constant 0 : index
    %457 = vector.load %arg19[%c0_250, %c0_251] : memref<1x32xf32, #tpu.memory_space<vmem>>, vector<1x32xf32>
    %c0_252 = arith.constant 0 : index
    %c0_253 = arith.constant 0 : index
    %458 = vector.load %arg20[%c0_252, %c0_253] : memref<32x32xf32, #tpu.memory_space<vmem>>, vector<32x32xf32>
    %c0_254 = arith.constant 0 : index
    %c0_255 = arith.constant 0 : index
    %459 = vector.load %arg21[%c0_254, %c0_255] : memref<1x32xf32, #tpu.memory_space<vmem>>, vector<1x32xf32>
    %cst_256 = arith.constant dense<0.000000e+00> : vector<12x32xf32>
    %460 = tpu.matmul %455, %456, %cst_256 {dimension_numbers = #tpu.dot_dimension_numbers<[1], [0], [0], [1], [0, 0, 1, 1], [], []>} : vector<12x32xf32>, vector<32x32xf32>, vector<12x32xf32> -> vector<12x32xf32>
    %461 = vector.broadcast %457 : vector<1x32xf32> to vector<12x32xf32>
    %462 = arith.addf %460, %461 : vector<12x32xf32>
    %cst_257 = arith.constant 5.000000e-01 : f32
    %463 = vector.broadcast %cst_257 : f32 to vector<12x32xf32>
    %464 = arith.mulf %463, %462 : vector<12x32xf32>
    %cst_258 = arith.constant 0.707106769 : f32
    %465 = vector.broadcast %cst_258 : f32 to vector<12x32xf32>
    %466 = arith.mulf %462, %465 : vector<12x32xf32>
    %467 = math.absf %466 : vector<12x32xf32>
    %cst_259 = arith.constant 0.327591091 : f32
    %468 = vector.broadcast %cst_259 : f32 to vector<12x32xf32>
    %469 = arith.mulf %468, %467 : vector<12x32xf32>
    %cst_260 = arith.constant 1.000000e+00 : f32
    %470 = vector.broadcast %cst_260 : f32 to vector<12x32xf32>
    %471 = arith.addf %470, %469 : vector<12x32xf32>
    %cst_261 = arith.constant 1.000000e+00 : f32
    %472 = vector.broadcast %cst_261 : f32 to vector<12x32xf32>
    %473 = arith.divf %472, %471 : vector<12x32xf32>
    %cst_262 = arith.constant 1.06140542 : f32
    %474 = vector.broadcast %cst_262 : f32 to vector<12x32xf32>
    %475 = arith.mulf %473, %474 : vector<12x32xf32>
    %cst_263 = arith.constant -1.45315206 : f32
    %476 = vector.broadcast %cst_263 : f32 to vector<12x32xf32>
    %477 = arith.addf %476, %475 : vector<12x32xf32>
    %478 = arith.mulf %473, %477 : vector<12x32xf32>
    %cst_264 = arith.constant 1.42141378 : f32
    %479 = vector.broadcast %cst_264 : f32 to vector<12x32xf32>
    %480 = arith.addf %479, %478 : vector<12x32xf32>
    %481 = arith.mulf %473, %480 : vector<12x32xf32>
    %cst_265 = arith.constant -0.284496725 : f32
    %482 = vector.broadcast %cst_265 : f32 to vector<12x32xf32>
    %483 = arith.addf %482, %481 : vector<12x32xf32>
    %484 = arith.mulf %473, %483 : vector<12x32xf32>
    %cst_266 = arith.constant 0.254829586 : f32
    %485 = vector.broadcast %cst_266 : f32 to vector<12x32xf32>
    %486 = arith.addf %485, %484 : vector<12x32xf32>
    %487 = arith.mulf %473, %486 : vector<12x32xf32>
    %cst_267 = arith.constant 0.000000e+00 : f32
    %488 = vector.broadcast %cst_267 : f32 to vector<12x32xf32>
    %489 = arith.subf %488, %467 : vector<12x32xf32>
    %490 = arith.mulf %489, %467 : vector<12x32xf32>
    %491 = math.exp %490 : vector<12x32xf32>
    %492 = arith.mulf %487, %491 : vector<12x32xf32>
    %cst_268 = arith.constant 1.000000e+00 : f32
    %493 = vector.broadcast %cst_268 : f32 to vector<12x32xf32>
    %494 = arith.subf %493, %492 : vector<12x32xf32>
    %cst_269 = arith.constant 0.000000e+00 : f32
    %495 = vector.broadcast %cst_269 : f32 to vector<12x32xf32>
    %496 = arith.cmpf oge, %466, %495 : vector<12x32xf32>
    %cst_270 = arith.constant 0.000000e+00 : f32
    %497 = vector.broadcast %cst_270 : f32 to vector<12x32xf32>
    %498 = arith.subf %497, %494 : vector<12x32xf32>
    %499 = arith.select %496, %494, %498 : vector<12x32xi1>, vector<12x32xf32>
    %cst_271 = arith.constant 1.000000e+00 : f32
    %500 = vector.broadcast %cst_271 : f32 to vector<12x32xf32>
    %501 = arith.addf %500, %499 : vector<12x32xf32>
    %502 = arith.mulf %464, %501 : vector<12x32xf32>
    %cst_272 = arith.constant dense<0.000000e+00> : vector<12x32xf32>
    %503 = tpu.matmul %502, %458, %cst_272 {dimension_numbers = #tpu.dot_dimension_numbers<[1], [0], [0], [1], [0, 0, 1, 1], [], []>} : vector<12x32xf32>, vector<32x32xf32>, vector<12x32xf32> -> vector<12x32xf32>
    %504 = vector.broadcast %459 : vector<1x32xf32> to vector<12x32xf32>
    %505 = arith.addf %503, %504 : vector<12x32xf32>
    %506 = arith.addf %455, %505 : vector<12x32xf32>
    %c5_273 = arith.constant 5 : index
    %c0_274 = arith.constant 0 : index
    %c0_275 = arith.constant 0 : index
    %507 = vector.load %arg12[%c5_273, %c0_274, %c0_275] : memref<6x1x32xf32, #tpu.memory_space<vmem>>, vector<1x1x32xf32>
    %508 = vector.shape_cast %507 : vector<1x1x32xf32> to vector<1x32xf32>
    %c5_276 = arith.constant 5 : index
    %c0_277 = arith.constant 0 : index
    %c0_278 = arith.constant 0 : index
    %509 = vector.load %arg13[%c5_276, %c0_277, %c0_278] : memref<6x1x32xf32, #tpu.memory_space<vmem>>, vector<1x1x32xf32>
    %510 = vector.shape_cast %509 : vector<1x1x32xf32> to vector<1x32xf32>
    %cst_279 = arith.constant dense<0.000000e+00> : vector<12xf32>
    %511 = vector.multi_reduction <add>, %506, %cst_279 [1] : vector<12x32xf32> to vector<12xf32>
    %512 = vector.shape_cast %511 : vector<12xf32> to vector<12x1xf32>
    %cst_280 = arith.constant 3.200000e+01 : f32
    %513 = vector.broadcast %cst_280 : f32 to vector<12x1xf32>
    %514 = arith.divf %512, %513 : vector<12x1xf32>
    %515 = vector.broadcast %514 : vector<12x1xf32> to vector<12x32xf32>
    %516 = arith.subf %506, %515 : vector<12x32xf32>
    %517 = arith.mulf %516, %516 : vector<12x32xf32>
    %cst_281 = arith.constant dense<0.000000e+00> : vector<12xf32>
    %518 = vector.multi_reduction <add>, %517, %cst_281 [1] : vector<12x32xf32> to vector<12xf32>
    %519 = vector.shape_cast %518 : vector<12xf32> to vector<12x1xf32>
    %cst_282 = arith.constant 3.200000e+01 : f32
    %520 = vector.broadcast %cst_282 : f32 to vector<12x1xf32>
    %521 = arith.divf %519, %520 : vector<12x1xf32>
    %cst_283 = arith.constant 9.99999974E-6 : f32
    %522 = vector.broadcast %cst_283 : f32 to vector<12x1xf32>
    %523 = arith.addf %521, %522 : vector<12x1xf32>
    %524 = math.rsqrt %523 : vector<12x1xf32>
    %525 = vector.broadcast %524 : vector<12x1xf32> to vector<12x32xf32>
    %526 = arith.mulf %516, %525 : vector<12x32xf32>
    %527 = vector.broadcast %508 : vector<1x32xf32> to vector<12x32xf32>
    %528 = arith.mulf %526, %527 : vector<12x32xf32>
    %529 = vector.broadcast %510 : vector<1x32xf32> to vector<12x32xf32>
    %530 = arith.addf %528, %529 : vector<12x32xf32>
    %c0_284 = arith.constant 0 : index
    %c0_285 = arith.constant 0 : index
    %531 = vector.load %arg22[%c0_284, %c0_285] : memref<32x12xf32, #tpu.memory_space<vmem>>, vector<32x12xf32>
    %cst_286 = arith.constant dense<0.000000e+00> : vector<12x12xf32>
    %532 = tpu.matmul %530, %531, %cst_286 {dimension_numbers = #tpu.dot_dimension_numbers<[1], [0], [0], [1], [0, 0, 1, 1], [], []>} : vector<12x32xf32>, vector<32x12xf32>, vector<12x12xf32> -> vector<12x12xf32>
    %c0_287 = arith.constant 0 : index
    %c0_288 = arith.constant 0 : index
    %533 = vector.load %arg23[%c0_287, %c0_288] : memref<1x12xf32, #tpu.memory_space<vmem>>, vector<1x12xf32>
    %534 = vector.broadcast %533 : vector<1x12xf32> to vector<12x12xf32>
    %535 = arith.addf %532, %534 : vector<12x12xf32>
    %536 = tpu.concatenate %530, %535 in 1 : vector<12x32xf32>, vector<12x12xf32> -> vector<12x44xf32>
    %c0_289 = arith.constant 0 : index
    %c0_290 = arith.constant 0 : index
    %c0_291 = arith.constant 0 : index
    %537 = vector.load %arg24[%c0_289, %c0_290, %c0_291] : memref<1x12x44xf32, #tpu.memory_space<vmem>>, vector<1x12x44xf32>
    %538 = vector.shape_cast %537 : vector<1x12x44xf32> to vector<12x44xf32>
    %539 = vector.shape_cast %536 : vector<12x44xf32> to vector<1x12x44xf32>
    tpu.vector_store %arg24[%c0_289, %c0_290, %c0_291], %539 {strides = array<i32>} : memref<1x12x44xf32, #tpu.memory_space<vmem>>, vector<1x12x44xf32>,
    return
  }
  func.func @transform_0(%arg0: i32) -> (i32, i32, i32) {
    %c0_i32 = arith.constant 0 : i32
    %c0_i32_0 = arith.constant 0 : i32
    %c0_i32_1 = arith.constant 0 : i32
    return %arg0, %c0_i32, %c0_i32_0 : i32, i32, i32
  }
  func.func @transform_1(%arg0: i32) -> (i32, i32, i32) {
    %c0_i32 = arith.constant 0 : i32
    %c0_i32_0 = arith.constant 0 : i32
    %c0_i32_1 = arith.constant 0 : i32
    return %arg0, %c0_i32, %c0_i32_0 : i32, i32, i32
  }
  func.func @transform_2(%arg0: i32) -> (i32, i32) {
    %c0_i32 = arith.constant 0 : i32
    %c0_i32_0 = arith.constant 0 : i32
    %c0_i32_1 = arith.constant 0 : i32
    return %c0_i32, %c0_i32_0 : i32, i32
  }
  func.func @transform_3(%arg0: i32) -> (i32, i32) {
    %c0_i32 = arith.constant 0 : i32
    %c0_i32_0 = arith.constant 0 : i32
    %c0_i32_1 = arith.constant 0 : i32
    return %c0_i32, %c0_i32_0 : i32, i32
  }
  func.func @transform_4(%arg0: i32) -> (i32, i32) {
    %c0_i32 = arith.constant 0 : i32
    %c0_i32_0 = arith.constant 0 : i32
    %c0_i32_1 = arith.constant 0 : i32
    return %c0_i32, %c0_i32_0 : i32, i32
  }
  func.func @transform_5(%arg0: i32) -> (i32, i32) {
    %c0_i32 = arith.constant 0 : i32
    %c0_i32_0 = arith.constant 0 : i32
    %c0_i32_1 = arith.constant 0 : i32
    return %c0_i32, %c0_i32_0 : i32, i32
  }
  func.func @transform_6(%arg0: i32) -> (i32, i32) {
    %c0_i32 = arith.constant 0 : i32
    %c0_i32_0 = arith.constant 0 : i32
    %c0_i32_1 = arith.constant 0 : i32
    return %c0_i32, %c0_i32_0 : i32, i32
  }
  func.func @transform_7(%arg0: i32) -> (i32, i32) {
    %c0_i32 = arith.constant 0 : i32
    %c0_i32_0 = arith.constant 0 : i32
    %c0_i32_1 = arith.constant 0 : i32
    return %c0_i32, %c0_i32_0 : i32, i32
  }
  func.func @transform_8(%arg0: i32) -> (i32, i32) {
    %c0_i32 = arith.constant 0 : i32
    %c0_i32_0 = arith.constant 0 : i32
    %c0_i32_1 = arith.constant 0 : i32
    return %c0_i32, %c0_i32_0 : i32, i32
  }
  func.func @transform_9(%arg0: i32) -> (i32, i32, i32) {
    %c0_i32 = arith.constant 0 : i32
    %c0_i32_0 = arith.constant 0 : i32
    %c0_i32_1 = arith.constant 0 : i32
    %c0_i32_2 = arith.constant 0 : i32
    return %c0_i32, %c0_i32_0, %c0_i32_1 : i32, i32, i32
  }
  func.func @transform_10(%arg0: i32) -> (i32, i32, i32) {
    %c0_i32 = arith.constant 0 : i32
    %c0_i32_0 = arith.constant 0 : i32
    %c0_i32_1 = arith.constant 0 : i32
    %c0_i32_2 = arith.constant 0 : i32
    return %c0_i32, %c0_i32_0, %c0_i32_1 : i32, i32, i32
  }
  func.func @transform_11(%arg0: i32) -> (i32, i32, i32) {
    %c0_i32 = arith.constant 0 : i32
    %c0_i32_0 = arith.constant 0 : i32
    %c0_i32_1 = arith.constant 0 : i32
    %c0_i32_2 = arith.constant 0 : i32
    return %c0_i32, %c0_i32_0, %c0_i32_1 : i32, i32, i32
  }
  func.func @transform_12(%arg0: i32) -> (i32, i32, i32) {
    %c0_i32 = arith.constant 0 : i32
    %c0_i32_0 = arith.constant 0 : i32
    %c0_i32_1 = arith.constant 0 : i32
    %c0_i32_2 = arith.constant 0 : i32
    return %c0_i32, %c0_i32_0, %c0_i32_1 : i32, i32, i32
  }
  func.func @transform_13(%arg0: i32) -> (i32, i32, i32) {
    %c0_i32 = arith.constant 0 : i32
    %c0_i32_0 = arith.constant 0 : i32
    %c0_i32_1 = arith.constant 0 : i32
    %c0_i32_2 = arith.constant 0 : i32
    return %c0_i32, %c0_i32_0, %c0_i32_1 : i32, i32, i32
  }
  func.func @transform_14(%arg0: i32) -> (i32, i32, i32) {
    %c0_i32 = arith.constant 0 : i32
    %c0_i32_0 = arith.constant 0 : i32
    %c0_i32_1 = arith.constant 0 : i32
    %c0_i32_2 = arith.constant 0 : i32
    return %c0_i32, %c0_i32_0, %c0_i32_1 : i32, i32, i32
  }
  func.func @transform_15(%arg0: i32) -> (i32, i32, i32) {
    %c0_i32 = arith.constant 0 : i32
    %c0_i32_0 = arith.constant 0 : i32
    %c0_i32_1 = arith.constant 0 : i32
    %c0_i32_2 = arith.constant 0 : i32
    return %c0_i32, %c0_i32_0, %c0_i32_1 : i32, i32, i32
  }
  func.func @transform_16(%arg0: i32) -> (i32, i32, i32) {
    %c0_i32 = arith.constant 0 : i32
    %c0_i32_0 = arith.constant 0 : i32
    %c0_i32_1 = arith.constant 0 : i32
    %c0_i32_2 = arith.constant 0 : i32
    return %c0_i32, %c0_i32_0, %c0_i32_1 : i32, i32, i32
  }
  func.func @transform_17(%arg0: i32) -> (i32, i32) {
    %c0_i32 = arith.constant 0 : i32
    %c0_i32_0 = arith.constant 0 : i32
    %c0_i32_1 = arith.constant 0 : i32
    return %c0_i32, %c0_i32_0 : i32, i32
  }
  func.func @transform_18(%arg0: i32) -> (i32, i32) {
    %c0_i32 = arith.constant 0 : i32
    %c0_i32_0 = arith.constant 0 : i32
    %c0_i32_1 = arith.constant 0 : i32
    return %c0_i32, %c0_i32_0 : i32, i32
  }
  func.func @transform_19(%arg0: i32) -> (i32, i32) {
    %c0_i32 = arith.constant 0 : i32
    %c0_i32_0 = arith.constant 0 : i32
    %c0_i32_1 = arith.constant 0 : i32
    return %c0_i32, %c0_i32_0 : i32, i32
  }
  func.func @transform_20(%arg0: i32) -> (i32, i32) {
    %c0_i32 = arith.constant 0 : i32
    %c0_i32_0 = arith.constant 0 : i32
    %c0_i32_1 = arith.constant 0 : i32
    return %c0_i32, %c0_i32_0 : i32, i32
  }
  func.func @transform_21(%arg0: i32) -> (i32, i32) {
    %c0_i32 = arith.constant 0 : i32
    %c0_i32_0 = arith.constant 0 : i32
    %c0_i32_1 = arith.constant 0 : i32
    return %c0_i32, %c0_i32_0 : i32, i32
  }
  func.func @transform_22(%arg0: i32) -> (i32, i32) {
    %c0_i32 = arith.constant 0 : i32
    %c0_i32_0 = arith.constant 0 : i32
    %c0_i32_1 = arith.constant 0 : i32
    return %c0_i32, %c0_i32_0 : i32, i32
  }
  func.func @transform_23(%arg0: i32) -> (i32, i32, i32) {
    %c0_i32 = arith.constant 0 : i32
    %c0_i32_0 = arith.constant 0 : i32
    %c0_i32_1 = arith.constant 0 : i32
    return %arg0, %c0_i32, %c0_i32_0 : i32, i32, i32
  }
}

</mosaic_0001>

<bundles_post_ra>
// kernel: decoder_layer_forward.1
= control target key start
LH: loop header
LB: loop body
LE: loop exit
PB: predicated region body
PF: predicated region fallthrough
CT: control target
= control target key end

     0   :  { %s7017_s0 = inlined_call_operand.vmem [shape: f32[2,12,32], index: 0, kind: input, shape index: {}]   ;;  %s7018_s1 = inlined_call_operand.vmem [shape: f32[2,18,32], index: 1, kind: input, shape index: {}]   ;;  %s7019_s2 = inlined_call_operand.vmem [shape: f32[8,32], index: 2, kind: input, shape index: {}]   ;;  %s7020_s3 = inlined_call_operand.vmem [shape: f32[48,32], index: 3, kind: input, shape index: {}]   ;;  %s7021_s4 = inlined_call_operand.vmem [shape: f32[32,32], index: 4, kind: input, shape index: {}]   ;;  %s7022_s5 = inlined_call_operand.vmem [shape: f32[48,12], index: 5, kind: input, shape index: {}]   ;;  %s7023_s6 = inlined_call_operand.vmem [shape: f32[32,12], index: 6, kind: input, shape index: {}]   ;;  %s7024_s7 = inlined_call_operand.vmem [shape: f32[48,8], index: 7, kind: input, shape index: {}]   ;;  %s7025_s8 = inlined_call_operand.vmem [shape: f32[48,18], index: 8, kind: input, shape index: {}]   ;;  %s7026_s9 = inlined_call_operand.vmem [shape: f32[16,32,32], index: 9, kind: input, shape index: {}]   ;;  %s7027_s10 = inlined_call_operand.vmem [shape: f32[16,1,32], index: 10, kind: input, shape index: {}]   ;;  %s7028_s11 = inlined_call_operand.vmem [shape: f32[6,1,32], index: 11, kind: input, shape index: {}]   ;;  %s7029_s12 = inlined_call_operand.vmem [shape: f32[6,1,32], index: 12, kind: input, shape index: {}]   ;;  %s7030_s13 = inlined_call_operand.vmem [shape: f32[2,32,64], index: 13, kind: input, shape index: {}]   ;;  %s7031_s14 = inlined_call_operand.vmem [shape: f32[2,1,64], index: 14, kind: input, shape index: {}]   ;;  %s7032_s15 = inlined_call_operand.vmem [shape: f32[2,64,32], index: 15, kind: input, shape index: {}]   ;;  %s7033_s16 = inlined_call_operand.vmem [shape: f32[2,1,32], index: 16, kind: input, shape index: {}]   ;;  %s7034_s17 = inlined_call_operand.vmem [shape: f32[32,32], index: 17, kind: input, shape index: {}]   ;;  %s7035_s18 = inlined_call_operand.vmem [shape: f32[1,32], index: 18, kind: input, shape index: {}]   ;;  %s7036_s19 = inlined_call_operand.vmem [shape: f32[32,32], index: 19, kind: input, shape index: {}]   ;;  %s7037_s20 = inlined_call_operand.vmem [shape: f32[1,32], index: 20, kind: input, shape index: {}]   ;;  %s7038_s21 = inlined_call_operand.vmem [shape: f32[32,12], index: 21, kind: input, shape index: {}]   ;;  %s7039_s22 = inlined_call_operand.vmem [shape: f32[1,12], index: 22, kind: input, shape index: {}]   ;;  %s7040_s23 = inlined_call_operand.vmem [shape: f32[2,12,44], index: 23, kind: output, shape index: {}]  }
   0x1   :  { %7048 = sst [smem:[#allocation2_spill]] %s7017_s0 }
   0x2   :  { %7049 = sst [smem:[#allocation3_spill]] %s7018_s1 }
   0x3   :  { %7050 = sst [smem:[#allocation4_spill]] %s7019_s2 }
   0x4   :  { %7051 = sst [smem:[#allocation5_spill]] %s7020_s3 }
   0x5   :  { %7052 = sst [smem:[#allocation6_spill]] %s7021_s4  ;;  %s6084_s4 = smov 0  }
   0x6   :  { %7053 = sst [smem:[#allocation7_spill]] %s7022_s5 }
   0x7   :  { %7054 = sst [smem:[#allocation8_spill]] %s7023_s6 }
   0x8   :  { %7055 = sst [smem:[#allocation9_spill]] %s7024_s7 }
   0x9 LB: > { %s4735_s30 = sadd.s32 4294967295, %s5957_s4   ;;  %p4739_p0 = scmp.ge.s32.totalorder %s5957_s4, 1  ;;  %s5957_s4 = sphi %s6084_s4, %s33_s4  }
   0xa   : > { %p647_p1 = scmp.lt.s32.totalorder %s5957_s4, 3 }
   0xc   : > { %p648_p2 = pnand %p4739_p0, %p647_p1 }
   0xd   : > { %v4745_v0 = vld [vmem:[%s7026_s9 + $0x20] sm:$0xff] (!%p648_p2)  ;;  %v4746_v1 = vld [vmem:[%s7026_s9 + $0x28] sm:$0xff] (!%p648_p2)  ;;  %p716_p3 = scmp.lt.s32.totalorder (!%p648_p2), %s4735_s30, 1  ;;  %v4747_v5 = vld [vmem:[%s7026_s9 + $0x30] sm:$0xff] (!%p648_p2)  ;;  %vm785_vm0 = vcmask (!%p648_p2), 261120   ;;  %s7056_s6 = sld [smem:[#allocation2_spill]] (!%p648_p2) }
   0xe   : > { %651 = sbr.rel (%p648_p2) target bundleno = 8499 (0x2133), region = 112  ;;  %v747_v2 = vld [vmem:[%s7026_s9] sm:$0xff] (!%p648_p2)  ;;  %v5573_v3 = vpack.c.bf16 (!%p648_p2), %v4746_v1, %v4745_v0  ;;  %v748_v4 = vld [vmem:[%s7026_s9 + $0x8] sm:$0xff] (!%p648_p2)  ;;  %v4748_v6 = vld [vmem:[%s7026_s9 + $0x38] sm:$0xff] (!%p648_p2)  ;;  %s7057_s25 = sld [smem:[#allocation5_spill]] (!%p648_p2)  ;;  %vm1031_vm2 = vcmask (!%p648_p2), 1043456  }
   0xf   : > { %v5565_v7 = vpack.c.bf16 (!%p648_p2), %v748_v4, %v747_v2  ;;  %v5577_v8 = vpack.c.bf16 (!%p648_p2), %v4748_v6, %v4747_v5  ;;  %v749_v9 = vld [vmem:[%s7026_s9 + $0x10] sm:$0xff] (!%p648_p2)  ;;  %v750_v10 = vld [vmem:[%s7026_s9 + $0x18] sm:$0xff] (!%p648_p2)  ;;  %v4763_v14 = vld [vmem:[%s7027_s10 + $0x1] ss:$0 sm:$0xff] (!%p648_p2)  ;;  %s7060_s0 = sld [smem:[#allocation7_spill]] (!%p648_p2)  ;;  %vm1175_vm3 = vcmask (!%p648_p2), 97280  }
  0x10   : > { %5574 = vmatprep.subr.bf16.mxu1 (!%p648_p2), %v5573_v3  ;;  %v5569_v11 = vpack.c.bf16 (!%p648_p2), %v750_v10, %v749_v9  ;;  %v4760_v16 = vld [vmem:[%s7027_s10] ss:$0 sm:$0xff] (!%p648_p2)  ;;  %vm6151_vm1 = vmpackc.low (!%p648_p2), %vm785_vm0, %vm785_vm0  ;;  %v4750_v43 = vld [vmem:[%s7026_s9 + $0x48] sm:$0xff] (!%p648_p2)  ;;  %vm5959_vm4 = vmmov (!%p648_p2), 1   ;;  %vm1478_vm6 = vcmask (!%p648_p2), 257024   ;;  %vm1680_vm9 = vcmask (!%p648_p2), 523264  }
  0x11   : > { %5576 = vmatpush3.bf16.msra.mxu1 (!%p648_p2), %v5573_v3  ;;  %5566 = vmatprep.subr.bf16.mxu0 (!%p648_p2), %v5565_v7  ;;  %v4749_v42 = vld [vmem:[%s7026_s9 + $0x40] sm:$0xff] (!%p648_p2)  ;;  %v4751_v44 = vld [vmem:[%s7026_s9 + $0x50] sm:$0xff] (!%p648_p2)  ;;  %v4752_v46 = vld [vmem:[%s7026_s9 + $0x58] sm:$0xff] (!%p648_p2)  ;;  %vm5961_vm10 = vmmov (!%p648_p2), 0   ;;  %s7063_s26 = sld [smem:[#allocation4_spill]] (!%p648_p2)  ;;  %s7064_s3 = sld [smem:[#allocation6_spill]] (!%p648_p2) }
  0x12   : > { %5568 = vmatpush3.bf16.msra.mxu0 (!%p648_p2), %v5565_v7  ;;  %5578 = vmatprep.subr.bf16.mxu1 (!%p648_p2), %v5577_v8  ;;  %v5581_v45 = vpack.c.bf16 (!%p648_p2), %v4750_v43, %v4749_v42  ;;  %v5585_v47 = vpack.c.bf16 (!%p648_p2), %v4752_v46, %v4751_v44  ;;  %vm6246_vm5 = vmpackc.low (!%p648_p2), %vm1031_vm2, %vm5959_vm4  ;;  %s7065_s2 = sld [smem:[#allocation8_spill]] (!%p648_p2)  ;;  %s7066_s5 = sld [smem:[#allocation9_spill]] (!%p648_p2)  ;;  %vm2846_vm11 = vcmask (!%p648_p2), 64512   ;;  %vm3931_vm14 = vcmask (!%p648_p2), 146432  }
  0x13   : > { %5570 = vmatprep.subr.bf16.mxu0 (!%p648_p2), %v5569_v11  ;;  %s7067_s7 = sld [smem:[#allocation3_spill]] (!%p648_p2)  ;;  %vm4016_vm15 = vcmask (!%p648_p2), 1041408   ;;  %vm4664_vm4 = vcmask (!%p648_p2), 359424  }
  0x14   : > { %v6147_v22 = vld [vmem:[%s7057_s25] sm:$0xff] (!%p648_p2)  ;;  %v6166_v32 = vld [vmem:[%s7057_s25 + $0x8] sm:$0xff] (!%p648_p2)  ;;  %v6171_v33 = vld [vmem:[%s7057_s25 + $0x10] sm:$0xff] (!%p648_p2) }
  0x15   : > { %s7070_s30 = smov (!%p716_p3, %s4735_s30), 1  ;;  %5580 = vmatpush3.bf16.msra.mxu1 %v5577_v8  ;;  %v6177_v35 = vld [vmem:[%s7057_s25 + $0x18] sm:$0xff]  ;;  %v6184_v37 = vld [vmem:[%s7057_s25 + $0x20] sm:$0xff]  ;;  %v6192_v40 = vld [vmem:[%s7057_s25 + $0x28] sm:$0xff] }
  0x16   : > { %s7046_s1 = sshll.u32 %s7070_s30, 4  ;;  %5572 = vmatpush3.bf16.msra.mxu0 %v5569_v11  ;;  %v773_v51 = vld [vmem:[%s7060_s0] sm:$0xff]  ;;  %v774_v53 = vld [vmem:[%s7060_s0 + $0x8] sm:$0xff]  ;;  %v775_v58 = vld [vmem:[%s7060_s0 + $0x10] sm:$0xff] }
  0x17   : > { %s720_s27 = scalar_lea.vmem %s7056_s6, %s7046_s1  ;;  %5582 = vmatprep.subr.bf16.mxu0 %v5581_v45  ;;  %v776_v62 = vld [vmem:[%s7060_s0 + $0x18] sm:$0xff]  ;;  %v777_v3 = vld [vmem:[%s7060_s0 + $0x20] sm:$0xff]  ;;  %v778_v8 = vld [vmem:[%s7060_s0 + $0x28] sm:$0xff]  ;;  %s5963_s6 = smov 32  }
  0x18   : > { %v6124_v12 = vld [vmem:[%s720_s27] sm:$0xff]  ;;  %v6130_v13 = vld [vmem:[%s720_s27 + $0x8] sm:$0xf]  ;;  %s7068_s27 = sshll.u32 %s7070_s30, 4 }
  0x19   : > { %5205 = vmatprep.mubr.msk.f32.mxu1 %vm785_vm0, %v6124_v12  ;;  %5194 = vmatprep.mubr.msk.f32.mxu0 %vm785_vm0, %v6124_v12  ;;  %s730_s1 = scalar_lea.vmem %s7040_s23, %s7068_s27 }
  0x1a   : > { %5206 = vmatmul.mubr.msk.f32.vlgmr.msra.gmra.mrb[0].mxu1 %vm785_vm0, %v6130_v13  ;;  %5195 = vmatmul.mubr.msk.f32.vlgmr.msra.gmra.mrb[0].mxu0 %vm785_vm0, %v6130_v13 }
  0x1b   : > { %5216 = vmatprep.mubr.msk.f32.mxu0 %vm785_vm0, %v6124_v12  ;;  %5584 = vmatpush3.bf16.msra.mxu0 %v5581_v45 }
  0x1c   : > { %5586 = vmatprep.subr.bf16.mxu0 %v5585_v47 }
  0x1f   : > { %5588 = vmatpush3.bf16.msra.mxu0 %v5585_v47 }
  0x22   : > { %5217 = vmatmul.mubr.msk.f32.vlgmr.msra.gmra.mrb[2].mxu0 %vm785_vm0, %v6130_v13 }
  0xed   : > { %v5207_v15 = vpop.f32.mrb[0].mxu1  ;;  %v5196_v19 = vpop.f32.mrb[0].mxu0 }
  0xee   : > { %v945_v17 = vadd.f32 %v5207_v15, %v4763_v14  ;;  %v939_v18 = vpop.f32.mrb[1].mxu1  ;;  %v864_v21 = vadd.f32 %v5196_v19, %v4760_v16  ;;  %v858_v23 = vpop.f32.mrb[1].mxu0 }
  0xef   : > { %v940_v20 = vadd.f32 %v4763_v14, %v939_v18  ;;  %v859_v24 = vadd.f32 %v4760_v16, %v858_v23 }
  0xf0   : > { %v1033_v27 = vrot.slane %v864_v21, 4 }
  0xf1   : > { %v5589_v26 = vpack.c.bf16 %v945_v17, %v940_v20  ;;  %v1032_v28 = vrot.slane %v859_v24, 4  ;;  %v1038_v29 = vmul.f32 %v859_v24, %v6147_v22  ;;  %v1041_v38 = vmul.f32 %v859_v24, %v6177_v35 }
  0xf3   : > { %5591 = vmatprep.subr.msk.bf16.mxu1 %vm6151_vm1, %v5589_v26  ;;  %v1037_v30 = vsel %vm1031_vm2, %v864_v21, %v1032_v28  ;;  %5223 = vmatprep.mubr.msk.f32.mxu1 %vm785_vm0, %v1038_v29  ;;  %v1034_v31 = vsel %vm1031_vm2, %v1032_v28, %v1033_v27 }
  0xf4   : > { %5594 = vmatpush3.bf16.xpose.msk.msra.mxu1 %vm6151_vm1, %v5589_v26  ;;  %v1039_v34 = vmul.f32 %v1037_v30, %v6166_v32  ;;  %v1040_v36 = vmul.f32 %v1034_v31, %v6171_v33  ;;  %v1042_v39 = vmul.f32 %v1037_v30, %v6184_v37  ;;  %v1043_v41 = vmul.f32 %v1034_v31, %v6192_v40 }
  0xfb   : > { %5224 = vmatmul.mubr.msk.f32.vlgmr.msra.gmra.mrb[2].mxu1 %vm785_vm0, %v1039_v34 }
  0xfc   : > { %5226 = vmatprep.mubr.msk.f32.mxu1 %vm785_vm0, %v1040_v36 }
  0xff   : > { %5227 = vmatmul.mubr.msk.f32.gmra.mrb[4].mxu1 %vm785_vm0, %v1041_v38 }
 0x100   : > { %5229 = vmatprep.mubr.msk.f32.mxu1 %vm785_vm0, %v1042_v39 }
 0x103   : > { %5230 = vmatmul.mubr.msk.f32.gmra.mrb[6].mxu1 %vm785_vm0, %v1043_v41 }
 0x1ce   : > { %v5225_v48 = vpop.f32.mrb[2].mxu1 }
 0x1cf   : > { %v1164_v49 = vmul.f32 0.35355338, %v5225_v48  ;;  %v1134_v50 = vpop.f32.mrb[3].mxu1 }
 0x1d0   : > { %v1163_v52 = vmul.f32 0.35355338, %v1134_v50 }
 0x1d1   : > { %v1170_v57 = vadd.f32 %v1164_v49, %v774_v53  ;;  %v5218_v53 = vpop.f32.mrb[2].mxu0 }
 0x1d2   : > { %v5228_v54 = vpop.f32.mrb[4].mxu1  ;;  %v1169_v55 = vadd.f32 %v1163_v52, %v773_v51 }
 0x1d3   : > { %v1144_v56 = vpop.f32.mrb[5].mxu1  ;;  %v1166_v59 = vmul.f32 0.35355338, %v5228_v54  ;;  %v1179_v2 = vsel %vm1175_vm3, %v1170_v57, -inf  ;;  %v4766_v54 = vld [vmem:[%s7027_s10 + $0x2] ss:$0 sm:$0xff] }
 0x1d4   : > { %v1165_v60 = vmul.f32 0.35355338, %v1144_v56  ;;  %v1176_v61 = vsel %vm1175_vm3, %v1169_v55, -inf  ;;  %v1026_v56 = vadd.f32 %v5218_v53, %v4766_v54 }
 0x1d5   : > { %1177 = vmax.xlane.f32.xlu0 %v1176_v61  ;;  %v1172_v7 = vadd.f32 %v1166_v59, %v776_v62  ;;  %v6457_v59 = vld [vmem:[%s7064_s3 + $0x18] sm:$0xff] }
 0x1d6   : > { %v5231_v63 = vpop.f32.mrb[6].mxu1  ;;  %v1171_v0 = vadd.f32 %v1165_v60, %v775_v58 }
 0x1d7   : > { %v1154_v1 = vpop.f32.mrb[7].mxu1  ;;  %v1168_v4 = vmul.f32 0.35355338, %v5231_v63  ;;  %v1185_v10 = vsel %vm1175_vm3, %v1172_v7, -inf }
 0x1d8   : > { %v1167_v5 = vmul.f32 0.35355338, %v1154_v1  ;;  %v1182_v6 = vsel %vm1175_vm3, %v1171_v0, -inf }
 0x1d9   : > { %1180 = vmax.xlane.f32.xlu0 %v1179_v2  ;;  %1183 = vmax.xlane.f32.xlu1 %v1182_v6  ;;  %v1174_v14 = vadd.f32 %v1168_v4, %v778_v8 }
 0x1da   : > { %v1173_v9 = vadd.f32 %v1167_v5, %v777_v3 }
 0x1db   : > { %v1191_v15 = vsel %vm1175_vm3, %v1174_v14, -inf }
 0x1dc   : > { %v1188_v11 = vsel %vm1175_vm3, %v1173_v9, -inf }
 0x1dd   : > { %1186 = vmax.xlane.f32.xlu1 %v1185_v10  ;;  %1189 = vmax.xlane.f32.xlu0 %v1188_v11 }
 0x1e1   : > { %1192 = vmax.xlane.f32.xlu1 %v1191_v15 }
 0x262   : > { %v1178_v16 = vpop.xlane.xlu0 %1177 }
 0x263   : > { %v1194_v17 = vsub.f32 %v1169_v55, %v1178_v16  ;;  %v1020_v55 = vpop.f32.mrb[3].mxu0  ;;  %v4753_v16 = vld [vmem:[%s7026_s9 + $0x60] sm:$0xff] }
 0x265   : > { %v1200_v18 = vmul.f32 1.442695, %v1194_v17  ;;  %v4754_v17 = vld [vmem:[%s7026_s9 + $0x68] sm:$0xff] }
 0x266   : > { %v1181_v19 = vpop.xlane.xlu0 %1180  ;;  %v1184_v20 = vpop.xlane.xlu1 %1183 }
 0x267   : > { %5803 = vpow2.f32 %v1200_v18  ;;  %v1195_v21 = vsub.f32 %v1170_v57, %v1181_v19  ;;  %v1196_v23 = vsub.f32 %v1171_v0, %v1184_v20  ;;  %v1021_v57 = vadd.f32 %v4766_v54, %v1020_v55  ;;  %v4755_v19 = vld [vmem:[%s7026_s9 + $0x70] sm:$0xff]  ;;  %v4756_v20 = vld [vmem:[%s7026_s9 + $0x78] sm:$0xff] }
 0x268   : > { %v5601_v18 = vpack.c.bf16 %v4754_v17, %v4753_v16  ;;  %v4787_v16 = vld [vmem:[%s7028_s11] ss:$0 sm:$0xff] }
 0x269   : > { %v1202_v24 = vmul.f32 1.442695, %v1195_v21  ;;  %v1204_v26 = vmul.f32 1.442695, %v1196_v23  ;;  %v5595_v58 = vpack.c.bf16 %v1026_v56, %v1021_v57  ;;  %v5605_v21 = vpack.c.bf16 %v4756_v20, %v4755_v19  ;;  %v4788_v20 = vld [vmem:[%s7029_s12] ss:$0 sm:$0xff] }
 0x26a   : > { %v1187_v27 = vpop.xlane.xlu1 %1186  ;;  %v1190_v28 = vpop.xlane.xlu0 %1189  ;;  %5602 = vmatprep.subr.bf16.mxu1 %v5601_v18 }
 0x26b   : > { %5805 = vpow2.f32 %v1202_v24  ;;  %v1197_v29 = vsub.f32 %v1172_v7, %v1187_v27  ;;  %v1198_v30 = vsub.f32 %v1173_v9, %v1190_v28  ;;  %5597 = vmatprep.subr.msk.bf16.mxu0 %vm6246_vm5, %v5595_v58  ;;  %5604 = vmatpush3.bf16.msra.mxu1 %v5601_v18 }
 0x26c   : > { %5807 = vpow2.f32 %v1204_v26  ;;  %5600 = vmatpush3.bf16.msk.msra.mxu0 %vm6246_vm5, %v5595_v58  ;;  %5606 = vmatprep.subr.bf16.mxu1 %v5605_v21 }
 0x26d   : > { %v1206_v31 = vmul.f32 1.442695, %v1197_v29  ;;  %v1208_v34 = vmul.f32 1.442695, %v1198_v30 }
 0x26e   : > { %v1193_v36 = vpop.xlane.xlu1 %1192 }
 0x26f   : > { %5809 = vpow2.f32 %v1206_v31  ;;  %v1199_v38 = vsub.f32 %v1174_v14, %v1193_v36  ;;  %5608 = vmatpush3.bf16.msra.mxu1 %v5605_v21 }
 0x270   : > { %5811 = vpow2.f32 %v1208_v34 }
 0x271   : > { %v5804_v39 = vpop.eup %5803  ;;  %v1210_v41 = vmul.f32 1.442695, %v1199_v38 }
 0x272   : > { %v1212_v42 = vsel %vm1175_vm3, %v5804_v39, 0.0 }
 0x273   : > { %5813 = vpow2.f32 %v1210_v41  ;;  %1213 = vadd.xlane.f32.xlu0 %v1212_v42 }
 0x275   : > { %v5806_v43 = vpop.eup %5805 }
 0x276   : > { %v5808_v44 = vpop.eup %5807  ;;  %v1215_v45 = vsel %vm1175_vm3, %v5806_v43, 0.0 }
 0x277   : > { %1216 = vadd.xlane.f32.xlu1 %v1215_v45  ;;  %v1218_v46 = vsel %vm1175_vm3, %v5808_v44, 0.0 }
 0x278   : > { %1219 = vadd.xlane.f32.xlu0 %v1218_v46 }
 0x279   : > { %v5810_v47 = vpop.eup %5809 }
 0x27a   : > { %v5812_v48 = vpop.eup %5811  ;;  %v1221_v49 = vsel %vm1175_vm3, %v5810_v47, 0.0 }
 0x27b   : > { %1222 = vadd.xlane.f32.xlu1 %v1221_v49  ;;  %v1224_v50 = vsel %vm1175_vm3, %v5812_v48, 0.0 }
 0x27c   : > { %1225 = vadd.xlane.f32.xlu0 %v1224_v50 }
 0x27d   : > { %v5814_v51 = vpop.eup %5813 }
 0x27e   : > { %v1227_v52 = vsel %vm1175_vm3, %v5814_v51, 0.0 }
 0x27f   : > { %1228 = vadd.xlane.f32.xlu1 %v1227_v52 }
 0x300   : > { %v1214_v60 = vpop.xlane.xlu0 %1213 }
 0x301   : > { %5815 = vrcp.f32 %v1214_v60 }
 0x304   : > { %v1217_v61 = vpop.xlane.xlu1 %1216 }
 0x305   : > { %5817 = vrcp.f32 %v1217_v61  ;;  %v1220_v62 = vpop.xlane.xlu0 %1219 }
 0x306   : > { %5819 = vrcp.f32 %v1220_v62 }
 0x308   : > { %v1223_v63 = vpop.xlane.xlu1 %1222 }
 0x309   : > { %5821 = vrcp.f32 %v1223_v63  ;;  %v1226_v0 = vpop.xlane.xlu0 %1225 }
 0x30a   : > { %5823 = vrcp.f32 %v1226_v0 }
 0x30b   : > { %v5816_v1 = vpop.eup %5815 }
 0x30c   : > { %v1229_v2 = vpop.xlane.xlu1 %1228  ;;  %v1236_v3 = vmul.f32 %v5816_v1, %v5804_v39 }
 0x30d   : > { %5825 = vrcp.f32 %v1229_v2  ;;  %v1520_v2 = vld [vmem:[%s7030_s13 + $0x8] sm:$0xff] }
 0x30e   : > { %5236 = vmatprep.mubr.msk.f32.mxu0 %vm1175_vm3, %v1236_v3 }
 0x30f   : > { %v5818_v4 = vpop.eup %5817 }
 0x310   : > { %v5820_v5 = vpop.eup %5819  ;;  %v1237_v6 = vmul.f32 %v5818_v4, %v5806_v43  ;;  %v1521_v4 = vld [vmem:[%s7030_s13 + $0x10] sm:$0xff] }
 0x311   : > { %v1238_v7 = vmul.f32 %v5820_v5, %v5808_v44  ;;  %v1522_v5 = vld [vmem:[%s7030_s13 + $0x18] sm:$0xff] }
 0x312   : > { %5237 = vmatmul.mubr.msk.f32.vlgmr.msra.gmra.mrb[4].mxu0 %vm1175_vm3, %v1237_v6  ;;  %v5613_v6 = vpack.c.bf16 %v1522_v5, %v1521_v4 }
 0x313   : > { %v5822_v8 = vpop.eup %5821  ;;  %5239 = vmatprep.mubr.msk.f32.mxu0 %vm1175_vm3, %v1238_v7 }
 0x314   : > { %v5824_v9 = vpop.eup %5823  ;;  %v1239_v10 = vmul.f32 %v5822_v8, %v5810_v47 }
 0x315   : > { %v1240_v11 = vmul.f32 %v5824_v9, %v5812_v48 }
 0x316   : > { %5240 = vmatmul.mubr.msk.f32.gmra.mrb[6].mxu0 %vm1175_vm3, %v1239_v10 }
 0x317   : > { %v5826_v14 = vpop.eup %5825  ;;  %5242 = vmatprep.mubr.msk.f32.mxu0 %vm1175_vm3, %v1240_v11 }
 0x318   : > { %v1241_v15 = vmul.f32 %v5826_v14, %v5814_v51 }
 0x31a   : > { %5243 = vmatmul.mubr.msk.f32.gmra.mrb[8].mxu0 %vm1175_vm3, %v1241_v15 }
 0x3e5   : > { %v5238_v23 = vpop.f32.mrb[4].mxu0 }
 0x3e6   : > { %v1329_v24 = vpop.f32.mrb[5].mxu0  ;;  %v1359_v26 = vmul.f32 %v5238_v23, %v6166_v32 }
 0x3e7   : > { %v1358_v36 = vmul.f32 %v1329_v24, %v6147_v22  ;;  %v4784_v22 = vld [vmem:[%s7027_s10 + $0x3] ss:$0 sm:$0xff] }
 0x3e8   : > { %v1366_v30 = vrot.slane %v1359_v26, 4 }
 0x3e9   : > { %v5241_v27 = vpop.f32.mrb[6].mxu0 }
 0x3ea   : > { %v1339_v28 = vpop.f32.mrb[7].mxu0  ;;  %v1361_v44 = vmul.f32 %v5241_v27, %v6177_v35  ;;  %v1524_v27 = vld [vmem:[%s7032_s15] sm:$0xff] }
 0x3eb   : > { %v1360_v29 = vmul.f32 %v1339_v28, %v6171_v33  ;;  %v1525_v28 = vld [vmem:[%s7032_s15 + $0x8] sm:$0xff] }
 0x3ed   : > { %v1367_v31 = vrot.slane %v1360_v29, 4  ;;  %v5244_v34 = vpop.f32.mrb[8].mxu0  ;;  %v5617_v29 = vpack.c.bf16 %v1525_v28, %v1524_v27 }
 0x3ee   : > { %v1363_v38 = vmul.f32 %v5244_v34, %v6192_v40  ;;  %v1349_v39 = vpop.f32.mrb[9].mxu0 }
 0x3ef   : > { %v1368_v41 = vsel %vm1031_vm2, %v1366_v30, %v1367_v31  ;;  %v1372_v42 = vadd.f32 %v1367_v31, %v1359_v26  ;;  %v1362_v43 = vmul.f32 %v1349_v39, %v6184_v37  ;;  %5618 = vmatprep.subr.bf16.mxu1 %v5617_v29  ;;  %v1526_v30 = vld [vmem:[%s7032_s15 + $0x10] sm:$0xff]  ;;  %v1527_v31 = vld [vmem:[%s7032_s15 + $0x18] sm:$0xff] }
 0x3f0   : > { %v1371_v32 = vadd.f32 %v1368_v41, %v1358_v36  ;;  %v1378_v45 = vrot.slane %v1363_v38, 4  ;;  %v5621_v34 = vpack.c.bf16 %v1527_v31, %v1526_v30  ;;  %v1528_v36 = vld [vmem:[%s7032_s15 + $0x20] sm:$0xff]  ;;  %v1529_v38 = vld [vmem:[%s7032_s15 + $0x28] sm:$0xff]  ;;  %v1530_v41 = vld [vmem:[%s7032_s15 + $0x30] sm:$0xff] }
 0x3f1   : > { %v1374_v46 = vadd.f32 %v1372_v42, %v1362_v43  ;;  %v1377_v47 = vrot.slane %v1362_v43, 4  ;;  %v5625_v39 = vpack.c.bf16 %v1529_v38, %v1528_v36  ;;  %v1531_v42 = vld [vmem:[%s7032_s15 + $0x38] sm:$0xff]  ;;  %v4792_v38 = vld [vmem:[%s7033_s16] ss:$0 sm:$0xff] }
 0x3f2   : > { %v1373_v33 = vadd.f32 %v1371_v32, %v1361_v44  ;;  %v5629_v43 = vpack.c.bf16 %v1531_v42, %v1530_v41  ;;  %v4789_v44 = vld [vmem:[%s7031_s14] ss:$0 sm:$0xff] }
 0x3f3   : > { %v1379_v48 = vsel %vm1031_vm2, %v1377_v47, %v1378_v45  ;;  %v1383_v49 = vadd.f32 %v1378_v45, %v1374_v46 }
 0x3f4   : > { %v1382_v50 = vadd.f32 %v1379_v48, %v1373_v33 }
 0x3f6   : > { %5253 = vmatprep.mubr.msk.f32.mxu1 %vm785_vm0, %v1382_v50 }
 0x3f7   : > { %5254 = vmatmul.mubr.msk.f32.vlgmr.msra.gmra.mrb[8].mxu1 %vm785_vm0, %v1383_v49 }
 0x3f8   : > { %5620 = vmatpush3.bf16.msra.mxu1 %v5617_v29 }
 0x3f9   : > { %5622 = vmatprep.subr.bf16.mxu1 %v5621_v34 }
 0x3fc   : > { %5624 = vmatpush3.bf16.msra.mxu1 %v5621_v34 }
 0x3fd   : > { %5626 = vmatprep.subr.bf16.mxu1 %v5625_v39 }
 0x400   : > { %5628 = vmatpush3.bf16.msra.mxu1 %v5625_v39 }
 0x401   : > { %5630 = vmatprep.subr.bf16.mxu1 %v5629_v43 }
 0x404   : > { %5632 = vmatpush3.bf16.msra.mxu1 %v5629_v43 }
 0x4ca   : > { %v5255_v37 = vpop.f32.mrb[8].mxu1 }
 0x4cb   : > { %v1468_v40 = vadd.f32 %v5255_v37, %v4784_v22  ;;  %v1462_v35 = vpop.f32.mrb[9].mxu1 }
 0x4cc   : > { %v1463_v51 = vadd.f32 %v4784_v22, %v1462_v35 }
 0x4cd   : > { %v1472_v52 = vadd.f32 %v1468_v40, %v6130_v13 }
 0x4ce   : > { %v1471_v53 = vadd.f32 %v1463_v51, %v6124_v12  ;;  %v1519_v12 = vld [vmem:[%s7030_s13] sm:$0xff] }
 0x4cf   : > { %v1479_v54 = vsel %vm1478_vm6, %v1472_v52, 0.0  ;;  %v5609_v3 = vpack.c.bf16 %v1520_v2, %v1519_v12 }
 0x4d0   : > { %1480 = vadd.xlane.f32.xlu1 %v1479_v54  ;;  %v1475_v55 = vsel %vm785_vm0, %v1471_v53, 0.0 }
 0x4d1   : > { %1476 = vadd.xlane.f32.xlu0 %v1475_v55  ;;  %5610 = vmatprep.subr.bf16.mxu0 %v5609_v3 }
 0x4d2   : > { %5612 = vmatpush3.bf16.msra.mxu0 %v5609_v3 }
 0x4d3   : > { %5614 = vmatprep.subr.bf16.mxu0 %v5613_v6 }
 0x4d6   : > { %5616 = vmatpush3.bf16.msra.mxu0 %v5613_v6 }
 0x55d   : > { %v1481_v56 = vpop.xlane.xlu1 %1480 }
 0x55e   : > { %v1484_v57 = vmul.f32 0.03125, %v1481_v56  ;;  %v1477_v58 = vpop.xlane.xlu0 %1476 }
 0x55f   : > { %v1483_v60 = vmul.f32 0.03125, %v1477_v58 }
 0x560   : > { %v1486_v61 = vsub.f32 %v1472_v52, %v1484_v57 }
 0x561   : > { %v1485_v62 = vsub.f32 %v1471_v53, %v1483_v60 }
 0x562   : > { %v1488_v63 = vmul.f32 %v1486_v61, %v1486_v61 }
 0x563   : > { %v1487_v0 = vmul.f32 %v1485_v62, %v1485_v62 }
 0x564   : > { %v1492_v1 = vsel %vm1478_vm6, %v1488_v63, 0.0 }
 0x565   : > { %1493 = vadd.xlane.f32.xlu1 %v1492_v1  ;;  %v1489_v13 = vsel %vm785_vm0, %v1487_v0, 0.0 }
 0x566   : > { %1490 = vadd.xlane.f32.xlu0 %v1489_v13 }
 0x5f2   : > { %v1494_v7 = vpop.xlane.xlu1 %1493 }
 0x5f3   : > { %v1496_v8 = vmul.f32 0.03125, %v1494_v7  ;;  %v1491_v9 = vpop.xlane.xlu0 %1490 }
 0x5f4   : > { %v1495_v10 = vmul.f32 0.03125, %v1491_v9 }
 0x5f5   : > { %v1498_v11 = vadd.f32 1e-05, %v1496_v8 }
 0x5f6   : > { %v1497_v14 = vadd.f32 1e-05, %v1495_v10 }
 0x5f7   : > { %5827 = vrsqrt.f32 %v1498_v11 }
 0x5f8   : > { %5829 = vrsqrt.f32 %v1497_v14 }
 0x601   : > { %v5828_v15 = vpop.eup %5827 }
 0x602   : > { %v5830_v17 = vpop.eup %5829  ;;  %v1502_v18 = vmul.f32 %v5828_v15, %v1486_v61 }
 0x603   : > { %v1501_v19 = vmul.f32 %v5830_v17, %v1485_v62 }
 0x604   : > { %v1510_v21 = vmul.f32 %v4787_v16, %v1502_v18 }
 0x605   : > { %v1509_v23 = vmul.f32 %v4787_v16, %v1501_v19 }
 0x606   : > { %v6311_v26 = vadd.f32 %v4788_v20, %v1510_v21 }
 0x607   : > { %v6309_v24 = vadd.f32 %v4788_v20, %v1509_v23 }
 0x609   : > { %5264 = vmatprep.mubr.msk.f32.mxu0 %vm785_vm0, %v6309_v24 }
 0x60a   : > { %5265 = vmatmul.mubr.msk.f32.vlgmr.msra.gmra.mrb[10].mxu0 %vm785_vm0, %v6311_v26 }
 0x6dd   : > { %v5266_v32 = vpop.f32.mrb[10].mxu0 }
 0x6de   : > { %v1617_v45 = vadd.f32 %v5266_v32, %v4789_v44  ;;  %v1611_v46 = vpop.f32.mrb[11].mxu0 }
 0x6df   : > { %v1612_v47 = vadd.f32 %v4789_v44, %v1611_v46 }
 0x6e0   : > { %v1623_v33 = vmul.f32 0.70710677, %v1617_v45  ;;  %v1621_v31 = vmul.f32 0.5, %v1617_v45 }
 0x6e1   : > { %v1622_v48 = vmul.f32 0.70710677, %v1612_v47  ;;  %v1620_v29 = vmul.f32 0.5, %v1612_v47 }
 0x6e2   : > { %v1625_v49 = vand.u32 2147483647, %v1623_v33  ;;  %vm1665_vm7 = vcmp.ge.f32.partialorder %v1623_v33, 0.0 }
 0x6e3   : > { %v1624_v50 = vand.u32 2147483647, %v1622_v48  ;;  %vm1664_vm8 = vcmp.ge.f32.partialorder %v1622_v48, 0.0 }
 0x6e4   : > { %v1627_v22 = vmul.f32 0.3275911, %v1625_v49  ;;  %v1653_v51 = vsub.f32 0.0, %v1625_v49 }
 0x6e5   : > { %v1626_v37 = vmul.f32 0.3275911, %v1624_v50  ;;  %v1652_v52 = vsub.f32 0.0, %v1624_v50 }
 0x6e6   : > { %v1629_v40 = vadd.f32 1.0, %v1627_v22  ;;  %v1655_v54 = vmul.f32 %v1653_v51, %v1625_v49  ;;  %v4800_v51 = vld [vmem:[%s7026_s9 + $0x88] sm:$0xff] }
 0x6e7   : > { %v1628_v35 = vadd.f32 1.0, %v1626_v37  ;;  %v1654_v57 = vmul.f32 %v1652_v52, %v1624_v50 }
 0x6e8   : > { %5831 = vrcp.f32 %v1629_v40  ;;  %v1658_v61 = vmul.f32 1.442695, %v1655_v54  ;;  %v4801_v54 = vld [vmem:[%s7026_s9 + $0x90] sm:$0xff] }
 0x6e9   : > { %5833 = vrcp.f32 %v1628_v35  ;;  %v1656_v0 = vmul.f32 1.442695, %v1654_v57  ;;  %v4803_v57 = vld [vmem:[%s7026_s9 + $0xa0] sm:$0xff] }
 0x6ea   : > { %5835 = vpow2.f32 %v1658_v61 }
 0x6eb   : > { %5837 = vpow2.f32 %v1656_v0  ;;  %v736_v0 = vld [vmem:[%s7063_s26] sm:$0xff]  ;;  %s5789_s26 = smul.u32 24, %s7070_s30 }
 0x6ed   : > { %s725_s28 = scalar_lea.vmem %s7067_s7, %s5789_s26 }
 0x6f2   : > { %v5832_v53 = vpop.eup %5831 }
 0x6f3   : > { %v5834_v55 = vpop.eup %5833  ;;  %v1635_v56 = vmul.f32 1.0614054, %v5832_v53 }
 0x6f4   : > { %v1634_v58 = vmul.f32 1.0614054, %v5834_v55  ;;  %v5836_v11 = vpop.eup %5835 }
 0x6f5   : > { %v1637_v60 = vadd.f32 -1.4531521, %v1635_v56  ;;  %v5838_v15 = vpop.eup %5837 }
 0x6f6   : > { %v1636_v62 = vadd.f32 -1.4531521, %v1634_v58  ;;  %v4804_v58 = vld [vmem:[%s7026_s9 + $0xa8] sm:$0xff] }
 0x6f7   : > { %v1639_v63 = vmul.f32 %v5832_v53, %v1637_v60  ;;  %v4807_v60 = vld [vmem:[%s7026_s9 + $0xc0] sm:$0xff]  ;;  %v5639_v61 = vpack.c.bf16 %v4804_v58, %v4803_v57  ;;  %v1841_v58 = vld [vmem:[%s7065_s2 + $0x18] sm:$0xff] }
 0x6f8   : > { %v1638_v1 = vmul.f32 %v5834_v55, %v1636_v62  ;;  %v4808_v62 = vld [vmem:[%s7026_s9 + $0xc8] sm:$0xff] }
 0x6f9   : > { %v1641_v13 = vadd.f32 1.4214138, %v1639_v63  ;;  %v5962_v63 = vmov 0.0  }
 0x6fa   : > { %v1640_v12 = vadd.f32 1.4214138, %v1638_v1  ;;  %5294 = vmatprep.mubr.msk.f32.mxu0 %vm5961_vm10, %v5962_v63  ;;  %v5647_v1 = vpack.c.bf16 %v4808_v62, %v4807_v60 }
 0x6fb   : > { %v1643_v2 = vmul.f32 %v5832_v53, %v1641_v13  ;;  %v4805_v13 = vld [vmem:[%s7026_s9 + $0xb0] sm:$0xff] }
 0x6fc   : > { %v1642_v3 = vmul.f32 %v5834_v55, %v1640_v12  ;;  %v4806_v12 = vld [vmem:[%s7026_s9 + $0xb8] sm:$0xff]  ;;  %5648 = vmatprep.subr.bf16.mxu1 %v5647_v1 }
 0x6fd   : > { %v1645_v4 = vadd.f32 -0.28449672, %v1643_v2  ;;  %v5643_v2 = vpack.c.bf16 %v4806_v12, %v4805_v13 }
 0x6fe   : > { %v1644_v5 = vadd.f32 -0.28449672, %v1642_v3  ;;  %v4809_v3 = vld [vmem:[%s7026_s9 + $0xd0] sm:$0xff] }
 0x6ff   : > { %v1647_v6 = vmul.f32 %v5832_v53, %v1645_v4  ;;  %v4810_v4 = vld [vmem:[%s7026_s9 + $0xd8] sm:$0xff] }
 0x700   : > { %v1646_v7 = vmul.f32 %v5834_v55, %v1644_v5  ;;  %v5651_v5 = vpack.c.bf16 %v4810_v4, %v4809_v3 }
 0x701   : > { %v1649_v8 = vadd.f32 0.2548296, %v1647_v6 }
 0x702   : > { %v1648_v9 = vadd.f32 0.2548296, %v1646_v7 }
 0x703   : > { %v1651_v10 = vmul.f32 %v5832_v53, %v1649_v8  ;;  %v5960_v53 = vmov 0.0|0.0  }
 0x704   : > { %v1650_v14 = vmul.f32 %v5834_v55, %v1648_v9  ;;  %5633 = vmatprep.subr.bf16.mxu0 %v5960_v53  ;;  %v4802_v55 = vld [vmem:[%s7026_s9 + $0x98] sm:$0xff] }
 0x705   : > { %v1661_v16 = vmul.f32 %v5836_v11, %v1651_v10  ;;  %v5637_v56 = vpack.c.bf16 %v4802_v55, %v4801_v54 }
 0x706   : > { %v1660_v17 = vmul.f32 %v5838_v15, %v1650_v14  ;;  %v4797_v15 = vld [vmem:[%s7028_s11 + $0x1] ss:$0 sm:$0xff] }
 0x707   : > { %v1663_v18 = vsub.f32 1.0, %v1661_v16 }
 0x708   : > { %v1662_v19 = vsub.f32 1.0, %v1660_v17 }
 0x709   : > { %v1667_v20 = vsub.f32 0.0, %v1663_v18 }
 0x70a   : > { %v1666_v21 = vsub.f32 0.0, %v1662_v19 }
 0x70b   : > { %v1669_v23 = vsel %vm1665_vm7, %v1663_v18, %v1667_v20 }
 0x70c   : > { %v1671_v27 = vadd.f32 1.0, %v1669_v23  ;;  %v1668_v28 = vsel %vm1664_vm8, %v1662_v19, %v1666_v21  ;;  %v4798_v19 = vld [vmem:[%s7029_s12 + $0x1] ss:$0 sm:$0xff] }
 0x70d   : > { %v1670_v30 = vadd.f32 1.0, %v1668_v28  ;;  %v4819_v28 = vld [vmem:[%s7027_s10 + $0x4] ss:$0 sm:$0xff] }
 0x70e   : > { %v1673_v36 = vmul.f32 %v1671_v27, %v1621_v31 }
 0x70f   : > { %v1672_v34 = vmul.f32 %v1670_v30, %v1620_v29  ;;  %v6423_v30 = vld [vmem:[%s7064_s3] sm:$0xff] }
 0x711   : > { %5283 = vmatprep.mubr.msk.f32.mxu1 %vm1680_vm9, %v1672_v34 }
 0x712   : > { %5284 = vmatmul.mubr.msk.f32.vlgmr.msra.gmra.mrb[10].mxu1 %vm1680_vm9, %v1673_v36 }
 0x713   : > { %5650 = vmatpush3.bf16.msra.mxu1 %v5647_v1 }
 0x714   : > { %5652 = vmatprep.subr.bf16.mxu1 %v5651_v5 }
 0x717   : > { %5654 = vmatpush3.bf16.msra.mxu1 %v5651_v5 }
 0x7e5   : > { %v5285_v39 = vpop.f32.mrb[10].mxu1 }
 0x7e6   : > { %v1759_v41 = vadd.f32 %v5285_v39, %v4792_v38  ;;  %v1753_v42 = vpop.f32.mrb[11].mxu1  ;;  %v4824_v39 = vld [vmem:[%s7027_s10 + $0x6] ss:$0 sm:$0xff] }
 0x7e7   : > { %v1754_v43 = vadd.f32 %v4792_v38, %v1753_v42  ;;  %v4821_v38 = vld [vmem:[%s7027_s10 + $0x5] ss:$0 sm:$0xff] }
 0x7e8   : > { %v1763_v44 = vadd.f32 %v1759_v41, %v6311_v26 }
 0x7e9   : > { %v1762_v32 = vadd.f32 %v1754_v43, %v6309_v24  ;;  %v4799_v24 = vld [vmem:[%s7026_s9 + $0x80] sm:$0xff] }
 0x7ea   : > { %v1771_v45 = vsel %vm1478_vm6, %v1763_v44, 0.0  ;;  %v5634_v52 = vpack.c.bf16 %v4800_v51, %v4799_v24 }
 0x7eb   : > { %1772 = vadd.xlane.f32.xlu1 %v1771_v45  ;;  %v1768_v46 = vsel %vm785_vm0, %v1762_v32, 0.0 }
 0x7ec   : > { %1769 = vadd.xlane.f32.xlu0 %v1768_v46  ;;  %5635 = vmatpush3.bf16.msra.mxu0 %v5634_v52  ;;  %v1838_v52 = vld [vmem:[%s7065_s2] sm:$0xff] }
 0x7ed   : > { %5636 = vmatprep.subr.bf16.mxu0 %v5960_v53 }
 0x7f0   : > { %5638 = vmatpush3.bf16.msra.mxu0 %v5637_v56 }
 0x7f1   : > { %5640 = vmatprep.subr.bf16.mxu0 %v5639_v61 }
 0x7f3   : > { %5295 = vmatmul.mubr.msk.f32.vlgmr.msra.gmra.mrb[12].mxu0 %vm785_vm0, %v736_v0  ;;  %v1840_v0 = vld [vmem:[%s7065_s2 + $0x10] sm:$0xff] }
 0x7f4   : > { %5642 = vmatpush3.bf16.msra.mxu0 %v5639_v61 }
 0x7f5   : > { %5644 = vmatprep.subr.bf16.mxu0 %v5643_v2 }
 0x7f8   : > { %5646 = vmatpush3.bf16.msra.mxu0 %v5643_v2 }
 0x878   : > { %v1773_v47 = vpop.xlane.xlu1 %1772 }
 0x879   : > { %v1775_v33 = vmul.f32 0.03125, %v1773_v47  ;;  %v1770_v48 = vpop.xlane.xlu0 %1769 }
 0x87a   : > { %v1774_v49 = vmul.f32 0.03125, %v1770_v48 }
 0x87b   : > { %v1777_v50 = vsub.f32 %v1763_v44, %v1775_v33 }
 0x87c   : > { %v1776_v22 = vsub.f32 %v1762_v32, %v1774_v49  ;;  %v6445_v49 = vld [vmem:[%s7064_s3 + $0x8] sm:$0xff] }
 0x87d   : > { %v1779_v37 = vmul.f32 %v1777_v50, %v1777_v50 }
 0x87e   : > { %v1778_v40 = vmul.f32 %v1776_v22, %v1776_v22 }
 0x87f   : > { %v1783_v35 = vsel %vm1478_vm6, %v1779_v37, 0.0 }
 0x880   : > { %1784 = vadd.xlane.f32.xlu1 %v1783_v35  ;;  %v1780_v26 = vsel %vm785_vm0, %v1778_v40, 0.0 }
 0x881   : > { %1781 = vadd.xlane.f32.xlu0 %v1780_v26  ;;  %v1839_v26 = vld [vmem:[%s7065_s2 + $0x8] sm:$0xff] }
 0x8c6   : > { %v1917_v29 = vpop.f32.mrb[12].mxu0 }
 0x8c7   : > { %v1918_v31 = vadd.f32 %v4819_v28, %v1917_v29  ;;  %v5296_v34 = vpop.f32.mrb[13].mxu0 }
 0x8c9   : > { %v2089_v36 = vmul.f32 %v1918_v31, %v6423_v30  ;;  %v2092_v40 = vmul.f32 %v1918_v31, %v6457_v59 }
 0x90d   : > { %v1785_v6 = vpop.xlane.xlu1 %1784 }
 0x90e   : > { %v1787_v7 = vmul.f32 0.03125, %v1785_v6  ;;  %v1782_v8 = vpop.xlane.xlu0 %1781 }
 0x90f   : > { %v1786_v9 = vmul.f32 0.03125, %v1782_v8 }
 0x910   : > { %v1789_v10 = vadd.f32 1e-05, %v1787_v7 }
 0x911   : > { %v1788_v11 = vadd.f32 1e-05, %v1786_v9 }
 0x912   : > { %5839 = vrsqrt.f32 %v1789_v10 }
 0x913   : > { %5841 = vrsqrt.f32 %v1788_v11 }
 0x91c   : > { %v5840_v14 = vpop.eup %5839 }
 0x91d   : > { %v5842_v16 = vpop.eup %5841  ;;  %v1793_v17 = vmul.f32 %v5840_v14, %v1777_v50  ;;  %v6450_v50 = vld [vmem:[%s7064_s3 + $0x10] sm:$0xff] }
 0x91e   : > { %v1792_v18 = vmul.f32 %v5842_v16, %v1776_v22  ;;  %v2090_v22 = vmul.f32 %v1918_v31, %v6445_v49  ;;  %v2091_v37 = vmul.f32 %v1918_v31, %v6450_v50 }
 0x91f   : > { %v1801_v20 = vmul.f32 %v4797_v15, %v1793_v17 }
 0x920   : > { %v1800_v21 = vmul.f32 %v4797_v15, %v1792_v18 }
 0x921   : > { %v6407_v27 = vadd.f32 %v4798_v19, %v1801_v20 }
 0x922   : > { %v6405_v23 = vadd.f32 %v4798_v19, %v1800_v21 }
 0x924   : > { %5305 = vmatprep.mubr.msk.f32.mxu0 %vm785_vm0, %v6405_v23  ;;  %5316 = vmatprep.mubr.msk.f32.mxu1 %vm785_vm0, %v6405_v23 }
 0x925   : > { %5306 = vmatmul.mubr.msk.f32.vlgmr.msra.gmra.mrb[14].mxu0 %vm785_vm0, %v6407_v27  ;;  %5317 = vmatmul.mubr.msk.f32.vlgmr.msra.gmra.mrb[12].mxu1 %vm785_vm0, %v6407_v27 }
 0x926   : > { %5323 = vmatprep.mubr.msk.f32.mxu0 %vm785_vm0, %v2089_v36 }
 0x9f8   : > { %v5307_v41 = vpop.f32.mrb[14].mxu0  ;;  %v5318_v42 = vpop.f32.mrb[12].mxu1 }
 0x9f9   : > { %v2005_v43 = vadd.f32 %v5307_v41, %v4821_v38  ;;  %v2086_v44 = vadd.f32 %v5318_v42, %v4824_v39  ;;  %v1999_v32 = vpop.f32.mrb[15].mxu0  ;;  %v2080_v45 = vpop.f32.mrb[13].mxu1 }
 0x9fa   : > { %v2000_v46 = vadd.f32 %v4821_v38, %v1999_v32  ;;  %v2081_v47 = vadd.f32 %v4824_v39, %v2080_v45  ;;  %v4840_v38 = vld [vmem:[%s7026_s9 + $0x100] sm:$0xff]  ;;  %v4841_v39 = vld [vmem:[%s7026_s9 + $0x108] sm:$0xff] }
 0x9fb   : > { %v5673_v41 = vpack.c.bf16 %v4841_v39, %v4840_v38  ;;  %v6566_v39 = vld [vmem:[%s7057_s25] sm:$0xff] }
 0x9fc   : > { %v5655_v33 = vpack.c.bf16 %v2005_v43, %v2000_v46  ;;  %v5661_v48 = vpack.c.bf16 %v2086_v44, %v2081_v47  ;;  %v4842_v46 = vld [vmem:[%s7026_s9 + $0x110] sm:$0xff]  ;;  %v4843_v47 = vld [vmem:[%s7026_s9 + $0x118] sm:$0xff] }
 0x9fe   : > { %5657 = vmatprep.subr.msk.bf16.mxu0 %vm6151_vm1, %v5655_v33  ;;  %5663 = vmatprep.subr.msk.bf16.mxu1 %vm6246_vm5, %v5661_v48 }
 0x9ff   : > { %5660 = vmatpush3.bf16.xpose.msk.msra.mxu0 %vm6151_vm1, %v5655_v33  ;;  %5666 = vmatpush3.bf16.msk.msra.mxu1 %vm6246_vm5, %v5661_v48 }
 0xa00   : > { %5667 = vmatprep.subr.bf16.mxu0 %v5960_v53  ;;  %5674 = vmatprep.subr.bf16.mxu1 %v5673_v41 }
 0xa06   : > { %5324 = vmatmul.mubr.msk.f32.vlgmr.msra.gmra.mrb[16].mxu0 %vm785_vm0, %v2090_v22 }
 0xa07   : > { %5326 = vmatprep.mubr.msk.f32.mxu0 %vm785_vm0, %v2091_v37  ;;  %v5677_v37 = vpack.c.bf16 %v4843_v47, %v4842_v46 }
 0xa0a   : > { %5327 = vmatmul.mubr.msk.f32.gmra.mrb[18].mxu0 %vm785_vm0, %v2092_v40 }
 0xa0b   : > { %5347 = vmatprep.mubr.msk.f32.mxu0 %vm5961_vm10, %v5962_v63 }
 0xad9   : > { %v5325_v35 = vpop.f32.mrb[16].mxu0 }
 0xada   : > { %v2197_v24 = vmul.f32 0.35355338, %v5325_v35  ;;  %v2177_v51 = vpop.f32.mrb[17].mxu0 }
 0xadb   : > { %v2196_v54 = vmul.f32 0.35355338, %v2177_v51  ;;  %v4811_v51 = vld [vmem:[%s7026_s9 + $0xe0] sm:$0xff] }
 0xadc   : > { %v2201_v55 = vadd.f32 %v2197_v24, %v1839_v26 }
 0xadd   : > { %v5328_v56 = vpop.f32.mrb[18].mxu0  ;;  %v2200_v57 = vadd.f32 %v2196_v54, %v1838_v52  ;;  %v4812_v52 = vld [vmem:[%s7026_s9 + $0xe8] sm:$0xff] }
 0xade   : > { %v2199_v60 = vmul.f32 0.35355338, %v5328_v56  ;;  %v2187_v61 = vpop.f32.mrb[19].mxu0  ;;  %v2207_v62 = vsel %vm1175_vm3, %v2201_v55, -inf  ;;  %v5668_v54 = vpack.c.bf16 %v4812_v52, %v4811_v51  ;;  %v4814_v56 = vld [vmem:[%s7026_s9 + $0xf8] sm:$0xff] }
 0xadf   : > { %v2198_v1 = vmul.f32 0.35355338, %v2187_v61  ;;  %2208 = vmax.xlane.f32.xlu1 %v2207_v62  ;;  %v2204_v13 = vsel %vm1175_vm3, %v2200_v57, -inf  ;;  %v6613_v52 = vld [vmem:[%s7057_s25 + $0x18] sm:$0xff] }
 0xae0   : > { %2205 = vmax.xlane.f32.xlu0 %v2204_v13  ;;  %v2203_v12 = vadd.f32 %v2199_v60, %v1841_v58  ;;  %5669 = vmatpush3.bf16.msra.mxu0 %v5668_v54  ;;  %v4848_v58 = vld [vmem:[%s7026_s9 + $0x140] sm:$0xff]  ;;  %v4849_v60 = vld [vmem:[%s7026_s9 + $0x148] sm:$0xff] }
 0xae1   : > { %v2202_v2 = vadd.f32 %v2198_v1, %v1840_v0  ;;  %5670 = vmatprep.subr.bf16.mxu0 %v5960_v53  ;;  %v5688_v61 = vpack.c.bf16 %v4849_v60, %v4848_v58 }
 0xae2   : > { %v2213_v3 = vsel %vm1175_vm3, %v2203_v12, -inf }
 0xae3   : > { %2214 = vmax.xlane.f32.xlu1 %v2213_v3  ;;  %v2210_v4 = vsel %vm1175_vm3, %v2202_v2, -inf }
 0xae4   : > { %2211 = vmax.xlane.f32.xlu0 %v2210_v4 }
 0xb6c   : > { %v2209_v5 = vpop.xlane.xlu1 %2208 }
 0xb6d   : > { %v2217_v6 = vsub.f32 %v2201_v55, %v2209_v5  ;;  %v2206_v7 = vpop.xlane.xlu0 %2205  ;;  %v4813_v55 = vld [vmem:[%s7026_s9 + $0xf0] sm:$0xff]  ;;  %v4860_v5 = vld [vmem:[%s7027_s10 + $0x8] ss:$0 sm:$0xff] }
 0xb6e   : > { %v2216_v8 = vsub.f32 %v2200_v57, %v2206_v7  ;;  %v5671_v57 = vpack.c.bf16 %v4814_v56, %v4813_v55 }
 0xb6f   : > { %v2222_v9 = vmul.f32 1.442695, %v2217_v6  ;;  %v4844_v6 = vld [vmem:[%s7026_s9 + $0x120] sm:$0xff] }
 0xb70   : > { %v2220_v10 = vmul.f32 1.442695, %v2216_v8  ;;  %v2215_v11 = vpop.xlane.xlu1 %2214  ;;  %5672 = vmatpush3.bf16.msra.mxu0 %v5671_v57  ;;  %v2463_v57 = vld [vmem:[%s7066_s5 + $0x8] sm:$0xff] }
 0xb71   : > { %5843 = vpow2.f32 %v2222_v9  ;;  %v2219_v14 = vsub.f32 %v2203_v12, %v2215_v11  ;;  %v2212_v15 = vpop.xlane.xlu0 %2211  ;;  %5681 = vmatprep.subr.bf16.mxu0 %v5960_v53 }
 0xb72   : > { %5845 = vpow2.f32 %v2220_v10  ;;  %v2218_v16 = vsub.f32 %v2202_v2, %v2212_v15 }
 0xb73   : > { %v2226_v17 = vmul.f32 1.442695, %v2219_v14 }
 0xb74   : > { %v2224_v18 = vmul.f32 1.442695, %v2218_v16 }
 0xb75   : > { %5847 = vpow2.f32 %v2226_v17 }
 0xb76   : > { %5849 = vpow2.f32 %v2224_v18  ;;  %v4846_v18 = vld [vmem:[%s7026_s9 + $0x130] sm:$0xff] }
 0xb7b   : > { %v5844_v19 = vpop.eup %5843 }
 0xb7c   : > { %v5846_v20 = vpop.eup %5845  ;;  %v2231_v21 = vsel %vm1175_vm3, %v5844_v19, 0.0 }
 0xb7d   : > { %2232 = vadd.xlane.f32.xlu1 %v2231_v21  ;;  %v2228_v28 = vsel %vm1175_vm3, %v5846_v20, 0.0 }
 0xb7e   : > { %2229 = vadd.xlane.f32.xlu0 %v2228_v28  ;;  %v4851_v28 = vld [vmem:[%s7026_s9 + $0x158] sm:$0xff] }
 0xb7f   : > { %v5848_v29 = vpop.eup %5847 }
 0xb80   : > { %v5850_v31 = vpop.eup %5849  ;;  %v2237_v34 = vsel %vm1175_vm3, %v5848_v29, 0.0 }
 0xb81   : > { %2238 = vadd.xlane.f32.xlu1 %v2237_v34  ;;  %v2234_v36 = vsel %vm1175_vm3, %v5850_v31, 0.0 }
 0xb82   : > { %2235 = vadd.xlane.f32.xlu0 %v2234_v36 }
 0xc0a   : > { %v2233_v42 = vpop.xlane.xlu1 %2232 }
 0xc0b   : > { %5851 = vrcp.f32 %v2233_v42  ;;  %v2230_v43 = vpop.xlane.xlu0 %2229  ;;  %v6572_v42 = vld [vmem:[%s7057_s25 + $0x20] sm:$0xff] }
 0xc0c   : > { %5853 = vrcp.f32 %v2230_v43 }
 0xc0e   : > { %v2239_v44 = vpop.xlane.xlu1 %2238 }
 0xc0f   : > { %5855 = vrcp.f32 %v2239_v44  ;;  %v2236_v32 = vpop.xlane.xlu0 %2235  ;;  %v4863_v44 = vld [vmem:[%s7027_s10 + $0x9] ss:$0 sm:$0xff] }
 0xc10   : > { %5857 = vrcp.f32 %v2236_v32 }
 0xc15   : > { %v5852_v45 = vpop.eup %5851 }
 0xc16   : > { %v5854_v33 = vpop.eup %5853  ;;  %v2245_v22 = vmul.f32 %v5852_v45, %v5844_v19  ;;  %v4847_v19 = vld [vmem:[%s7026_s9 + $0x138] sm:$0xff]  ;;  %v4865_v45 = vld [vmem:[%s7027_s10 + $0xa] ss:$0 sm:$0xff] }
 0xc17   : > { %v2244_v48 = vmul.f32 %v5854_v33, %v5846_v20  ;;  %v4850_v20 = vld [vmem:[%s7026_s9 + $0x150] sm:$0xff]  ;;  %v5685_v21 = vpack.c.bf16 %v4847_v19, %v4846_v18 }
 0xc19   : > { %v5856_v40 = vpop.eup %5855  ;;  %5333 = vmatprep.mubr.msk.f32.mxu1 %vm1175_vm3, %v2244_v48 }
 0xc1a   : > { %v5858_v35 = vpop.eup %5857  ;;  %5334 = vmatmul.mubr.msk.f32.vlgmr.msra.gmra.mrb[14].mxu1 %vm1175_vm3, %v2245_v22  ;;  %v2247_v24 = vmul.f32 %v5856_v40, %v5848_v29  ;;  %v5691_v29 = vpack.c.bf16 %v4851_v28, %v4850_v20 }
 0xc1b   : > { %5676 = vmatpush3.bf16.msra.mxu1 %v5673_v41  ;;  %v2246_v26 = vmul.f32 %v5858_v35, %v5850_v31  ;;  %v4838_v31 = vld [vmem:[%s7027_s10 + $0x7] ss:$0 sm:$0xff]  ;;  %v6598_v35 = vld [vmem:[%s7057_s25 + $0x8] sm:$0xff] }
 0xc1c   : > { %5678 = vmatprep.subr.bf16.mxu1 %v5677_v37 }
 0xc1d   : > { %5336 = vmatprep.mubr.msk.f32.mxu1 %vm1175_vm3, %v2246_v26 }
 0xc1e   : > { %5337 = vmatmul.mubr.msk.f32.gmra.mrb[16].mxu1 %vm1175_vm3, %v2247_v24  ;;  %v6604_v24 = vld [vmem:[%s7057_s25 + $0x10] sm:$0xff]  ;;  %vm4666_vm3 = vcmask 355328  }
 0xc1f   : > { %5680 = vmatpush3.bf16.msra.mxu1 %v5677_v37  ;;  %5358 = vmatprep.mubr.msk.f32.mxu1 %vm785_vm0, %v6405_v23  ;;  %v6592_v37 = vld [vmem:[%s7057_s25 + $0x28] sm:$0xff] }
 0xc20   : > { %5687 = vmatprep.subr.bf16.mxu1 %v5960_v53 }
 0xc22   : > { %5359 = vmatmul.mubr.msk.f32.vlgmr.msra.gmra.mrb[18].mxu1 %vm785_vm0, %v6407_v27 }
 0xc23   : > { %5380 = vmatprep.mubr.msk.f32.mxu1 %vm5961_vm10, %v5962_v63  ;;  %5689 = vmatpush3.bf16.msra.mxu1 %v5688_v61 }
 0xc24   : > { %5690 = vmatprep.subr.bf16.mxu1 %v5960_v53 }
 0xc27   : > { %5692 = vmatpush3.bf16.msra.mxu1 %v5691_v29 }
 0xced   : > { %v5335_v62 = vpop.f32.mrb[14].mxu1 }
 0xcee   : > { %v2349_v0 = vmul.f32 %v5335_v62, %v6445_v49  ;;  %v2329_v1 = vpop.f32.mrb[15].mxu1  ;;  %v4845_v49 = vld [vmem:[%s7026_s9 + $0x128] sm:$0xff]  ;;  %v2462_v62 = vld [vmem:[%s7066_s5] sm:$0xff] }
 0xcef   : > { %v2348_v13 = vmul.f32 %v2329_v1, %v6423_v30  ;;  %v5682_v11 = vpack.c.bf16 %v4845_v49, %v4844_v6 }
 0xcf1   : > { %v2352_v12 = vadd.f32 %v2349_v0, %v2348_v13  ;;  %v5338_v2 = vpop.f32.mrb[16].mxu1 }
 0xcf2   : > { %v2339_v3 = vpop.f32.mrb[17].mxu1  ;;  %v2351_v7 = vmul.f32 %v5338_v2, %v6457_v59  ;;  %v2465_v2 = vld [vmem:[%s7066_s5 + $0x18] sm:$0xff] }
 0xcf3   : > { %v2350_v4 = vmul.f32 %v2339_v3, %v6450_v50  ;;  %v2464_v3 = vld [vmem:[%s7066_s5 + $0x10] sm:$0xff] }
 0xcf5   : > { %v2353_v30 = vadd.f32 %v2352_v12, %v2350_v4  ;;  %v5360_v8 = vpop.f32.mrb[18].mxu1 }
 0xcf6   : > { %v2546_v9 = vadd.f32 %v5360_v8, %v4860_v5  ;;  %v2540_v10 = vpop.f32.mrb[19].mxu1 }
 0xcf7   : > { %v2354_v50 = vadd.f32 %v2353_v30, %v2351_v7  ;;  %v2541_v14 = vadd.f32 %v4860_v5, %v2540_v10 }
 0xcf8   : > { %v2707_v15 = vrot.slane %v2546_v9, 4 }
 0xcf9   : > { %v2706_v16 = vrot.slane %v2541_v14, 4  ;;  %5348 = vmatmul.mubr.msk.f32.vlgmr.msra.gmra.mrb[20].mxu0 %vm785_vm0, %v2354_v50  ;;  %v2712_v41 = vmul.f32 %v6566_v39, %v2541_v14  ;;  %v2715_v54 = vmul.f32 %v6613_v52, %v2541_v14 }
 0xcfa   : > { %5683 = vmatpush3.bf16.msra.mxu0 %v5682_v11  ;;  %5369 = vmatprep.mubr.msk.f32.mxu0 %vm5961_vm10, %v5962_v63  ;;  %v2466_v11 = vld [vmem:[%s7066_s5 + $0x20] sm:$0xff] }
 0xcfb   : > { %v2708_v17 = vsel %vm1031_vm2, %v2706_v16, %v2707_v15  ;;  %5684 = vmatprep.subr.bf16.mxu0 %v5960_v53  ;;  %v2711_v59 = vsel %vm1031_vm2, %v2546_v9, %v2706_v16  ;;  %v2467_v9 = vld [vmem:[%s7066_s5 + $0x28] sm:$0xff] }
 0xcfc   : > { %v2716_v43 = vmul.f32 %v6572_v42, %v2711_v59  ;;  %v2717_v40 = vmul.f32 %v6592_v37, %v2708_v17  ;;  %v2713_v26 = vmul.f32 %v6598_v35, %v2711_v59  ;;  %v2714_v51 = vmul.f32 %v6604_v24, %v2708_v17 }
 0xcfe   : > { %5686 = vmatpush3.bf16.msra.mxu0 %v5685_v21 }
 0xdcc   : > { %v2430_v34 = vpop.f32.mrb[20].mxu0 }
 0xdcd   : > { %v2431_v36 = vadd.f32 %v4838_v31, %v2430_v34  ;;  %v5349_v38 = vpop.f32.mrb[21].mxu0 }
 0xdcf   : > { %5370 = vmatmul.mubr.msk.f32.vlgmr.msra.gmra.mrb[22].mxu0 %vm785_vm0, %v2431_v36  ;;  %5381 = vmatmul.mubr.msk.f32.vlgmr.msra.gmra.mrb[20].mxu1 %vm785_vm0, %v2431_v36 }
 0xdd0   : > { %5385 = vmatprep.mubr.msk.f32.mxu0 %vm785_vm0, %v2712_v41  ;;  %5391 = vmatprep.mubr.msk.f32.mxu1 %vm785_vm0, %v2716_v43 }
 0xea2   : > { %v2624_v32 = vpop.f32.mrb[22].mxu0  ;;  %v2700_v46 = vpop.f32.mrb[20].mxu1 }
 0xea3   : > { %v2625_v47 = vadd.f32 %v4863_v44, %v2624_v32  ;;  %v5371_v33 = vpop.f32.mrb[23].mxu0  ;;  %v5382_v48 = vpop.f32.mrb[21].mxu1  ;;  %v2701_v22 = vadd.f32 %v4865_v45, %v2700_v46 }
 0xea5   : > { %5383 = vmatprep.subr.msk.mxu0 %vm785_vm0, %v2625_v47  ;;  %5787 = vmatprep.subr.msk.mxu1 %vm785_vm0, %v2625_v47 }
 0xea6   : > { %5384 = vmatpush3.xpose.msk.msra.mxu0 %vm785_vm0, %v2625_v47  ;;  %5788 = vmatpush3.xpose.msk.msra.mxu1 %vm785_vm0, %v2625_v47 }
 0xea7   : > { %5394 = vmatprep.subr.mxu1 %v2701_v22 }
 0xea9   : > { %5386 = vmatmul.mubr.msk.f32.vlgmr.msra.gmra.mrb[24].mxu0 %vm785_vm0, %v2713_v26  ;;  %5392 = vmatmul.mubr.msk.f32.vlgmr.msra.gmra.mrb[22].mxu1 %vm785_vm0, %v2717_v40 }
 0xeaa   : > { %5388 = vmatprep.mubr.msk.f32.mxu0 %vm785_vm0, %v2714_v51  ;;  %5395 = vmatpush3.msra.mxu1 %v2701_v22 }
 0xead   : > { %5389 = vmatmul.mubr.msk.f32.gmra.mrb[26].mxu0 %vm785_vm0, %v2715_v54 }
 0xf7c   : > { %v5387_v55 = vpop.f32.mrb[24].mxu0  ;;  %v5393_v56 = vpop.f32.mrb[22].mxu1 }
 0xf7d   : > { %v2835_v58 = vmul.f32 0.35355338, %v5387_v55  ;;  %v2805_v60 = vpop.f32.mrb[25].mxu0  ;;  %v2825_v61 = vpop.f32.mrb[23].mxu1  ;;  %v2839_v4 = vmul.f32 0.35355338, %v5393_v56 }
 0xf7e   : > { %v2834_v0 = vmul.f32 0.35355338, %v2805_v60  ;;  %v2838_v7 = vmul.f32 0.35355338, %v2825_v61 }
 0xf7f   : > { %v2841_v1 = vadd.f32 %v2835_v58, %v2463_v57  ;;  %v2845_v15 = vadd.f32 %v2839_v4, %v2467_v9 }
 0xf80   : > { %v5390_v13 = vpop.f32.mrb[26].mxu0  ;;  %v2840_v12 = vadd.f32 %v2834_v0, %v2462_v62  ;;  %v2844_v17 = vadd.f32 %v2838_v7, %v2466_v11 }
 0xf81   : > { %v2837_v5 = vmul.f32 0.35355338, %v5390_v13  ;;  %v2815_v6 = vpop.f32.mrb[27].mxu0  ;;  %v2850_v49 = vsel %vm2846_vm11, %v2841_v1, -inf  ;;  %v2862_v59 = vsel %vm2846_vm11, %v2845_v15, -inf }
 0xf82   : > { %v2836_v30 = vmul.f32 0.35355338, %v2815_v6  ;;  %2851 = vmax.xlane.f32.xlu1 %v2850_v49  ;;  %v2847_v8 = vsel %vm2846_vm11, %v2840_v12, -inf  ;;  %v2859_v18 = vsel %vm2846_vm11, %v2844_v17, -inf }
 0xf83   : > { %2848 = vmax.xlane.f32.xlu0 %v2847_v8  ;;  %v2843_v10 = vadd.f32 %v2837_v5, %v2465_v2 }
 0xf84   : > { %v2842_v50 = vadd.f32 %v2836_v30, %v2464_v3 }
 0xf85   : > { %v2856_v14 = vsel %vm2846_vm11, %v2843_v10, -inf }
 0xf86   : > { %2857 = vmax.xlane.f32.xlu1 %v2856_v14  ;;  %v2853_v16 = vsel %vm2846_vm11, %v2842_v50, -inf }
 0xf87   : > { %2854 = vmax.xlane.f32.xlu0 %v2853_v16  ;;  %v4853_v16 = vld [vmem:[%s7026_s9 + $0x168] sm:$0xff] }
 0xf8a   : > { %2863 = vmax.xlane.f32.xlu1 %v2862_v59  ;;  %v4854_v59 = vld [vmem:[%s7026_s9 + $0x170] sm:$0xff] }
 0xf8b   : > { %2860 = vmax.xlane.f32.xlu0 %v2859_v18  ;;  %v4855_v18 = vld [vmem:[%s7026_s9 + $0x178] sm:$0xff] }
0x100f   : > { %v2852_v19 = vpop.xlane.xlu1 %2851 }
0x1010   : > { %v2866_v20 = vsub.f32 %v2841_v1, %v2852_v19  ;;  %v2849_v21 = vpop.xlane.xlu0 %2848  ;;  %v5697_v19 = vpack.c.bf16 %v4855_v18, %v4854_v59 }
0x1011   : > { %v2865_v28 = vsub.f32 %v2840_v12, %v2849_v21 }
0x1012   : > { %v2873_v29 = vmul.f32 1.442695, %v2866_v20 }
0x1013   : > { %v2871_v31 = vmul.f32 1.442695, %v2865_v28  ;;  %v2858_v34 = vpop.xlane.xlu1 %2857 }
0x1014   : > { %5859 = vpow2.f32 %v2873_v29  ;;  %v2868_v36 = vsub.f32 %v2843_v10, %v2858_v34  ;;  %v2855_v38 = vpop.xlane.xlu0 %2854 }
0x1015   : > { %5861 = vpow2.f32 %v2871_v31  ;;  %v2867_v41 = vsub.f32 %v2842_v50, %v2855_v38 }
0x1016   : > { %v2877_v43 = vmul.f32 1.442695, %v2868_v36 }
0x1017   : > { %v2875_v44 = vmul.f32 1.442695, %v2867_v41  ;;  %v2864_v32 = vpop.xlane.xlu1 %2863 }
0x1018   : > { %5863 = vpow2.f32 %v2877_v43  ;;  %v2870_v45 = vsub.f32 %v2845_v15, %v2864_v32  ;;  %v2861_v46 = vpop.xlane.xlu0 %2860  ;;  %v4852_v15 = vld [vmem:[%s7026_s9 + $0x160] sm:$0xff] }
0x1019   : > { %5865 = vpow2.f32 %v2875_v44  ;;  %v2869_v47 = vsub.f32 %v2844_v17, %v2861_v46  ;;  %v5693_v17 = vpack.c.bf16 %v4853_v16, %v4852_v15 }
0x101a   : > { %v2881_v33 = vmul.f32 1.442695, %v2870_v45 }
0x101b   : > { %v2879_v48 = vmul.f32 1.442695, %v2869_v47  ;;  %5694 = vmatprep.subr.bf16.mxu0 %v5693_v17 }
0x101c   : > { %5867 = vpow2.f32 %v2881_v33  ;;  %5696 = vmatpush3.bf16.msra.mxu0 %v5693_v17 }
0x101d   : > { %5869 = vpow2.f32 %v2879_v48  ;;  %5698 = vmatprep.subr.bf16.mxu0 %v5697_v19 }
0x101e   : > { %v5860_v22 = vpop.eup %5859 }
0x101f   : > { %v5862_v40 = vpop.eup %5861  ;;  %v2886_v26 = vsel %vm2846_vm11, %v5860_v22, 0.0 }
0x1020   : > { %2887 = vadd.xlane.f32.xlu1 %v2886_v26  ;;  %v2883_v51 = vsel %vm2846_vm11, %v5862_v40, 0.0  ;;  %5700 = vmatpush3.bf16.msra.mxu0 %v5697_v19 }
0x1021   : > { %2884 = vadd.xlane.f32.xlu0 %v2883_v51 }
0x1022   : > { %v5864_v54 = vpop.eup %5863 }
0x1023   : > { %v5866_v55 = vpop.eup %5865  ;;  %v2892_v56 = vsel %vm2846_vm11, %v5864_v54, 0.0 }
0x1024   : > { %2893 = vadd.xlane.f32.xlu1 %v2892_v56  ;;  %v2889_v57 = vsel %vm2846_vm11, %v5866_v55, 0.0 }
0x1025   : > { %2890 = vadd.xlane.f32.xlu0 %v2889_v57  ;;  %v4880_v57 = vld [vmem:[%s7027_s10 + $0xb] ss:$0 sm:$0xff] }
0x1026   : > { %v5868_v58 = vpop.eup %5867 }
0x1027   : > { %v5870_v60 = vpop.eup %5869  ;;  %v2898_v61 = vsel %vm2846_vm11, %v5868_v58, 0.0 }
0x1028   : > { %2899 = vadd.xlane.f32.xlu1 %v2898_v61  ;;  %v2895_v62 = vsel %vm2846_vm11, %v5870_v60, 0.0 }
0x1029   : > { %2896 = vadd.xlane.f32.xlu0 %v2895_v62 }
0x10ad   : > { %v2888_v0 = vpop.xlane.xlu1 %2887 }
0x10ae   : > { %5871 = vrcp.f32 %v2888_v0  ;;  %v2885_v1 = vpop.xlane.xlu0 %2884 }
0x10af   : > { %5873 = vrcp.f32 %v2885_v1 }
0x10b1   : > { %v2894_v13 = vpop.xlane.xlu1 %2893 }
0x10b2   : > { %5875 = vrcp.f32 %v2894_v13  ;;  %v2891_v12 = vpop.xlane.xlu0 %2890 }
0x10b3   : > { %5877 = vrcp.f32 %v2891_v12 }
0x10b5   : > { %v2900_v2 = vpop.xlane.xlu1 %2899 }
0x10b6   : > { %5879 = vrcp.f32 %v2900_v2  ;;  %v2897_v3 = vpop.xlane.xlu0 %2896 }
0x10b7   : > { %5881 = vrcp.f32 %v2897_v3 }
0x10b8   : > { %v5872_v4 = vpop.eup %5871 }
0x10b9   : > { %v5874_v5 = vpop.eup %5873  ;;  %v2908_v49 = vmul.f32 %v5872_v4, %v5860_v22 }
0x10ba   : > { %v2907_v6 = vmul.f32 %v5874_v5, %v5862_v40 }
0x10bc   : > { %v5876_v7 = vpop.eup %5875  ;;  %5396 = vmatprep.mubr.msk.f32.mxu1 %vm2846_vm11, %v2907_v6 }
0x10bd   : > { %v5878_v30 = vpop.eup %5877  ;;  %5397 = vmatmul.mubr.msk.f32.vlgmr.msra.gmra.mrb[24].mxu1 %vm2846_vm11, %v2908_v49  ;;  %v2910_v9 = vmul.f32 %v5876_v7, %v5864_v54 }
0x10be   : > { %v2909_v8 = vmul.f32 %v5878_v30, %v5866_v55 }
0x10c0   : > { %v5880_v10 = vpop.eup %5879  ;;  %5399 = vmatprep.mubr.msk.f32.mxu1 %vm2846_vm11, %v2909_v8 }
0x10c1   : > { %v5882_v11 = vpop.eup %5881  ;;  %5400 = vmatmul.mubr.msk.f32.gmra.mrb[26].mxu1 %vm2846_vm11, %v2910_v9  ;;  %v2912_v14 = vmul.f32 %v5880_v10, %v5868_v58  ;;  %v4888_v9 = vld [vmem:[%s7030_s13 + $0x28] sm:$0xff] }
0x10c2   : > { %v2911_v50 = vmul.f32 %v5882_v11, %v5870_v60  ;;  %v4889_v11 = vld [vmem:[%s7030_s13 + $0x30] sm:$0xff] }
0x10c4   : > { %5402 = vmatprep.mubr.msk.f32.mxu1 %vm2846_vm11, %v2911_v50  ;;  %v4890_v50 = vld [vmem:[%s7030_s13 + $0x38] sm:$0xff] }
0x10c5   : > { %5403 = vmatmul.mubr.msk.f32.gmra.mrb[28].mxu1 %vm2846_vm11, %v2912_v14  ;;  %v5705_v14 = vpack.c.bf16 %v4890_v50, %v4889_v11 }
0x1190   : > { %v5398_v20 = vpop.f32.mrb[24].mxu1 }
0x1191   : > { %v2997_v21 = vpop.f32.mrb[25].mxu1  ;;  %v3027_v28 = vmul.f32 %v6598_v35, %v5398_v20 }
0x1192   : > { %v3026_v43 = vmul.f32 %v6566_v39, %v2997_v21  ;;  %v4885_v21 = vld [vmem:[%s7028_s11 + $0x2] ss:$0 sm:$0xff] }
0x1193   : > { %v3034_v36 = vrot.slane %v3027_v28, 4 }
0x1194   : > { %v5401_v29 = vpop.f32.mrb[26].mxu1 }
0x1195   : > { %v3007_v31 = vpop.f32.mrb[27].mxu1  ;;  %v3029_v33 = vmul.f32 %v6613_v52, %v5401_v29 }
0x1196   : > { %v3028_v34 = vmul.f32 %v6604_v24, %v3007_v31 }
0x1198   : > { %v3035_v38 = vrot.slane %v3028_v34, 4  ;;  %v5404_v41 = vpop.f32.mrb[28].mxu1  ;;  %v4886_v34 = vld [vmem:[%s7029_s12 + $0x2] ss:$0 sm:$0xff] }
0x1199   : > { %v3031_v44 = vmul.f32 %v6592_v37, %v5404_v41  ;;  %v3017_v32 = vpop.f32.mrb[29].mxu1 }
0x119a   : > { %v3036_v45 = vsel %vm1031_vm2, %v3034_v36, %v3035_v38  ;;  %v3040_v46 = vadd.f32 %v3035_v38, %v3027_v28  ;;  %v3030_v47 = vmul.f32 %v6572_v42, %v3017_v32  ;;  %v4893_v32 = vld [vmem:[%s7032_s15 + $0x48] sm:$0xff] }
0x119b   : > { %v3039_v48 = vadd.f32 %v3036_v45, %v3026_v43  ;;  %v3046_v22 = vrot.slane %v3031_v44, 4  ;;  %v4892_v44 = vld [vmem:[%s7032_s15 + $0x40] sm:$0xff] }
0x119c   : > { %v3042_v40 = vadd.f32 %v3040_v46, %v3030_v47  ;;  %v3045_v26 = vrot.slane %v3030_v47, 4  ;;  %v5709_v45 = vpack.c.bf16 %v4893_v32, %v4892_v44  ;;  %v4894_v46 = vld [vmem:[%s7032_s15 + $0x50] sm:$0xff]  ;;  %v4895_v47 = vld [vmem:[%s7032_s15 + $0x58] sm:$0xff] }
0x119d   : > { %v3041_v51 = vadd.f32 %v3039_v48, %v3029_v33  ;;  %v5713_v33 = vpack.c.bf16 %v4895_v47, %v4894_v46  ;;  %v4896_v48 = vld [vmem:[%s7032_s15 + $0x60] sm:$0xff] }
0x119e   : > { %v3047_v54 = vsel %vm1031_vm2, %v3045_v26, %v3046_v22  ;;  %v3051_v55 = vadd.f32 %v3046_v22, %v3042_v40  ;;  %5710 = vmatprep.subr.bf16.mxu0 %v5709_v45  ;;  %v4897_v22 = vld [vmem:[%s7032_s15 + $0x68] sm:$0xff]  ;;  %v4898_v26 = vld [vmem:[%s7032_s15 + $0x70] sm:$0xff] }
0x119f   : > { %v3050_v56 = vadd.f32 %v3047_v54, %v3041_v51  ;;  %v5717_v40 = vpack.c.bf16 %v4897_v22, %v4896_v48  ;;  %v4899_v51 = vld [vmem:[%s7032_s15 + $0x78] sm:$0xff] }
0x11a0   : > { %v5721_v54 = vpack.c.bf16 %v4899_v51, %v4898_v26 }
0x11a1   : > { %5413 = vmatprep.mubr.msk.f32.mxu0 %vm785_vm0, %v3050_v56 }
0x11a2   : > { %5414 = vmatmul.mubr.msk.f32.vlgmr.msra.gmra.mrb[28].mxu0 %vm785_vm0, %v3051_v55  ;;  %v4901_v55 = vld [vmem:[%s7031_s14 + $0x1] ss:$0 sm:$0xff] }
0x11a3   : > { %5712 = vmatpush3.bf16.msra.mxu0 %v5709_v45 }
0x11a4   : > { %5714 = vmatprep.subr.bf16.mxu0 %v5713_v33 }
0x11a7   : > { %5716 = vmatpush3.bf16.msra.mxu0 %v5713_v33 }
0x11a8   : > { %5718 = vmatprep.subr.bf16.mxu0 %v5717_v40 }
0x11ab   : > { %5720 = vmatpush3.bf16.msra.mxu0 %v5717_v40 }
0x11ac   : > { %5722 = vmatprep.subr.bf16.mxu0 %v5721_v54 }
0x11af   : > { %5724 = vmatpush3.bf16.msra.mxu0 %v5721_v54 }
0x11b0   : > { %5739 = vmatprep.subr.bf16.mxu0 %v5960_v53 }
0x1275   : > { %v5415_v58 = vpop.f32.mrb[28].mxu0 }
0x1276   : > { %v3136_v60 = vadd.f32 %v5415_v58, %v4880_v57  ;;  %v3130_v61 = vpop.f32.mrb[29].mxu0 }
0x1277   : > { %v3131_v62 = vadd.f32 %v4880_v57, %v3130_v61 }
0x1278   : > { %v3140_v0 = vadd.f32 %v3136_v60, %v6407_v27 }
0x1279   : > { %v3139_v1 = vadd.f32 %v3131_v62, %v6405_v23  ;;  %v4887_v23 = vld [vmem:[%s7030_s13 + $0x20] sm:$0xff] }
0x127a   : > { %v3148_v13 = vsel %vm1478_vm6, %v3140_v0, 0.0  ;;  %v5701_v10 = vpack.c.bf16 %v4888_v9, %v4887_v23 }
0x127b   : > { %3149 = vadd.xlane.f32.xlu1 %v3148_v13  ;;  %v3145_v12 = vsel %vm785_vm0, %v3139_v1, 0.0 }
0x127c   : > { %3146 = vadd.xlane.f32.xlu0 %v3145_v12  ;;  %5702 = vmatprep.subr.bf16.mxu1 %v5701_v10 }
0x127d   : > { %5704 = vmatpush3.bf16.msra.mxu1 %v5701_v10 }
0x127e   : > { %5706 = vmatprep.subr.bf16.mxu1 %v5705_v14 }
0x1281   : > { %5708 = vmatpush3.bf16.msra.mxu1 %v5705_v14 }
0x1308   : > { %v3150_v2 = vpop.xlane.xlu1 %3149 }
0x1309   : > { %v3152_v3 = vmul.f32 0.03125, %v3150_v2  ;;  %v3147_v4 = vpop.xlane.xlu0 %3146 }
0x130a   : > { %v3151_v5 = vmul.f32 0.03125, %v3147_v4 }
0x130b   : > { %v3154_v6 = vsub.f32 %v3140_v0, %v3152_v3 }
0x130c   : > { %v3153_v49 = vsub.f32 %v3139_v1, %v3151_v5 }
0x130d   : > { %v3156_v7 = vmul.f32 %v3154_v6, %v3154_v6 }
0x130e   : > { %v3155_v30 = vmul.f32 %v3153_v49, %v3153_v49 }
0x130f   : > { %v3160_v8 = vsel %vm1478_vm6, %v3156_v7, 0.0 }
0x1310   : > { %3161 = vadd.xlane.f32.xlu1 %v3160_v8  ;;  %v3157_v27 = vsel %vm785_vm0, %v3155_v30, 0.0 }
0x1311   : > { %3158 = vadd.xlane.f32.xlu0 %v3157_v27 }
0x139d   : > { %v3162_v15 = vpop.xlane.xlu1 %3161 }
0x139e   : > { %v3164_v16 = vmul.f32 0.03125, %v3162_v15  ;;  %v3159_v17 = vpop.xlane.xlu0 %3158 }
0x139f   : > { %v3163_v59 = vmul.f32 0.03125, %v3159_v17 }
0x13a0   : > { %v3166_v18 = vadd.f32 1e-05, %v3164_v16 }
0x13a1   : > { %v3165_v19 = vadd.f32 1e-05, %v3163_v59 }
0x13a2   : > { %5883 = vrsqrt.f32 %v3166_v18 }
0x13a3   : > { %5885 = vrsqrt.f32 %v3165_v19 }
0x13ac   : > { %v5884_v20 = vpop.eup %5883 }
0x13ad   : > { %v5886_v28 = vpop.eup %5885  ;;  %v3170_v29 = vmul.f32 %v5884_v20, %v3154_v6 }
0x13ae   : > { %v3169_v31 = vmul.f32 %v5886_v28, %v3153_v49 }
0x13af   : > { %v3178_v36 = vmul.f32 %v4885_v21, %v3170_v29 }
0x13b0   : > { %v3177_v38 = vmul.f32 %v4885_v21, %v3169_v31 }
0x13b1   : > { %v6704_v43 = vadd.f32 %v4886_v34, %v3178_v36 }
0x13b2   : > { %v6702_v41 = vadd.f32 %v4886_v34, %v3177_v38 }
0x13b4   : > { %5424 = vmatprep.mubr.msk.f32.mxu1 %vm785_vm0, %v6702_v41 }
0x13b5   : > { %5425 = vmatmul.mubr.msk.f32.vlgmr.msra.gmra.mrb[30].mxu1 %vm785_vm0, %v6704_v43 }
0x1488   : > { %v5426_v56 = vpop.f32.mrb[30].mxu1 }
0x1489   : > { %v3289_v57 = vadd.f32 %v5426_v56, %v4901_v55  ;;  %v3283_v58 = vpop.f32.mrb[31].mxu1 }
0x148a   : > { %v3284_v60 = vadd.f32 %v4901_v55, %v3283_v58  ;;  %v4904_v58 = vld [vmem:[%s7033_s16 + $0x1] ss:$0 sm:$0xff] }
0x148b   : > { %v3295_v61 = vmul.f32 0.70710677, %v3289_v57  ;;  %v3293_v54 = vmul.f32 0.5, %v3289_v57 }
0x148c   : > { %v3294_v62 = vmul.f32 0.70710677, %v3284_v60  ;;  %v3292_v26 = vmul.f32 0.5, %v3284_v60 }
0x148d   : > { %v3297_v0 = vand.u32 2147483647, %v3295_v61  ;;  %vm3337_vm12 = vcmp.ge.f32.partialorder %v3295_v61, 0.0 }
0x148e   : > { %v3296_v1 = vand.u32 2147483647, %v3294_v62  ;;  %vm3336_vm13 = vcmp.ge.f32.partialorder %v3294_v62, 0.0 }
0x148f   : > { %v3299_v13 = vmul.f32 0.3275911, %v3297_v0  ;;  %v3325_v4 = vsub.f32 0.0, %v3297_v0 }
0x1490   : > { %v3298_v12 = vmul.f32 0.3275911, %v3296_v1  ;;  %v3324_v5 = vsub.f32 0.0, %v3296_v1 }
0x1491   : > { %v3301_v2 = vadd.f32 1.0, %v3299_v13  ;;  %v3327_v49 = vmul.f32 %v3325_v4, %v3297_v0 }
0x1492   : > { %v3300_v3 = vadd.f32 1.0, %v3298_v12  ;;  %v3326_v8 = vmul.f32 %v3324_v5, %v3296_v1 }
0x1493   : > { %5887 = vrcp.f32 %v3301_v2  ;;  %v3330_v9 = vmul.f32 1.442695, %v3327_v49 }
0x1494   : > { %5889 = vrcp.f32 %v3300_v3  ;;  %v3328_v50 = vmul.f32 1.442695, %v3326_v8 }
0x1495   : > { %5891 = vpow2.f32 %v3330_v9  ;;  %v4913_v9 = vld [vmem:[%s7026_s9 + $0x190] sm:$0xff] }
0x1496   : > { %5893 = vpow2.f32 %v3328_v50 }
0x149d   : > { %v5888_v6 = vpop.eup %5887 }
0x149e   : > { %v5890_v7 = vpop.eup %5889  ;;  %v3307_v30 = vmul.f32 1.0614054, %v5888_v6 }
0x149f   : > { %v3306_v27 = vmul.f32 1.0614054, %v5890_v7  ;;  %v5892_v34 = vpop.eup %5891 }
0x14a0   : > { %v3309_v23 = vadd.f32 -1.4531521, %v3307_v30  ;;  %v5894_v38 = vpop.eup %5893 }
0x14a1   : > { %v3308_v10 = vadd.f32 -1.4531521, %v3306_v27  ;;  %v4912_v27 = vld [vmem:[%s7026_s9 + $0x188] sm:$0xff] }
0x14a2   : > { %v3311_v11 = vmul.f32 %v5888_v6, %v3309_v23 }
0x14a3   : > { %v3310_v14 = vmul.f32 %v5890_v7, %v3308_v10  ;;  %v4914_v10 = vld [vmem:[%s7026_s9 + $0x198] sm:$0xff] }
0x14a4   : > { %v3313_v15 = vadd.f32 1.4214138, %v3311_v11  ;;  %v5729_v11 = vpack.c.bf16 %v4914_v10, %v4913_v9  ;;  %v3509_v10 = vld [vmem:[%s7025_s8] sm:$0xff] }
0x14a5   : > { %v3312_v16 = vadd.f32 1.4214138, %v3310_v14 }
0x14a6   : > { %v3315_v17 = vmul.f32 %v5888_v6, %v3313_v15 }
0x14a7   : > { %v3314_v59 = vmul.f32 %v5890_v7, %v3312_v16 }
0x14a8   : > { %v3317_v18 = vadd.f32 -0.28449672, %v3315_v17 }
0x14a9   : > { %v3316_v19 = vadd.f32 -0.28449672, %v3314_v59 }
0x14aa   : > { %v3319_v20 = vmul.f32 %v5888_v6, %v3317_v18 }
0x14ab   : > { %v3318_v21 = vmul.f32 %v5890_v7, %v3316_v19  ;;  %v4909_v19 = vld [vmem:[%s7028_s11 + $0x3] ss:$0 sm:$0xff] }
0x14ac   : > { %v3321_v28 = vadd.f32 0.2548296, %v3319_v20 }
0x14ad   : > { %v3320_v29 = vadd.f32 0.2548296, %v3318_v21 }
0x14ae   : > { %v3323_v31 = vmul.f32 %v5888_v6, %v3321_v28 }
0x14af   : > { %v3322_v36 = vmul.f32 %v5890_v7, %v3320_v29  ;;  %v4910_v29 = vld [vmem:[%s7029_s12 + $0x3] ss:$0 sm:$0xff] }
0x14b0   : > { %v3333_v44 = vmul.f32 %v5892_v34, %v3323_v31  ;;  %v4915_v34 = vld [vmem:[%s7026_s9 + $0x1a0] sm:$0xff] }
0x14b1   : > { %v3332_v32 = vmul.f32 %v5894_v38, %v3322_v36  ;;  %v4916_v36 = vld [vmem:[%s7026_s9 + $0x1a8] sm:$0xff] }
0x14b2   : > { %v3335_v45 = vsub.f32 1.0, %v3333_v44 }
0x14b3   : > { %v3334_v46 = vsub.f32 1.0, %v3332_v32  ;;  %v5734_v32 = vpack.c.bf16 %v4916_v36, %v4915_v34 }
0x14b4   : > { %v3339_v47 = vsub.f32 0.0, %v3335_v45 }
0x14b5   : > { %v3338_v33 = vsub.f32 0.0, %v3334_v46 }
0x14b6   : > { %v3341_v48 = vsel %vm3337_vm12, %v3335_v45, %v3339_v47  ;;  %v4918_v47 = vld [vmem:[%s7026_s9 + $0x1b8] sm:$0xff] }
0x14b7   : > { %v3343_v22 = vadd.f32 1.0, %v3341_v48  ;;  %v3340_v40 = vsel %vm3336_vm13, %v3334_v46, %v3338_v33  ;;  %v4917_v46 = vld [vmem:[%s7026_s9 + $0x1b0] sm:$0xff]  ;;  %v733_v48 = vld [vmem:[%s725_s28] sm:$0xff] }
0x14b8   : > { %v3342_v51 = vadd.f32 1.0, %v3340_v40  ;;  %v5737_v33 = vpack.c.bf16 %v4918_v47, %v4917_v46  ;;  %v735_v40 = vld [vmem:[%s725_s28 + $0x10] sm:$0x3] }
0x14b9   : > { %v3345_v56 = vmul.f32 %v3343_v22, %v3293_v54  ;;  %v734_v22 = vld [vmem:[%s725_s28 + $0x8] sm:$0xff] }
0x14ba   : > { %v3344_v55 = vmul.f32 %v3342_v51, %v3292_v26  ;;  %v4931_v26 = vld [vmem:[%s7027_s10 + $0xc] ss:$0 sm:$0xff] }
0x14bc   : > { %5443 = vmatprep.mubr.msk.f32.mxu0 %vm1680_vm9, %v3344_v55 }
0x14bd   : > { %5444 = vmatmul.mubr.msk.f32.vlgmr.msra.gmra.mrb[30].mxu0 %vm1680_vm9, %v3345_v56 }
0x14be   : > { %5482 = vmatprep.mubr.msk.f32.mxu0 %vm5961_vm10, %v5962_v63 }
0x1590   : > { %v5445_v61 = vpop.f32.mrb[30].mxu0 }
0x1591   : > { %v3430_v62 = vadd.f32 %v5445_v61, %v4904_v58  ;;  %v3424_v0 = vpop.f32.mrb[31].mxu0 }
0x1592   : > { %v3425_v1 = vadd.f32 %v4904_v58, %v3424_v0 }
0x1593   : > { %v3434_v60 = vadd.f32 %v3430_v62, %v6704_v43 }
0x1594   : > { %v3433_v57 = vadd.f32 %v3425_v1, %v6702_v41  ;;  %v4911_v41 = vld [vmem:[%s7026_s9 + $0x180] sm:$0xff] }
0x1595   : > { %v3442_v13 = vsel %vm1478_vm6, %v3434_v60, 0.0  ;;  %v5725_v23 = vpack.c.bf16 %v4912_v27, %v4911_v41  ;;  %v4922_v41 = vld [vmem:[%s7026_s9 + $0x1d8] sm:$0xff] }
0x1596   : > { %3443 = vadd.xlane.f32.xlu1 %v3442_v13  ;;  %v3439_v12 = vsel %vm785_vm0, %v3433_v57, 0.0  ;;  %v4934_v13 = vld [vmem:[%s7027_s10 + $0xd] ss:$0 sm:$0xff] }
0x1597   : > { %3440 = vadd.xlane.f32.xlu0 %v3439_v12  ;;  %5726 = vmatprep.subr.bf16.mxu1 %v5725_v23 }
0x1598   : > { %5728 = vmatpush3.bf16.msra.mxu1 %v5725_v23  ;;  %v3510_v23 = vld [vmem:[%s7025_s8 + $0x8] sm:$0xff] }
0x1599   : > { %5730 = vmatprep.subr.bf16.mxu1 %v5729_v11 }
0x159c   : > { %5732 = vmatpush3.bf16.msra.mxu1 %v5729_v11 }
0x159d   : > { %5733 = vmatprep.subr.bf16.mxu1 %v5960_v53 }
0x1623   : > { %v3444_v2 = vpop.xlane.xlu1 %3443 }
0x1624   : > { %v3446_v3 = vmul.f32 0.03125, %v3444_v2  ;;  %v3441_v4 = vpop.xlane.xlu0 %3440 }
0x1625   : > { %v3445_v5 = vmul.f32 0.03125, %v3441_v4 }
0x1626   : > { %v3448_v6 = vsub.f32 %v3434_v60, %v3446_v3 }
0x1627   : > { %v3447_v49 = vsub.f32 %v3433_v57, %v3445_v5 }
0x1628   : > { %v3450_v7 = vmul.f32 %v3448_v6, %v3448_v6 }
0x1629   : > { %v3449_v30 = vmul.f32 %v3447_v49, %v3447_v49 }
0x162a   : > { %v3454_v8 = vsel %vm1478_vm6, %v3450_v7, 0.0 }
0x162b   : > { %3455 = vadd.xlane.f32.xlu1 %v3454_v8  ;;  %v3451_v43 = vsel %vm785_vm0, %v3449_v30, 0.0 }
0x162c   : > { %3452 = vadd.xlane.f32.xlu0 %v3451_v43 }
0x16b8   : > { %v3456_v50 = vpop.xlane.xlu1 %3455 }
0x16b9   : > { %v3458_v14 = vmul.f32 0.03125, %v3456_v50  ;;  %v3453_v15 = vpop.xlane.xlu0 %3452 }
0x16ba   : > { %v3457_v16 = vmul.f32 0.03125, %v3453_v15 }
0x16bb   : > { %v3460_v17 = vadd.f32 1e-05, %v3458_v14 }
0x16bc   : > { %v3459_v59 = vadd.f32 1e-05, %v3457_v16 }
0x16bd   : > { %5895 = vrsqrt.f32 %v3460_v17 }
0x16be   : > { %5897 = vrsqrt.f32 %v3459_v59 }
0x16c7   : > { %v5896_v18 = vpop.eup %5895 }
0x16c8   : > { %v5898_v20 = vpop.eup %5897  ;;  %v3464_v21 = vmul.f32 %v5896_v18, %v3448_v6  ;;  %v3511_v18 = vld [vmem:[%s7025_s8 + $0x10] sm:$0xff] }
0x16c9   : > { %v3463_v28 = vmul.f32 %v5898_v20, %v3447_v49 }
0x16ca   : > { %v3472_v31 = vmul.f32 %v4909_v19, %v3464_v21 }
0x16cb   : > { %v3471_v38 = vmul.f32 %v4909_v19, %v3463_v28 }
0x16cc   : > { %v6778_v45 = vadd.f32 %v4910_v29, %v3472_v31  ;;  %v3514_v31 = vld [vmem:[%s7025_s8 + $0x28] sm:$0xff] }
0x16cd   : > { %v6776_v44 = vadd.f32 %v4910_v29, %v3471_v38 }
0x16cf   : > { %5454 = vmatprep.mubr.msk.f32.mxu1 %vm785_vm0, %v6776_v44 }
0x16d0   : > { %5455 = vmatmul.mubr.msk.f32.vlgmr.msra.gmra.mrb[32].mxu1 %vm785_vm0, %v6778_v45 }
0x16d1   : > { %5735 = vmatpush3.bf16.msra.mxu1 %v5734_v32  ;;  %5465 = vmatprep.mubr.msk.f32.mxu1 %vm5961_vm10, %v5962_v63  ;;  %v3513_v32 = vld [vmem:[%s7025_s8 + $0x20] sm:$0xff] }
0x16d2   : > { %5736 = vmatprep.subr.bf16.mxu1 %v5960_v53 }
0x16d5   : > { %5738 = vmatpush3.bf16.msra.mxu1 %v5737_v33 }
0x16d8   : > { %5466 = vmatmul.mubr.msk.f32.vlgmr.msra.gmra.mrb[34].mxu1 %vm785_vm0, %v733_v48 }
0x16d9   : > { %5468 = vmatprep.mubr.msk.f32.mxu1 %vm5961_vm10, %v5962_v63 }
0x16dc   : > { %5469 = vmatmul.mubr.msk.f32.gmra.mrb[36].mxu1 %vm785_vm0, %v734_v22 }
0x16dd   : > { %5471 = vmatprep.mubr.msk.f32.mxu1 %vm5961_vm10, %v5962_v63 }
0x16e0   : > { %5472 = vmatmul.mubr.msk.f32.gmra.mrb[38].mxu1 %vm785_vm0, %v735_v40 }
0x17a3   : > { %v5456_v51 = vpop.f32.mrb[32].mxu1 }
0x17a4   : > { %v3599_v54 = vadd.f32 %v5456_v51, %v4931_v26  ;;  %v3593_v55 = vpop.f32.mrb[33].mxu1 }
0x17a5   : > { %v3594_v56 = vadd.f32 %v4931_v26, %v3593_v55  ;;  %v4938_v26 = vld [vmem:[%s7027_s10 + $0xe] ss:$0 sm:$0xff] }
0x17a6   : > { %v3786_v58 = vrot.slane %v3599_v54, 4 }
0x17a7   : > { %v3785_v61 = vrot.slane %v3594_v56, 4  ;;  %v3791_v62 = vmul.f32 %v6566_v39, %v3594_v56  ;;  %v3794_v8 = vmul.f32 %v6613_v52, %v3594_v56 }
0x17a9   : > { %v3790_v0 = vsel %vm1031_vm2, %v3599_v54, %v3785_v61  ;;  %5497 = vmatprep.mubr.msk.f32.mxu1 %vm785_vm0, %v3791_v62  ;;  %v3787_v1 = vsel %vm1031_vm2, %v3785_v61, %v3786_v58 }
0x17aa   : > { %v3792_v7 = vmul.f32 %v6598_v35, %v3790_v0  ;;  %v3793_v30 = vmul.f32 %v6604_v24, %v3787_v1  ;;  %v3795_v43 = vmul.f32 %v6572_v42, %v3790_v0  ;;  %v3796_v25 = vmul.f32 %v6592_v37, %v3787_v1  ;;  %v4919_v35 = vld [vmem:[%s7026_s9 + $0x1c0] sm:$0xff]  ;;  %v4920_v24 = vld [vmem:[%s7026_s9 + $0x1c8] sm:$0xff]  ;;  %v4921_v42 = vld [vmem:[%s7026_s9 + $0x1d0] sm:$0xff] }
0x17ab   : > { %v3683_v60 = vpop.f32.mrb[34].mxu1  ;;  %v5740_v52 = vpack.c.bf16 %v4920_v24, %v4919_v35  ;;  %v5743_v37 = vpack.c.bf16 %v4922_v41, %v4921_v42 }
0x17ac   : > { %v5467_v57 = vpop.f32.mrb[35].mxu1  ;;  %v3684_v2 = vadd.f32 %v4934_v13, %v3683_v60 }
0x17ad   : > { %5741 = vmatpush3.bf16.msra.mxu0 %v5740_v52 }
0x17ae   : > { %5742 = vmatprep.subr.bf16.mxu0 %v5960_v53 }
0x17af   : > { %v3688_v12 = vpop.f32.mrb[36].mxu1 }
0x17b0   : > { %v3689_v3 = vadd.f32 %v4934_v13, %v3688_v12  ;;  %v5470_v4 = vpop.f32.mrb[37].mxu1 }
0x17b1   : > { %5744 = vmatpush3.bf16.msra.mxu0 %v5743_v37 }
0x17b2   : > { %v5745_v5 = vpack.c.bf16 %v3689_v3, %v3684_v2 }
0x17b3   : > { %v3693_v6 = vpop.f32.mrb[38].mxu1 }
0x17b4   : > { %5747 = vmatprep.subr.msk.bf16.mxu1 %vm6151_vm1, %v5745_v5  ;;  %v3694_v39 = vadd.f32 %v4934_v13, %v3693_v6  ;;  %v5473_v49 = vpop.f32.mrb[39].mxu1  ;;  %5483 = vmatmul.mubr.msk.f32.vlgmr.msra.gmra.mrb[32].mxu0 %vm785_vm0, %v733_v48 }
0x17b5   : > { %5750 = vmatpush3.bf16.xpose.msk.msra.mxu1 %vm6151_vm1, %v5745_v5  ;;  %5485 = vmatprep.mubr.msk.f32.mxu0 %vm5961_vm10, %v5962_v63 }
0x17b6   : > { %5495 = vmatprep.subr.msk.mxu1 %vm785_vm0, %v3694_v39 }
0x17b8   : > { %5486 = vmatmul.mubr.msk.f32.gmra.mrb[34].mxu0 %vm785_vm0, %v734_v22 }
0x17b9   : > { %5488 = vmatprep.mubr.msk.f32.mxu0 %vm5961_vm10, %v5962_v63  ;;  %v3512_v63 = vld [vmem:[%s7025_s8 + $0x18] sm:$0xff] }
0x17bc   : > { %5489 = vmatmul.mubr.msk.f32.gmra.mrb[36].mxu0 %vm785_vm0, %v735_v40 }
0x17bd   : > { %5496 = vmatpush3.xpose.msk.msra.mxu1 %vm785_vm0, %v3694_v39 }
0x17c0   : > { %5498 = vmatmul.mubr.msk.f32.vlgmr.msra.gmra.mrb[40].mxu1 %vm785_vm0, %v3792_v7 }
0x17c1   : > { %5500 = vmatprep.mubr.msk.f32.mxu1 %vm785_vm0, %v3793_v30 }
0x17c4   : > { %5501 = vmatmul.mubr.msk.f32.gmra.mrb[42].mxu1 %vm785_vm0, %v3794_v8 }
0x17c5   : > { %5503 = vmatprep.mubr.msk.f32.mxu1 %vm785_vm0, %v3795_v43 }
0x17c8   : > { %5504 = vmatmul.mubr.msk.f32.gmra.mrb[44].mxu1 %vm785_vm0, %v3796_v25 }
0x1887   : > { %v3769_v51 = vpop.f32.mrb[32].mxu0 }
0x1888   : > { %v5484_v54 = vpop.f32.mrb[33].mxu0  ;;  %v3770_v55 = vadd.f32 %v4938_v26, %v3769_v51  ;;  %v4926_v51 = vld [vmem:[%s7026_s9 + $0x1f8] sm:$0xff] }
0x188b   : > { %v3774_v56 = vpop.f32.mrb[34].mxu0 }
0x188c   : > { %v3775_v58 = vadd.f32 %v4938_v26, %v3774_v56  ;;  %v5487_v61 = vpop.f32.mrb[35].mxu0 }
0x188e   : > { %v5751_v62 = vpack.c.bf16 %v3775_v58, %v3770_v55  ;;  %v5945_v58 = vld [vmem:[%s7057_s25 + $0x8] sm:$0xff] }
0x1890   : > { %5752 = vmatprep.subr.bf16.mxu0 %v5751_v62 }
0x1891   : > { %5754 = vmatpush3.bf16.msra.mxu0 %v5751_v62 }
0x1893   : > { %v5499_v27 = vpop.f32.mrb[40].mxu1 }
0x1894   : > { %v3920_v9 = vmul.f32 0.35355338, %v5499_v27  ;;  %v3890_v53 = vpop.f32.mrb[41].mxu1 }
0x1895   : > { %v3919_v11 = vmul.f32 0.35355338, %v3890_v53 }
0x1896   : > { %v3926_v50 = vadd.f32 %v3920_v9, %v3510_v23 }
0x1897   : > { %v5502_v14 = vpop.f32.mrb[42].mxu1  ;;  %v3925_v15 = vadd.f32 %v3919_v11, %v3509_v10 }
0x1898   : > { %v3922_v16 = vmul.f32 0.35355338, %v5502_v14  ;;  %v3900_v17 = vpop.f32.mrb[43].mxu1  ;;  %v3935_v59 = vsel %vm3931_vm14, %v3926_v50, -inf }
0x1899   : > { %v3921_v19 = vmul.f32 0.35355338, %v3900_v17  ;;  %3936 = vmax.xlane.f32.xlu1 %v3935_v59  ;;  %v3932_v20 = vsel %vm3931_vm14, %v3925_v15, -inf }
0x189a   : > { %3933 = vmax.xlane.f32.xlu0 %v3932_v20  ;;  %v3928_v21 = vadd.f32 %v3922_v16, %v3512_v63 }
0x189b   : > { %v5505_v28 = vpop.f32.mrb[44].mxu1  ;;  %v3927_v29 = vadd.f32 %v3921_v19, %v3511_v18 }
0x189c   : > { %v3924_v34 = vmul.f32 0.35355338, %v5505_v28  ;;  %v3910_v36 = vpop.f32.mrb[45].mxu1  ;;  %v3941_v38 = vsel %vm3931_vm14, %v3928_v21, -inf }
0x189d   : > { %v3923_v46 = vmul.f32 0.35355338, %v3910_v36  ;;  %3942 = vmax.xlane.f32.xlu1 %v3941_v38  ;;  %v3938_v47 = vsel %vm3931_vm14, %v3927_v29, -inf }
0x189e   : > { %3939 = vmax.xlane.f32.xlu0 %v3938_v47  ;;  %v3930_v33 = vadd.f32 %v3924_v34, %v3514_v31 }
0x189f   : > { %v3929_v48 = vadd.f32 %v3923_v46, %v3513_v32 }
0x18a0   : > { %v3947_v22 = vsel %vm3931_vm14, %v3930_v33, -inf }
0x18a1   : > { %3948 = vmax.xlane.f32.xlu1 %v3947_v22  ;;  %v3944_v40 = vsel %vm3931_vm14, %v3929_v48, -inf  ;;  %v4924_v22 = vld [vmem:[%s7026_s9 + $0x1e8] sm:$0xff] }
0x18a2   : > { %3945 = vmax.xlane.f32.xlu0 %v3944_v40 }
0x1926   : > { %v3937_v0 = vpop.xlane.xlu1 %3936 }
0x1927   : > { %v3951_v1 = vsub.f32 %v3926_v50, %v3937_v0  ;;  %v3934_v60 = vpop.xlane.xlu0 %3933  ;;  %v3779_v50 = vpop.f32.mrb[36].mxu0 }
0x1928   : > { %v3950_v57 = vsub.f32 %v3925_v15, %v3934_v60  ;;  %v3780_v14 = vadd.f32 %v4938_v26, %v3779_v50  ;;  %v5490_v15 = vpop.f32.mrb[37].mxu0  ;;  %v4925_v26 = vld [vmem:[%s7026_s9 + $0x1f0] sm:$0xff] }
0x1929   : > { %v3958_v13 = vmul.f32 1.442695, %v3951_v1  ;;  %v5759_v54 = vpack.c.bf16 %v4926_v51, %v4925_v26  ;;  %v5946_v1 = vld [vmem:[%s7057_s25 + $0x10] sm:$0xff]  ;;  %v4963_v51 = vld [vmem:[%s7028_s11 + $0x4] ss:$0 sm:$0xff] }
0x192a   : > { %v3956_v12 = vmul.f32 1.442695, %v3950_v57  ;;  %v3943_v2 = vpop.xlane.xlu1 %3942  ;;  %5510 = vmatprep.subr.msk.mxu0 %vm4016_vm15, %v3780_v14 }
0x192b   : > { %5899 = vpow2.f32 %v3958_v13  ;;  %v3953_v3 = vsub.f32 %v3928_v21, %v3943_v2  ;;  %v3940_v4 = vpop.xlane.xlu0 %3939  ;;  %5511 = vmatpush3.msk.msra.mxu0 %vm4016_vm15, %v3780_v14  ;;  %v5947_v2 = vld [vmem:[%s7057_s25] sm:$0xff] }
0x192c   : > { %5901 = vpow2.f32 %v3956_v12  ;;  %v3952_v5 = vsub.f32 %v3927_v29, %v3940_v4  ;;  %v5948_v4 = vld [vmem:[%s7057_s25 + $0x28] sm:$0xff] }
0x192d   : > { %v3962_v6 = vmul.f32 1.442695, %v3953_v3 }
0x192e   : > { %v3960_v39 = vmul.f32 1.442695, %v3952_v5  ;;  %v3949_v49 = vpop.xlane.xlu1 %3948 }
0x192f   : > { %5903 = vpow2.f32 %v3962_v6  ;;  %v3955_v7 = vsub.f32 %v3930_v33, %v3949_v49  ;;  %v3946_v30 = vpop.xlane.xlu0 %3945 }
0x1930   : > { %5905 = vpow2.f32 %v3960_v39  ;;  %v3954_v8 = vsub.f32 %v3929_v48, %v3946_v30  ;;  %v4923_v48 = vld [vmem:[%s7026_s9 + $0x1e0] sm:$0xff] }
0x1931   : > { %v3966_v43 = vmul.f32 1.442695, %v3955_v7  ;;  %v5755_v40 = vpack.c.bf16 %v4924_v22, %v4923_v48  ;;  %v5949_v7 = vld [vmem:[%s7057_s25 + $0x20] sm:$0xff] }
0x1932   : > { %v3964_v25 = vmul.f32 1.442695, %v3954_v8  ;;  %v5950_v8 = vld [vmem:[%s7057_s25 + $0x18] sm:$0xff] }
0x1933   : > { %5907 = vpow2.f32 %v3966_v43  ;;  %5756 = vmatprep.subr.bf16.mxu1 %v5755_v40 }
0x1934   : > { %5909 = vpow2.f32 %v3964_v25  ;;  %5758 = vmatpush3.bf16.msra.mxu1 %v5755_v40 }
0x1935   : > { %v5900_v35 = vpop.eup %5899  ;;  %5760 = vmatprep.subr.bf16.mxu1 %v5759_v54 }
0x1936   : > { %v5902_v24 = vpop.eup %5901  ;;  %v3971_v42 = vsel %vm3931_vm14, %v5900_v35, 0.0 }
0x1937   : > { %3972 = vadd.xlane.f32.xlu1 %v3971_v42  ;;  %v3968_v52 = vsel %vm3931_vm14, %v5902_v24, 0.0 }
0x1938   : > { %3969 = vadd.xlane.f32.xlu0 %v3968_v52  ;;  %5762 = vmatpush3.bf16.msra.mxu1 %v5759_v54 }
0x1939   : > { %v5904_v41 = vpop.eup %5903 }
0x193a   : > { %v5906_v37 = vpop.eup %5905  ;;  %v3977_v27 = vsel %vm3931_vm14, %v5904_v41, 0.0 }
0x193b   : > { %3978 = vadd.xlane.f32.xlu1 %v3977_v27  ;;  %v3974_v23 = vsel %vm3931_vm14, %v5906_v37, 0.0 }
0x193c   : > { %3975 = vadd.xlane.f32.xlu0 %v3974_v23  ;;  %v4958_v23 = vld [vmem:[%s7027_s10 + $0xf] ss:$0 sm:$0xff] }
0x193d   : > { %v5908_v9 = vpop.eup %5907 }
0x193e   : > { %v5910_v53 = vpop.eup %5909  ;;  %v3983_v10 = vsel %vm3931_vm14, %v5908_v9, 0.0 }
0x193f   : > { %3984 = vadd.xlane.f32.xlu1 %v3983_v10  ;;  %v3980_v11 = vsel %vm3931_vm14, %v5910_v53, 0.0 }
0x1940   : > { %3981 = vadd.xlane.f32.xlu0 %v3980_v11 }
0x19c4   : > { %v3973_v63 = vpop.xlane.xlu1 %3972 }
0x19c5   : > { %5911 = vrcp.f32 %v3973_v63  ;;  %v3970_v16 = vpop.xlane.xlu0 %3969 }
0x19c6   : > { %5913 = vrcp.f32 %v3970_v16 }
0x19c8   : > { %v3979_v17 = vpop.xlane.xlu1 %3978 }
0x19c9   : > { %5915 = vrcp.f32 %v3979_v17  ;;  %v3976_v59 = vpop.xlane.xlu0 %3975 }
0x19ca   : > { %5917 = vrcp.f32 %v3976_v59 }
0x19cc   : > { %v3985_v18 = vpop.xlane.xlu1 %3984 }
0x19cd   : > { %5919 = vrcp.f32 %v3985_v18  ;;  %v3982_v19 = vpop.xlane.xlu0 %3981 }
0x19ce   : > { %5921 = vrcp.f32 %v3982_v19 }
0x19cf   : > { %v5912_v20 = vpop.eup %5911 }
0x19d0   : > { %v5914_v21 = vpop.eup %5913  ;;  %v3993_v29 = vmul.f32 %v5912_v20, %v5900_v35 }
0x19d1   : > { %v3992_v28 = vmul.f32 %v5914_v21, %v5902_v24 }
0x19d3   : > { %v5916_v31 = vpop.eup %5915  ;;  %5512 = vmatprep.mubr.msk.f32.mxu0 %vm3931_vm14, %v3992_v28 }
0x19d4   : > { %v5918_v34 = vpop.eup %5917  ;;  %5513 = vmatmul.mubr.msk.f32.vlgmr.msra.gmra.mrb[38].mxu0 %vm3931_vm14, %v3993_v29  ;;  %v3995_v38 = vmul.f32 %v5916_v31, %v5904_v41  ;;  %v4277_v31 = vld [vmem:[%s7034_s17 + $0x8] sm:$0xff] }
0x19d5   : > { %v3994_v36 = vmul.f32 %v5918_v34, %v5906_v37 }
0x19d7   : > { %v5920_v32 = vpop.eup %5919  ;;  %5515 = vmatprep.mubr.msk.f32.mxu0 %vm3931_vm14, %v3994_v36  ;;  %v4278_v36 = vld [vmem:[%s7034_s17 + $0x10] sm:$0xff] }
0x19d8   : > { %v5922_v46 = vpop.eup %5921  ;;  %5516 = vmatmul.mubr.msk.f32.gmra.mrb[40].mxu0 %vm3931_vm14, %v3995_v38  ;;  %v3997_v33 = vmul.f32 %v5920_v32, %v5908_v9  ;;  %v4279_v38 = vld [vmem:[%s7034_s17 + $0x18] sm:$0xff] }
0x19d9   : > { %v3996_v47 = vmul.f32 %v5922_v46, %v5910_v53  ;;  %v5767_v32 = vpack.c.bf16 %v4279_v38, %v4278_v36 }
0x19db   : > { %5518 = vmatprep.mubr.msk.f32.mxu0 %vm3931_vm14, %v3996_v47 }
0x19dc   : > { %5519 = vmatmul.mubr.msk.f32.gmra.mrb[42].mxu0 %vm3931_vm14, %v3997_v33 }
0x1aa7   : > { %v5514_v55 = vpop.f32.mrb[38].mxu0 }
0x1aa8   : > { %v4086_v56 = vpop.f32.mrb[39].mxu0  ;;  %v4116_v61 = vmul.f32 %v5945_v58, %v5514_v55  ;;  %v4964_v58 = vld [vmem:[%s7029_s12 + $0x4] ss:$0 sm:$0xff] }
0x1aa9   : > { %v4115_v3 = vmul.f32 %v5947_v2, %v4086_v56  ;;  %v4284_v2 = vld [vmem:[%s7036_s19 + $0x18] sm:$0xff] }
0x1aaa   : > { %v4123_v57 = vrot.slane %v4116_v61, 4 }
0x1aab   : > { %v5517_v62 = vpop.f32.mrb[40].mxu0 }
0x1aac   : > { %v4096_v0 = vpop.f32.mrb[41].mxu0  ;;  %v4118_v43 = vmul.f32 %v5950_v8, %v5517_v62 }
0x1aad   : > { %v4117_v60 = vmul.f32 %v5946_v1, %v4096_v0 }
0x1aaf   : > { %v4124_v13 = vrot.slane %v4117_v60, 4  ;;  %v5520_v12 = vpop.f32.mrb[42].mxu0  ;;  %v4281_v60 = vld [vmem:[%s7036_s19] sm:$0xff] }
0x1ab0   : > { %v4120_v5 = vmul.f32 %v5948_v4, %v5520_v12  ;;  %v4106_v6 = vpop.f32.mrb[43].mxu0  ;;  %v4283_v12 = vld [vmem:[%s7036_s19 + $0x10] sm:$0xff]  ;;  %v4965_v4 = vld [vmem:[%s7035_s18] ss:$0 sm:$0xff] }
0x1ab1   : > { %v4125_v39 = vsel %vm1031_vm2, %v4123_v57, %v4124_v13  ;;  %v4129_v49 = vadd.f32 %v4124_v13, %v4116_v61  ;;  %v4119_v30 = vmul.f32 %v5949_v7, %v4106_v6  ;;  %v4282_v57 = vld [vmem:[%s7036_s19 + $0x8] sm:$0xff] }
0x1ab2   : > { %v4128_v25 = vadd.f32 %v4125_v39, %v4115_v3  ;;  %v4135_v35 = vrot.slane %v4120_v5, 4  ;;  %v5771_v13 = vpack.c.bf16 %v4282_v57, %v4281_v60  ;;  %v5775_v3 = vpack.c.bf16 %v4284_v2, %v4283_v12 }
0x1ab3   : > { %v4131_v24 = vadd.f32 %v4129_v49, %v4119_v30  ;;  %v4134_v42 = vrot.slane %v4119_v30, 4 }
0x1ab4   : > { %v4130_v52 = vadd.f32 %v4128_v25, %v4118_v43  ;;  %5772 = vmatprep.subr.bf16.mxu1 %v5771_v13 }
0x1ab5   : > { %v4136_v41 = vsel %vm1031_vm2, %v4134_v42, %v4135_v35  ;;  %v4140_v37 = vadd.f32 %v4135_v35, %v4131_v24 }
0x1ab6   : > { %v4139_v27 = vadd.f32 %v4136_v41, %v4130_v52 }
0x1ab8   : > { %5529 = vmatprep.mubr.msk.f32.mxu1 %vm785_vm0, %v4139_v27 }
0x1ab9   : > { %5530 = vmatmul.mubr.msk.f32.vlgmr.msra.gmra.mrb[46].mxu1 %vm785_vm0, %v4140_v37 }
0x1aba   : > { %5774 = vmatpush3.bf16.msra.mxu1 %v5771_v13 }
0x1abb   : > { %5776 = vmatprep.subr.bf16.mxu1 %v5775_v3 }
0x1abe   : > { %5778 = vmatpush3.bf16.msra.mxu1 %v5775_v3 }
0x1b8c   : > { %v5531_v9 = vpop.f32.mrb[46].mxu1 }
0x1b8d   : > { %v4225_v53 = vadd.f32 %v5531_v9, %v4958_v23  ;;  %v4219_v10 = vpop.f32.mrb[47].mxu1 }
0x1b8e   : > { %v4220_v11 = vadd.f32 %v4958_v23, %v4219_v10 }
0x1b8f   : > { %v4229_v50 = vadd.f32 %v4225_v53, %v6778_v45 }
0x1b90   : > { %v4228_v14 = vadd.f32 %v4220_v11, %v6776_v44  ;;  %v4276_v44 = vld [vmem:[%s7034_s17] sm:$0xff] }
0x1b91   : > { %v4237_v15 = vsel %vm1478_vm6, %v4229_v50, 0.0  ;;  %v5763_v34 = vpack.c.bf16 %v4277_v31, %v4276_v44 }
0x1b92   : > { %4238 = vadd.xlane.f32.xlu1 %v4237_v15  ;;  %v4234_v63 = vsel %vm785_vm0, %v4228_v14, 0.0 }
0x1b93   : > { %4235 = vadd.xlane.f32.xlu0 %v4234_v63  ;;  %5764 = vmatprep.subr.bf16.mxu0 %v5763_v34 }
0x1b94   : > { %5766 = vmatpush3.bf16.msra.mxu0 %v5763_v34 }
0x1b95   : > { %5768 = vmatprep.subr.bf16.mxu0 %v5767_v32 }
0x1b98   : > { %5770 = vmatpush3.bf16.msra.mxu0 %v5767_v32 }
0x1c1f   : > { %v4239_v16 = vpop.xlane.xlu1 %4238 }
0x1c20   : > { %v4241_v17 = vmul.f32 0.03125, %v4239_v16  ;;  %v4236_v59 = vpop.xlane.xlu0 %4235 }
0x1c21   : > { %v4240_v18 = vmul.f32 0.03125, %v4236_v59 }
0x1c22   : > { %v4243_v19 = vsub.f32 %v4229_v50, %v4241_v17 }
0x1c23   : > { %v4242_v20 = vsub.f32 %v4228_v14, %v4240_v18 }
0x1c24   : > { %v4245_v21 = vmul.f32 %v4243_v19, %v4243_v19 }
0x1c25   : > { %v4244_v28 = vmul.f32 %v4242_v20, %v4242_v20 }
0x1c26   : > { %v4249_v29 = vsel %vm1478_vm6, %v4245_v21, 0.0 }
0x1c27   : > { %4250 = vadd.xlane.f32.xlu1 %v4249_v29  ;;  %v4246_v45 = vsel %vm785_vm0, %v4244_v28, 0.0 }
0x1c28   : > { %4247 = vadd.xlane.f32.xlu0 %v4246_v45 }
0x1cb4   : > { %v4251_v46 = vpop.xlane.xlu1 %4250 }
0x1cb5   : > { %v4253_v47 = vmul.f32 0.03125, %v4251_v46  ;;  %v4248_v33 = vpop.xlane.xlu0 %4247 }
0x1cb6   : > { %v4252_v48 = vmul.f32 0.03125, %v4248_v33 }
0x1cb7   : > { %v4255_v22 = vadd.f32 1e-05, %v4253_v47 }
0x1cb8   : > { %v4254_v40 = vadd.f32 1e-05, %v4252_v48 }
0x1cb9   : > { %5923 = vrsqrt.f32 %v4255_v22 }
0x1cba   : > { %5925 = vrsqrt.f32 %v4254_v40 }
0x1cc3   : > { %v5924_v26 = vpop.eup %5923 }
0x1cc4   : > { %v5926_v54 = vpop.eup %5925  ;;  %v4259_v55 = vmul.f32 %v5924_v26, %v4243_v19 }
0x1cc5   : > { %v4258_v56 = vmul.f32 %v5926_v54, %v4242_v20 }
0x1cc6   : > { %v4267_v61 = vmul.f32 %v4963_v51, %v4259_v55 }
0x1cc7   : > { %v4266_v62 = vmul.f32 %v4963_v51, %v4258_v56 }
0x1cc8   : > { %v6952_v1 = vadd.f32 %v4964_v58, %v4267_v61 }
0x1cc9   : > { %v6950_v0 = vadd.f32 %v4964_v58, %v4266_v62  ;;  %v4968_v62 = vld [vmem:[%s7037_s20] ss:$0 sm:$0xff] }
0x1ccb   : > { %5540 = vmatprep.mubr.msk.f32.mxu0 %vm785_vm0, %v6950_v0 }
0x1ccc   : > { %5541 = vmatmul.mubr.msk.f32.vlgmr.msra.gmra.mrb[44].mxu0 %vm785_vm0, %v6952_v1 }
0x1d9f   : > { %v5542_v5 = vpop.f32.mrb[44].mxu0 }
0x1da0   : > { %v4370_v6 = vadd.f32 %v5542_v5, %v4965_v4  ;;  %v4364_v39 = vpop.f32.mrb[45].mxu0 }
0x1da1   : > { %v4365_v49 = vadd.f32 %v4965_v4, %v4364_v39 }
0x1da2   : > { %v4376_v7 = vmul.f32 0.70710677, %v4370_v6  ;;  %v4374_v56 = vmul.f32 0.5, %v4370_v6 }
0x1da3   : > { %v4375_v30 = vmul.f32 0.70710677, %v4365_v49  ;;  %v4373_v54 = vmul.f32 0.5, %v4365_v49 }
0x1da4   : > { %v4378_v8 = vand.u32 2147483647, %v4376_v7  ;;  %vm4418_vm1 = vcmp.ge.f32.partialorder %v4376_v7, 0.0 }
0x1da5   : > { %v4377_v43 = vand.u32 2147483647, %v4375_v30  ;;  %vm4417_vm2 = vcmp.ge.f32.partialorder %v4375_v30, 0.0 }
0x1da6   : > { %v4380_v25 = vmul.f32 0.3275911, %v4378_v8  ;;  %v4406_v52 = vsub.f32 0.0, %v4378_v8 }
0x1da7   : > { %v4379_v35 = vmul.f32 0.3275911, %v4377_v43  ;;  %v4405_v41 = vsub.f32 0.0, %v4377_v43 }
0x1da8   : > { %v4382_v24 = vadd.f32 1.0, %v4380_v25  ;;  %v4408_v27 = vmul.f32 %v4406_v52, %v4378_v8  ;;  %v4564_v52 = vld [vmem:[%s7038_s21 + $0x10] sm:$0xff] }
0x1da9   : > { %v4381_v42 = vadd.f32 1.0, %v4379_v35  ;;  %v4407_v53 = vmul.f32 %v4405_v41, %v4377_v43  ;;  %v4565_v41 = vld [vmem:[%s7038_s21 + $0x18] sm:$0xff] }
0x1daa   : > { %5927 = vrcp.f32 %v4382_v24  ;;  %v4411_v50 = vmul.f32 1.442695, %v4408_v27  ;;  %v4563_v24 = vld [vmem:[%s7038_s21 + $0x8] sm:$0xff] }
0x1dab   : > { %5929 = vrcp.f32 %v4381_v42  ;;  %v4409_v63 = vmul.f32 1.442695, %v4407_v53 }
0x1dac   : > { %5931 = vpow2.f32 %v4411_v50 }
0x1dad   : > { %5933 = vpow2.f32 %v4409_v63 }
0x1db4   : > { %v5928_v37 = vpop.eup %5927 }
0x1db5   : > { %v5930_v23 = vpop.eup %5929  ;;  %v4388_v9 = vmul.f32 1.0614054, %v5928_v37 }
0x1db6   : > { %v4387_v10 = vmul.f32 1.0614054, %v5930_v23  ;;  %v5932_v34 = vpop.eup %5931 }
0x1db7   : > { %v4390_v11 = vadd.f32 -1.4531521, %v4388_v9  ;;  %v5934_v38 = vpop.eup %5933 }
0x1db8   : > { %v4389_v14 = vadd.f32 -1.4531521, %v4387_v10 }
0x1db9   : > { %v4392_v15 = vmul.f32 %v5928_v37, %v4390_v11 }
0x1dba   : > { %v4391_v16 = vmul.f32 %v5930_v23, %v4389_v14  ;;  %v4973_v14 = vld [vmem:[%s7028_s11 + $0x5] ss:$0 sm:$0xff] }
0x1dbb   : > { %v4394_v17 = vadd.f32 1.4214138, %v4392_v15 }
0x1dbc   : > { %v4393_v59 = vadd.f32 1.4214138, %v4391_v16 }
0x1dbd   : > { %v4396_v18 = vmul.f32 %v5928_v37, %v4394_v17  ;;  %v4974_v17 = vld [vmem:[%s7029_s12 + $0x5] ss:$0 sm:$0xff] }
0x1dbe   : > { %v4395_v19 = vmul.f32 %v5930_v23, %v4393_v59 }
0x1dbf   : > { %v4398_v20 = vadd.f32 -0.28449672, %v4396_v18 }
0x1dc0   : > { %v4397_v21 = vadd.f32 -0.28449672, %v4395_v19 }
0x1dc1   : > { %v4400_v28 = vmul.f32 %v5928_v37, %v4398_v20 }
0x1dc2   : > { %v4399_v29 = vmul.f32 %v5930_v23, %v4397_v21  ;;  %v4975_v21 = vld [vmem:[%s7039_s22] ss:$0 sm:$0xff] }
0x1dc3   : > { %v4402_v45 = vadd.f32 0.2548296, %v4400_v28 }
0x1dc4   : > { %v4401_v44 = vadd.f32 0.2548296, %v4399_v29 }
0x1dc5   : > { %v4404_v31 = vmul.f32 %v5928_v37, %v4402_v45  ;;  %v5783_v37 = vpack.c.bf16 %v4565_v41, %v4564_v52 }
0x1dc6   : > { %v4403_v36 = vmul.f32 %v5930_v23, %v4401_v44 }
0x1dc7   : > { %v4414_v32 = vmul.f32 %v5932_v34, %v4404_v31 }
0x1dc8   : > { %v4413_v46 = vmul.f32 %v5934_v38, %v4403_v36 }
0x1dc9   : > { %v4416_v47 = vsub.f32 1.0, %v4414_v32 }
0x1dca   : > { %v4415_v33 = vsub.f32 1.0, %v4413_v46 }
0x1dcb   : > { %v4420_v48 = vsub.f32 0.0, %v4416_v47 }
0x1dcc   : > { %v4419_v22 = vsub.f32 0.0, %v4415_v33 }
0x1dcd   : > { %v4422_v40 = vsel %vm4418_vm1, %v4416_v47, %v4420_v48 }
0x1dce   : > { %v4424_v26 = vadd.f32 1.0, %v4422_v40  ;;  %v4421_v51 = vsel %vm4417_vm2, %v4415_v33, %v4419_v22 }
0x1dcf   : > { %v4423_v55 = vadd.f32 1.0, %v4421_v51 }
0x1dd0   : > { %v4426_v61 = vmul.f32 %v4424_v26, %v4374_v56 }
0x1dd1   : > { %v4425_v58 = vmul.f32 %v4423_v55, %v4373_v54 }
0x1dd3   : > { %5551 = vmatprep.mubr.msk.f32.mxu1 %vm785_vm0, %v4425_v58 }
0x1dd4   : > { %5552 = vmatmul.mubr.msk.f32.vlgmr.msra.gmra.mrb[48].mxu1 %vm785_vm0, %v4426_v61 }
0x1ea7   : > { %v5553_v60 = vpop.f32.mrb[48].mxu1 }
0x1ea8   : > { %v4511_v57 = vadd.f32 %v5553_v60, %v4968_v62  ;;  %v4505_v13 = vpop.f32.mrb[49].mxu1 }
0x1ea9   : > { %v4506_v12 = vadd.f32 %v4968_v62, %v4505_v13 }
0x1eaa   : > { %v4515_v2 = vadd.f32 %v4511_v57, %v6952_v1 }
0x1eab   : > { %v4514_v3 = vadd.f32 %v4506_v12, %v6950_v0  ;;  %v4562_v0 = vld [vmem:[%s7038_s21] sm:$0xff] }
0x1eac   : > { %v4523_v4 = vsel %vm1478_vm6, %v4515_v2, 0.0  ;;  %v5779_v42 = vpack.c.bf16 %v4563_v24, %v4562_v0 }
0x1ead   : > { %4524 = vadd.xlane.f32.xlu1 %v4523_v4  ;;  %v4520_v5 = vsel %vm785_vm0, %v4514_v3, 0.0 }
0x1eae   : > { %4521 = vadd.xlane.f32.xlu0 %v4520_v5  ;;  %5780 = vmatprep.subr.bf16.mxu0 %v5779_v42 }
0x1eaf   : > { %5782 = vmatpush3.bf16.msra.mxu0 %v5779_v42 }
0x1eb0   : > { %5784 = vmatprep.subr.bf16.mxu0 %v5783_v37 }
0x1eb3   : > { %5786 = vmatpush3.bf16.msra.mxu0 %v5783_v37 }
0x1f3a   : > { %v4525_v6 = vpop.xlane.xlu1 %4524 }
0x1f3b   : > { %v4527_v39 = vmul.f32 0.03125, %v4525_v6  ;;  %v4522_v49 = vpop.xlane.xlu0 %4521 }
0x1f3c   : > { %v4526_v7 = vmul.f32 0.03125, %v4522_v49 }
0x1f3d   : > { %v4529_v30 = vsub.f32 %v4515_v2, %v4527_v39 }
0x1f3e   : > { %v4528_v8 = vsub.f32 %v4514_v3, %v4526_v7 }
0x1f3f   : > { %v4531_v43 = vmul.f32 %v4529_v30, %v4529_v30 }
0x1f40   : > { %v4530_v25 = vmul.f32 %v4528_v8, %v4528_v8 }
0x1f41   : > { %v4535_v35 = vsel %vm1478_vm6, %v4531_v43, 0.0 }
0x1f42   : > { %4536 = vadd.xlane.f32.xlu1 %v4535_v35  ;;  %v4532_v1 = vsel %vm785_vm0, %v4530_v25, 0.0 }
0x1f43   : > { %4533 = vadd.xlane.f32.xlu0 %v4532_v1 }
0x1fcf   : > { %v4537_v27 = vpop.xlane.xlu1 %4536 }
0x1fd0   : > { %v4539_v23 = vmul.f32 0.03125, %v4537_v27  ;;  %v4534_v9 = vpop.xlane.xlu0 %4533 }
0x1fd1   : > { %v4538_v53 = vmul.f32 0.03125, %v4534_v9 }
0x1fd2   : > { %v4541_v10 = vadd.f32 1e-05, %v4539_v23 }
0x1fd3   : > { %v4540_v11 = vadd.f32 1e-05, %v4538_v53 }
0x1fd4   : > { %5935 = vrsqrt.f32 %v4541_v10 }
0x1fd5   : > { %5937 = vrsqrt.f32 %v4540_v11 }
0x1fde   : > { %v5936_v50 = vpop.eup %5935 }
0x1fdf   : > { %v5938_v15 = vpop.eup %5937  ;;  %v4545_v63 = vmul.f32 %v5936_v50, %v4529_v30 }
0x1fe0   : > { %v4544_v16 = vmul.f32 %v5938_v15, %v4528_v8 }
0x1fe1   : > { %v4553_v59 = vmul.f32 %v4973_v14, %v4545_v63 }
0x1fe2   : > { %v4552_v18 = vmul.f32 %v4973_v14, %v4544_v16 }
0x1fe3   : > { %v4561_v20 = vadd.f32 %v4974_v17, %v4553_v59 }
0x1fe4   : > { %v4560_v19 = vadd.f32 %v4974_v17, %v4552_v18 }
0x1fe6   : > { %5562 = vmatprep.mubr.msk.f32.mxu0 %vm785_vm0, %v4560_v19 }
0x1fe7   : > { %5563 = vmatmul.mubr.msk.f32.vlgmr.msra.gmra.mrb[46].mxu0 %vm785_vm0, %v4561_v20 }
0x20ba   : > { %v5564_v28 = vpop.f32.mrb[46].mxu0 }
0x20bb   : > { %v4651_v29 = vadd.f32 %v5564_v28, %v4975_v21  ;;  %v4645_v45 = vpop.f32.mrb[47].mxu0 }
0x20bc   : > { %v4646_v44 = vadd.f32 %v4975_v21, %v4645_v45 }
0x20bd   : > { %4658 = vrot.lane.b32.xlu1 %v4651_v29, %s5963_s6 }
0x20be   : > { %4656 = vrot.lane.b32.xlu0 %v4646_v44, %s5963_s6 }
0x212f   : > { %v4659_v31 = vpop.permute.xlu1 %4658 }
0x2130   : > { %v4663_v34 = vsel %vm785_vm0, %v4561_v20, %v4659_v31  ;;  %v4657_v36 = vpop.permute.xlu0 %4656 }
0x2131   : > { %4667 = vst.msk [vmem:[%s730_s1 + $0x8] sm:$0xf] %vm4666_vm3, %v4663_v34  ;;  %v4662_v38 = vsel %vm785_vm0, %v4560_v19, %v4657_v36 }
0x2132   : > { %4665 = vst.msk [vmem:[%s730_s1] sm:$0xff] %vm4664_vm4, %v4662_v38 }
0x2133 PF: > { %s33_s4 = sadd.s32 1, %s5957_s4  }
0x2134   : > { %p30_p4 = scmp.ge.s32.totalorder %s33_s4, 4  }
0x2136   :  { %32 = sbr.rel (!%p30_p4) target bundleno = 9 (0x9), region = 189 }

</bundles_post_ra>
